<compile_context>
chip_gen: v7x
topology: tpu7x:2x2x1
jax: 0.10.0
libtpu: 0.0.40
codegen_flags: <defaults>
</compile_context>

<pallas_src>
import jax
import jax.numpy as jnp
import numpy as np
from jax.experimental import pallas as pl
from jax.experimental.pallas import tpu as pltpu

EPS = 1e-5
F32 = jnp.float32
BF16 = jnp.bfloat16


# --------------------------------------------------------------------------- #
# helpers
# --------------------------------------------------------------------------- #
def _round_up(v, m):
    return ((v + m - 1) // m) * m


def _row_tile(rows):
    """Largest row tile (multiple of 8, <=2048) dividing `rows` with >=2 tiles."""
    for t in (2048, 1024, 512, 256, 128, 64, 32, 16, 8):
        if rows % t == 0 and rows // t >= 2:
            return t
    return rows


def _images_per_step(n, hw, target_rows=256):
    """Images per pass-B grid step: smallest divisor of n giving M>=target."""
    nb = 1
    for c in range(1, n + 1):
        if n % c == 0:
            nb = c
            if c * hw >= target_rows:
                break
    return nb


def _nbytes(shape, dtype):
    return int(np.prod(shape)) * jnp.dtype(dtype).itemsize


def _cparams(vmem_bytes):
    # Working set + headroom, floored at 32 MiB and capped at 48 MiB so it is
    # always safely below v7x's 64 MiB physical VMEM (plenty on v5e/v6e too).
    vmem = min(max(int(vmem_bytes) + (8 << 20), 32 << 20), 48 << 20)
    return pltpu.CompilerParams(dimension_semantics=("parallel",),
                                vmem_limit_bytes=vmem)


def _bn_scale_shift(partial_stats, gamma, beta, count):
    """Combine per-tile (sum, sum_sq) into BN scale/shift vectors (plain JAX)."""
    s = jnp.sum(partial_stats[:, 0, :], axis=0)
    q = jnp.sum(partial_stats[:, 1, :], axis=0)
    mean = s / count
    var = jnp.maximum(q / count - mean * mean, 0.0)    # biased (training) var
    inv = jax.lax.rsqrt(var + EPS)
    scale = gamma * inv
    shift = beta - mean * scale
    return scale.reshape(1, -1), shift.reshape(1, -1)


# --------------------------------------------------------------------------- #
# kernels
# --------------------------------------------------------------------------- #
def _conv1x1_stats_kernel(x_ref, w_ref, y_ref, st_ref):
    # conv1: row-tile matmul (bf16 operands, f32 accumulation) + channel stats
    # from the f32 accumulator; activation stored back in bf16.
    y = jnp.dot(x_ref[...].astype(BF16), w_ref[...],
                preferred_element_type=jnp.float32)
    s = jnp.sum(y, axis=0, keepdims=True)
    q = jnp.sum(y * y, axis=0, keepdims=True)
    st_ref[...] = jnp.concatenate([s, q], axis=0).reshape(1, 2, -1)
    y_ref[...] = y.astype(BF16)


def _bn_relu_conv1x1_stats_kernel(h_ref, sc_ref, sh_ref, w_ref, y_ref, st_ref):
    # bn(prev, from bf16 activation) + relu fused with the next 1x1 conv.
    a = jnp.maximum(h_ref[...].astype(jnp.float32) * sc_ref[...] + sh_ref[...],
                    0.0)
    y = jnp.dot(a.astype(BF16), w_ref[...], preferred_element_type=jnp.float32)
    s = jnp.sum(y, axis=0, keepdims=True)
    q = jnp.sum(y * y, axis=0, keepdims=True)
    st_ref[...] = jnp.concatenate([s, q], axis=0).reshape(1, 2, -1)
    y_ref[...] = y.astype(BF16)


def _bn_relu_conv3x3_stats_kernel(h_ref, sc_ref, sh_ref, w_ref, y_ref, st_ref,
                                  pad_ref):
    # nB images per grid step: bn1+relu -> zero-halo pad -> 9 accumulating
    # (nB*H*W, Pp) x (Pp, Pp) MXU matmuls (no im2col scratch) + channel stats.
    B, H, W, P = h_ref.shape
    sc = sc_ref[...].reshape(1, 1, 1, P)
    sh = sh_ref[...].reshape(1, 1, 1, P)
    a = jnp.maximum(h_ref[...].astype(jnp.float32) * sc + sh, 0.0).astype(BF16)

    # Zero only the 1-element halo, single interior store.
    pad_ref[:, 0:1, :, :] = jnp.zeros((B, 1, W + 2, P), BF16)
    pad_ref[:, H + 1:H + 2, :, :] = jnp.zeros((B, 1, W + 2, P), BF16)
    pad_ref[:, 1:H + 1, 0:1, :] = jnp.zeros((B, H, 1, P), BF16)
    pad_ref[:, 1:H + 1, W + 1:W + 2, :] = jnp.zeros((B, H, 1, P), BF16)
    pad_ref[:, 1:H + 1, 1:W + 1, :] = a

    # TODO(synk): pair adjacent taps (K = 2*Pp) to fill the 256-wide MXU K dim
    # on v6e/v7x, and generate the kw-shifted taps with pltpu.roll + edge
    # masks to avoid sublane-unaligned slices.
    y = None
    for kh in range(3):
        for kw in range(3):
            t = kh * 3 + kw
            tap = pad_ref[:, kh:kh + H, kw:kw + W, :].reshape(B * H * W, P)
            d = jnp.dot(tap, w_ref[t * P:(t + 1) * P, :],
                        preferred_element_type=jnp.float32)
            y = d if y is None else y + d

    s = jnp.sum(y, axis=0, keepdims=True)
    q = jnp.sum(y * y, axis=0, keepdims=True)
    st_ref[...] = jnp.concatenate([s, q], axis=0).reshape(1, 2, -1)
    y_ref[...] = y.reshape(B, H, W, P).astype(BF16)


def _bn_add_relu_kernel(h_ref, x_ref, sc_ref, sh_ref, o_ref):
    o_ref[...] = jnp.maximum(
        h_ref[...].astype(jnp.float32) * sc_ref[...] + sh_ref[...] + x_ref[...],
        0.0)


# --------------------------------------------------------------------------- #
# wrapper
# --------------------------------------------------------------------------- #
def bottleneck_adaibn_forward(x_nchw, params):
    """Bottleneck_AdaIBN forward (ibn=None, stride=1, downsample=None).

    x_nchw: (N, inplanes, H, W) float32.  Returns NCHW float32 output.
    """
    w1, g1, b1, w2, g2, b2, w3, g3, b3 = params
    N, Cin, H, W = x_nchw.shape
    P = w1.shape[1]
    Cout = w3.shape[1]
    assert Cin == Cout, "downsample=None requires inplanes == planes * 4"

    Cp = _round_up(Cin, 128)     # lane-dense padded channel counts
    Pp = _round_up(P, 128)
    Op = _round_up(Cout, 128)    # == Cp since Cin == Cout

    # ---- wrapper-side layout / padding (once, outside the kernels) ---------
    x_nhwc = jnp.transpose(x_nchw, (0, 2, 3, 1)).astype(F32)
    x2d = jnp.pad(x_nhwc, ((0, 0), (0, 0), (0, 0), (0, Cp - Cin))).reshape(-1, Cp)
    R = N * H * W

    w1p = jnp.pad(w1, ((0, Cp - Cin), (0, Pp - P))).astype(BF16)
    w2p = jnp.pad(w2, ((0, 0), (0, Pp - P), (0, Pp - P))
                  ).reshape(9 * Pp, Pp).astype(BF16)
    w3p = jnp.pad(w3, ((0, Pp - P), (0, Op - Cout))).astype(BF16)
    g1p = jnp.pad(g1.reshape(-1), (0, Pp - P)).astype(F32)
    b1p = jnp.pad(b1.reshape(-1), (0, Pp - P)).astype(F32)
    g2p = jnp.pad(g2.reshape(-1), (0, Pp - P)).astype(F32)
    b2p = jnp.pad(b2.reshape(-1), (0, Pp - P)).astype(F32)
    g3p = jnp.pad(g3.reshape(-1), (0, Op - Cout)).astype(F32)
    b3p = jnp.pad(b3.reshape(-1), (0, Op - Cout)).astype(F32)

    TR = _row_tile(R)
    nt = R // TR

    # ---- pass A: conv1 (1x1) + stats1 ---------------------------------------
    blk_a = (_nbytes((TR, Cp), F32) + _nbytes((Cp, Pp), BF16)
             + _nbytes((TR, Pp), BF16) + _nbytes((1, 2, Pp), F32))
    tmp_a = _nbytes((TR, Pp), F32)
    h1, st1 = pl.pallas_call(
        _conv1x1_stats_kernel,
        grid=(nt,),
        in_specs=[pl.BlockSpec((TR, Cp), lambda i: (i, 0)),
                  pl.BlockSpec((Cp, Pp), lambda i: (0, 0))],
        out_specs=[pl.BlockSpec((TR, Pp), lambda i: (i, 0)),
                   pl.BlockSpec((1, 2, Pp), lambda i: (i, 0, 0))],
        out_shape=[jax.ShapeDtypeStruct((R, Pp), BF16),
                   jax.ShapeDtypeStruct((nt, 2, Pp), F32)],
        compiler_params=_cparams(2 * blk_a + tmp_a),
        cost_estimate=pl.CostEstimate(
            flops=2 * R * Cp * Pp, transcendentals=0,
            bytes_accessed=_nbytes((R, Cp), F32) + _nbytes((R, Pp), BF16)
            + _nbytes((Cp, Pp), BF16)),
    )(x2d, w1p)
    scale1, shift1 = _bn_scale_shift(st1, g1p, b1p, R)

    # ---- pass B: bn1 + relu + conv2 (3x3, 9 tap matmuls) + stats2 -----------
    nB = _images_per_step(N, H * W)
    gB = N // nB
    act_blk = _nbytes((nB, H, W, Pp), BF16)
    scr_b = _nbytes((nB, H + 2, W + 2, Pp), BF16)
    tmp_b = _nbytes((nB * H * W, Pp), F32) + _nbytes((nB, H, W, Pp), F32)
    blk_b = (2 * act_blk + 2 * _nbytes((1, Pp), F32)
             + _nbytes((9 * Pp, Pp), BF16) + _nbytes((1, 2, Pp), F32))
    h2, st2 = pl.pallas_call(
        _bn_relu_conv3x3_stats_kernel,
        grid=(gB,),
        in_specs=[pl.BlockSpec((nB, H, W, Pp), lambda n: (n, 0, 0, 0)),
                  pl.BlockSpec((1, Pp), lambda n: (0, 0)),
                  pl.BlockSpec((1, Pp), lambda n: (0, 0)),
                  pl.BlockSpec((9 * Pp, Pp), lambda n: (0, 0))],
        out_specs=[pl.BlockSpec((nB, H, W, Pp), lambda n: (n, 0, 0, 0)),
                   pl.BlockSpec((1, 2, Pp), lambda n: (n, 0, 0))],
        out_shape=[jax.ShapeDtypeStruct((N, H, W, Pp), BF16),
                   jax.ShapeDtypeStruct((gB, 2, Pp), F32)],
        scratch_shapes=[pltpu.VMEM((nB, H + 2, W + 2, Pp), BF16)],
        compiler_params=_cparams(2 * blk_b + scr_b + tmp_b),
        cost_estimate=pl.CostEstimate(
            flops=2 * R * 9 * Pp * Pp, transcendentals=0,
            bytes_accessed=2 * _nbytes((N, H, W, Pp), BF16)
            + _nbytes((9 * Pp, Pp), BF16)),
    )(h1.reshape(N, H, W, Pp), scale1, shift1, w2p)
    scale2, shift2 = _bn_scale_shift(st2, g2p, b2p, R)

    # ---- pass C: bn2 + relu + conv3 (1x1) + stats3 --------------------------
    blk_c = (_nbytes((TR, Pp), BF16) + 2 * _nbytes((1, Pp), F32)
             + _nbytes((Pp, Op), BF16) + _nbytes((TR, Op), BF16)
             + _nbytes((1, 2, Op), F32))
    tmp_c = _nbytes((TR, Pp), F32) + _nbytes((TR, Op), F32)
    h3, st3 = pl.pallas_call(
        _bn_relu_conv1x1_stats_kernel,
        grid=(nt,),
        in_specs=[pl.BlockSpec((TR, Pp), lambda i: (i, 0)),
                  pl.BlockSpec((1, Pp), lambda i: (0, 0)),
                  pl.BlockSpec((1, Pp), lambda i: (0, 0)),
                  pl.BlockSpec((Pp, Op), lambda i: (0, 0))],
        out_specs=[pl.BlockSpec((TR, Op), lambda i: (i, 0)),
                   pl.BlockSpec((1, 2, Op), lambda i: (i, 0, 0))],
        out_shape=[jax.ShapeDtypeStruct((R, Op), BF16),
                   jax.ShapeDtypeStruct((nt, 2, Op), F32)],
        compiler_params=_cparams(2 * blk_c + tmp_c),
        cost_estimate=pl.CostEstimate(
            flops=2 * R * Pp * Op, transcendentals=0,
            bytes_accessed=_nbytes((R, Pp), BF16) + _nbytes((R, Op), BF16)
            + _nbytes((Pp, Op), BF16)),
    )(h2.reshape(R, Pp), scale2, shift2, w3p)
    scale3, shift3 = _bn_scale_shift(st3, g3p, b3p, R)

    # ---- pass D: bn3 + residual add + relu (in place of the residual buffer)
    blk_d = (_nbytes((TR, Op), BF16) + _nbytes((TR, Cp), F32)
             + 2 * _nbytes((1, Op), F32) + _nbytes((TR, Op), F32))
    out2d = pl.pallas_call(
        _bn_add_relu_kernel,
        grid=(nt,),
        in_specs=[pl.BlockSpec((TR, Op), lambda i: (i, 0)),
                  pl.BlockSpec((TR, Cp), lambda i: (i, 0)),
                  pl.BlockSpec((1, Op), lambda i: (0, 0)),
                  pl.BlockSpec((1, Op), lambda i: (0, 0))],
        out_specs=pl.BlockSpec((TR, Op), lambda i: (i, 0)),
        out_shape=jax.ShapeDtypeStruct((R, Op), F32),
        input_output_aliases={1: 0},   # reuse the x2d residual buffer
        compiler_params=_cparams(2 * blk_d),
        cost_estimate=pl.CostEstimate(
            flops=4 * R * Op, transcendentals=0,
            bytes_accessed=_nbytes((R, Op), BF16) + 2 * _nbytes((R, Op), F32)),
    )(h3, x2d, scale3, shift3)

    out = out2d.reshape(N, H, W, Op)[..., :Cout]
    return jnp.transpose(out, (0, 3, 1, 2))


# --------------------------------------------------------------------------- #
# pure-JAX reference (same precision policy: bf16 conv operands, bf16
# inter-stage activation storage, f32 accumulation / BN math)
# --------------------------------------------------------------------------- #
def reference_forward(x_nchw, params):
    w1, g1, b1, w2, g2, b2, w3, g3, b3 = params
    x = jnp.transpose(x_nchw, (0, 2, 3, 1)).astype(F32)
    Cin = x.shape[-1]
    P = w1.shape[1]
    Cout = w3.shape[1]

    def conv(y, w_hwio, pad):
        return jax.lax.conv_general_dilated(
            y.astype(BF16), w_hwio.astype(BF16),
            window_strides=(1, 1), padding=[(pad, pad), (pad, pad)],
            dimension_numbers=('NHWC', 'HWIO', 'NHWC'),
            preferred_element_type=F32)

    def bn_scale_shift(y, g, b):
        mean = jnp.mean(y, axis=(0, 1, 2))
        var = jnp.mean((y - mean.reshape(1, 1, 1, -1)) ** 2, axis=(0, 1, 2))
        inv = jax.lax.rsqrt(var + EPS)
        scale = g.reshape(-1) * inv
        shift = b.reshape(-1) - mean * scale
        return scale.reshape(1, 1, 1, -1), shift.reshape(1, 1, 1, -1)

    y1 = conv(x, w1.reshape(1, 1, Cin, P), 0)
    s1, t1 = bn_scale_shift(y1, g1, b1)
    a1 = jax.nn.relu(y1.astype(BF16).astype(F32) * s1 + t1)

    y2 = conv(a1, w2.reshape(3, 3, P, P), 1)
    s2, t2 = bn_scale_shift(y2, g2, b2)
    a2 = jax.nn.relu(y2.astype(BF16).astype(F32) * s2 + t2)

    y3 = conv(a2, w3.reshape(1, 1, P, Cout), 0)
    s3, t3 = bn_scale_shift(y3, g3, b3)
    out = jax.nn.relu(y3.astype(BF16).astype(F32) * s3 + t3 + x)
    return jnp.transpose(out, (0, 3, 1, 2))


def make_params(key, inplanes, planes):
    expansion = 4
    cout = planes * expansion
    ks = jax.random.split(key, 9)
    w1 = 0.1 * jax.random.normal(ks[0], (inplanes, planes), F32)
    w2 = 0.1 * jax.random.normal(ks[1], (9, planes, planes), F32)
    w3 = 0.1 * jax.random.normal(ks[2], (planes, cout), F32)
    g1 = 1.0 + 0.1 * jax.random.normal(ks[3], (1, planes), F32)
    b1 = 0.1 * jax.random.normal(ks[4], (1, planes), F32)
    g2 = 1.0 + 0.1 * jax.random.normal(ks[5], (1, planes), F32)
    b2 = 0.1 * jax.random.normal(ks[6], (1, planes), F32)
    g3 = 1.0 + 0.1 * jax.random.normal(ks[7], (1, cout), F32)
    b3 = 0.1 * jax.random.normal(ks[8], (1, cout), F32)
    return (w1, g1, b1, w2, g2, b2, w3, g3, b3)


if __name__ == "__main__":
    key = jax.random.PRNGKey(0)
    k_x, k_p = jax.random.split(key)

    # Small but representative bottleneck shapes: inplanes == planes * 4.
    N, planes, H, W = 2, 16, 16, 16
    inplanes = planes * 4
    x = jax.random.normal(k_x, (N, inplanes, H, W), F32)
    params = make_params(k_p, inplanes, planes)

    fwd = jax.jit(bottleneck_adaibn_forward)
    out = jax.block_until_ready(fwd(x, params))
    ref = jax.block_until_ready(reference_forward(x, params))

    np.testing.assert_allclose(np.asarray(out), np.asarray(ref),
                               rtol=2e-3, atol=2e-3)
    print("KERNEL_OK")
</pallas_src>

<mosaic_0001>
module attributes {stable_mosaic.version = 11 : i64} {
  func.func @_conv1x1_stats_kernel(%arg0: i32, %arg1: memref<256x128xf32, #tpu.memory_space<vmem>>, %arg2: memref<128x128xbf16, #tpu.memory_space<vmem>>, %arg3: memref<256x128xbf16, #tpu.memory_space<vmem>>, %arg4: memref<1x2x128xf32, #tpu.memory_space<vmem>>) attributes {dimension_semantics = [#tpu.dimension_semantics<parallel>], iteration_bounds = array<i64: 2>, scalar_prefetch = 0 : i64, scratch_operands = 0 : i64, tpu.core_type = #tpu.core_type<tc>, window_params = [{transform_indices = @transform_0, window_bounds = array<i64: 256, 128>}, {pipeline_mode = #tpu.pipeline_mode<synchronous>, transform_indices = @transform_1, window_bounds = array<i64: 128, 128>}, {transform_indices = @transform_2, window_bounds = array<i64: 256, 128>}, {transform_indices = @transform_3, window_bounds = array<i64: 1, 2, 128>}]} {
    %c0 = arith.constant 0 : index
    %c0_0 = arith.constant 0 : index
    %0 = vector.load %arg1[%c0, %c0_0] : memref<256x128xf32, #tpu.memory_space<vmem>>, vector<256x128xf32>
    %1 = arith.truncf %0 : vector<256x128xf32> to vector<256x128xbf16>
    %c0_1 = arith.constant 0 : index
    %c0_2 = arith.constant 0 : index
    %2 = vector.load %arg2[%c0_1, %c0_2] : memref<128x128xbf16, #tpu.memory_space<vmem>>, vector<128x128xbf16>
    %cst = arith.constant dense<0.000000e+00> : vector<256x128xf32>
    %3 = tpu.matmul %1, %2, %cst {dimension_numbers = #tpu.dot_dimension_numbers<[1], [0], [0], [1], [0, 0, 1, 1], [], []>} : vector<256x128xbf16>, vector<128x128xbf16>, vector<256x128xf32> -> vector<256x128xf32>
    %cst_3 = arith.constant dense<0.000000e+00> : vector<128xf32>
    %4 = vector.multi_reduction <add>, %3, %cst_3 [0] : vector<256x128xf32> to vector<128xf32>
    %5 = vector.shape_cast %4 : vector<128xf32> to vector<1x128xf32>
    %6 = arith.mulf %3, %3 : vector<256x128xf32>
    %cst_4 = arith.constant dense<0.000000e+00> : vector<128xf32>
    %7 = vector.multi_reduction <add>, %6, %cst_4 [0] : vector<256x128xf32> to vector<128xf32>
    %8 = vector.shape_cast %7 : vector<128xf32> to vector<1x128xf32>
    %9 = tpu.concatenate %5, %8 in 0 : vector<1x128xf32>, vector<1x128xf32> -> vector<2x128xf32>
    %10 = vector.shape_cast %9 : vector<2x128xf32> to vector<1x2x128xf32>
    %c0_5 = arith.constant 0 : index
    %c0_6 = arith.constant 0 : index
    %c0_7 = arith.constant 0 : index
    %11 = vector.load %arg4[%c0_5, %c0_6, %c0_7] : memref<1x2x128xf32, #tpu.memory_space<vmem>>, vector<1x2x128xf32>
    tpu.vector_store %arg4[%c0_5, %c0_6, %c0_7], %10 {strides = array<i32>} : memref<1x2x128xf32, #tpu.memory_space<vmem>>, vector<1x2x128xf32>,
    %12 = arith.truncf %3 : vector<256x128xf32> to vector<256x128xbf16>
    %c0_8 = arith.constant 0 : index
    %c0_9 = arith.constant 0 : index
    %13 = vector.load %arg3[%c0_8, %c0_9] : memref<256x128xbf16, #tpu.memory_space<vmem>>, vector<256x128xbf16>
    tpu.vector_store %arg3[%c0_8, %c0_9], %12 {strides = array<i32>} : memref<256x128xbf16, #tpu.memory_space<vmem>>, vector<256x128xbf16>,
    return
  }
  func.func @transform_0(%arg0: i32) -> (i32, i32) {
    %c0_i32 = arith.constant 0 : i32
    %c0_i32_0 = arith.constant 0 : i32
    return %arg0, %c0_i32 : i32, i32
  }
  func.func @transform_1(%arg0: i32) -> (i32, i32) {
    %c0_i32 = arith.constant 0 : i32
    %c0_i32_0 = arith.constant 0 : i32
    %c0_i32_1 = arith.constant 0 : i32
    return %c0_i32, %c0_i32_0 : i32, i32
  }
  func.func @transform_2(%arg0: i32) -> (i32, i32) {
    %c0_i32 = arith.constant 0 : i32
    %c0_i32_0 = arith.constant 0 : i32
    return %arg0, %c0_i32 : i32, i32
  }
  func.func @transform_3(%arg0: i32) -> (i32, i32, i32) {
    %c0_i32 = arith.constant 0 : i32
    %c0_i32_0 = arith.constant 0 : i32
    %c0_i32_1 = arith.constant 0 : i32
    return %arg0, %c0_i32, %c0_i32_0 : i32, i32, i32
  }
}

module attributes {stable_mosaic.version = 11 : i64} {
  func.func @_bn_relu_conv1x1_stats_kernel(%arg0: i32, %arg1: memref<256x128xbf16, #tpu.memory_space<vmem>>, %arg2: memref<1x128xf32, #tpu.memory_space<vmem>>, %arg3: memref<1x128xf32, #tpu.memory_space<vmem>>, %arg4: memref<128x128xbf16, #tpu.memory_space<vmem>>, %arg5: memref<256x128xbf16, #tpu.memory_space<vmem>>, %arg6: memref<1x2x128xf32, #tpu.memory_space<vmem>>) attributes {dimension_semantics = [#tpu.dimension_semantics<parallel>], iteration_bounds = array<i64: 2>, scalar_prefetch = 0 : i64, scratch_operands = 0 : i64, tpu.core_type = #tpu.core_type<tc>, window_params = [{transform_indices = @transform_0, window_bounds = array<i64: 256, 128>}, {pipeline_mode = #tpu.pipeline_mode<synchronous>, transform_indices = @transform_1, window_bounds = array<i64: 1, 128>}, {pipeline_mode = #tpu.pipeline_mode<synchronous>, transform_indices = @transform_2, window_bounds = array<i64: 1, 128>}, {pipeline_mode = #tpu.pipeline_mode<synchronous>, transform_indices = @transform_3, window_bounds = array<i64: 128, 128>}, {transform_indices = @transform_4, window_bounds = array<i64: 256, 128>}, {transform_indices = @transform_5, window_bounds = array<i64: 1, 2, 128>}]} {
    %c0 = arith.constant 0 : index
    %c0_0 = arith.constant 0 : index
    %0 = vector.load %arg1[%c0, %c0_0] : memref<256x128xbf16, #tpu.memory_space<vmem>>, vector<256x128xbf16>
    %1 = arith.extf %0 : vector<256x128xbf16> to vector<256x128xf32>
    %c0_1 = arith.constant 0 : index
    %c0_2 = arith.constant 0 : index
    %2 = vector.load %arg2[%c0_1, %c0_2] : memref<1x128xf32, #tpu.memory_space<vmem>>, vector<1x128xf32>
    %3 = vector.broadcast %2 : vector<1x128xf32> to vector<256x128xf32>
    %4 = arith.mulf %1, %3 : vector<256x128xf32>
    %c0_3 = arith.constant 0 : index
    %c0_4 = arith.constant 0 : index
    %5 = vector.load %arg3[%c0_3, %c0_4] : memref<1x128xf32, #tpu.memory_space<vmem>>, vector<1x128xf32>
    %6 = vector.broadcast %5 : vector<1x128xf32> to vector<256x128xf32>
    %7 = arith.addf %4, %6 : vector<256x128xf32>
    %cst = arith.constant 0.000000e+00 : f32
    %8 = vector.broadcast %cst : f32 to vector<256x128xf32>
    %9 = arith.maximumf %7, %8 : vector<256x128xf32>
    %10 = arith.truncf %9 : vector<256x128xf32> to vector<256x128xbf16>
    %c0_5 = arith.constant 0 : index
    %c0_6 = arith.constant 0 : index
    %11 = vector.load %arg4[%c0_5, %c0_6] : memref<128x128xbf16, #tpu.memory_space<vmem>>, vector<128x128xbf16>
    %cst_7 = arith.constant dense<0.000000e+00> : vector<256x128xf32>
    %12 = tpu.matmul %10, %11, %cst_7 {dimension_numbers = #tpu.dot_dimension_numbers<[1], [0], [0], [1], [0, 0, 1, 1], [], []>} : vector<256x128xbf16>, vector<128x128xbf16>, vector<256x128xf32> -> vector<256x128xf32>
    %cst_8 = arith.constant dense<0.000000e+00> : vector<128xf32>
    %13 = vector.multi_reduction <add>, %12, %cst_8 [0] : vector<256x128xf32> to vector<128xf32>
    %14 = vector.shape_cast %13 : vector<128xf32> to vector<1x128xf32>
    %15 = arith.mulf %12, %12 : vector<256x128xf32>
    %cst_9 = arith.constant dense<0.000000e+00> : vector<128xf32>
    %16 = vector.multi_reduction <add>, %15, %cst_9 [0] : vector<256x128xf32> to vector<128xf32>
    %17 = vector.shape_cast %16 : vector<128xf32> to vector<1x128xf32>
    %18 = tpu.concatenate %14, %17 in 0 : vector<1x128xf32>, vector<1x128xf32> -> vector<2x128xf32>
    %19 = vector.shape_cast %18 : vector<2x128xf32> to vector<1x2x128xf32>
    %c0_10 = arith.constant 0 : index
    %c0_11 = arith.constant 0 : index
    %c0_12 = arith.constant 0 : index
    %20 = vector.load %arg6[%c0_10, %c0_11, %c0_12] : memref<1x2x128xf32, #tpu.memory_space<vmem>>, vector<1x2x128xf32>
    tpu.vector_store %arg6[%c0_10, %c0_11, %c0_12], %19 {strides = array<i32>} : memref<1x2x128xf32, #tpu.memory_space<vmem>>, vector<1x2x128xf32>,
    %21 = arith.truncf %12 : vector<256x128xf32> to vector<256x128xbf16>
    %c0_13 = arith.constant 0 : index
    %c0_14 = arith.constant 0 : index
    %22 = vector.load %arg5[%c0_13, %c0_14] : memref<256x128xbf16, #tpu.memory_space<vmem>>, vector<256x128xbf16>
    tpu.vector_store %arg5[%c0_13, %c0_14], %21 {strides = array<i32>} : memref<256x128xbf16, #tpu.memory_space<vmem>>, vector<256x128xbf16>,
    return
  }
  func.func @transform_0(%arg0: i32) -> (i32, i32) {
    %c0_i32 = arith.constant 0 : i32
    %c0_i32_0 = arith.constant 0 : i32
    return %arg0, %c0_i32 : i32, i32
  }
  func.func @transform_1(%arg0: i32) -> (i32, i32) {
    %c0_i32 = arith.constant 0 : i32
    %c0_i32_0 = arith.constant 0 : i32
    %c0_i32_1 = arith.constant 0 : i32
    return %c0_i32, %c0_i32_0 : i32, i32
  }
  func.func @transform_2(%arg0: i32) -> (i32, i32) {
    %c0_i32 = arith.constant 0 : i32
    %c0_i32_0 = arith.constant 0 : i32
    %c0_i32_1 = arith.constant 0 : i32
    return %c0_i32, %c0_i32_0 : i32, i32
  }
  func.func @transform_3(%arg0: i32) -> (i32, i32) {
    %c0_i32 = arith.constant 0 : i32
    %c0_i32_0 = arith.constant 0 : i32
    %c0_i32_1 = arith.constant 0 : i32
    return %c0_i32, %c0_i32_0 : i32, i32
  }
  func.func @transform_4(%arg0: i32) -> (i32, i32) {
    %c0_i32 = arith.constant 0 : i32
    %c0_i32_0 = arith.constant 0 : i32
    return %arg0, %c0_i32 : i32, i32
  }
  func.func @transform_5(%arg0: i32) -> (i32, i32, i32) {
    %c0_i32 = arith.constant 0 : i32
    %c0_i32_0 = arith.constant 0 : i32
    %c0_i32_1 = arith.constant 0 : i32
    return %arg0, %c0_i32, %c0_i32_0 : i32, i32, i32
  }
}

module attributes {stable_mosaic.version = 11 : i64} {
  func.func @_bn_relu_conv3x3_stats_kernel(%arg0: i32, %arg1: memref<1x16x16x128xbf16, #tpu.memory_space<vmem>>, %arg2: memref<1x128xf32, #tpu.memory_space<vmem>>, %arg3: memref<1x128xf32, #tpu.memory_space<vmem>>, %arg4: memref<1152x128xbf16, #tpu.memory_space<vmem>>, %arg5: memref<1x16x16x128xbf16, #tpu.memory_space<vmem>>, %arg6: memref<1x2x128xf32, #tpu.memory_space<vmem>>, %arg7: memref<1x18x18x128xbf16, #tpu.memory_space<vmem>>) attributes {dimension_semantics = [#tpu.dimension_semantics<parallel>], iteration_bounds = array<i64: 2>, scalar_prefetch = 0 : i64, scratch_operands = 1 : i64, tpu.core_type = #tpu.core_type<tc>, window_params = [{transform_indices = @transform_0, window_bounds = array<i64: 1, 16, 16, 128>}, {pipeline_mode = #tpu.pipeline_mode<synchronous>, transform_indices = @transform_1, window_bounds = array<i64: 1, 128>}, {pipeline_mode = #tpu.pipeline_mode<synchronous>, transform_indices = @transform_2, window_bounds = array<i64: 1, 128>}, {pipeline_mode = #tpu.pipeline_mode<synchronous>, transform_indices = @transform_3, window_bounds = array<i64: 1152, 128>}, {transform_indices = @transform_4, window_bounds = array<i64: 1, 16, 16, 128>}, {transform_indices = @transform_5, window_bounds = array<i64: 1, 2, 128>}]} {
    %c0 = arith.constant 0 : index
    %c0_0 = arith.constant 0 : index
    %0 = vector.load %arg2[%c0, %c0_0] : memref<1x128xf32, #tpu.memory_space<vmem>>, vector<1x128xf32>
    %1 = vector.shape_cast %0 : vector<1x128xf32> to vector<1x1x1x128xf32>
    %c0_1 = arith.constant 0 : index
    %c0_2 = arith.constant 0 : index
    %2 = vector.load %arg3[%c0_1, %c0_2] : memref<1x128xf32, #tpu.memory_space<vmem>>, vector<1x128xf32>
    %3 = vector.shape_cast %2 : vector<1x128xf32> to vector<1x1x1x128xf32>
    %c0_3 = arith.constant 0 : index
    %c0_4 = arith.constant 0 : index
    %c0_5 = arith.constant 0 : index
    %c0_6 = arith.constant 0 : index
    %4 = vector.load %arg1[%c0_3, %c0_4, %c0_5, %c0_6] : memref<1x16x16x128xbf16, #tpu.memory_space<vmem>>, vector<1x16x16x128xbf16>
    %5 = arith.extf %4 : vector<1x16x16x128xbf16> to vector<1x16x16x128xf32>
    %6 = vector.broadcast %1 : vector<1x1x1x128xf32> to vector<1x16x16x128xf32>
    %7 = arith.mulf %5, %6 : vector<1x16x16x128xf32>
    %8 = vector.broadcast %3 : vector<1x1x1x128xf32> to vector<1x16x16x128xf32>
    %9 = arith.addf %7, %8 : vector<1x16x16x128xf32>
    %cst = arith.constant 0.000000e+00 : f32
    %10 = vector.broadcast %cst : f32 to vector<1x16x16x128xf32>
    %11 = arith.maximumf %9, %10 : vector<1x16x16x128xf32>
    %12 = arith.truncf %11 : vector<1x16x16x128xf32> to vector<1x16x16x128xbf16>
    %cst_7 = arith.constant 0.000000e+00 : bf16
    %13 = vector.broadcast %cst_7 : bf16 to vector<1x1x18x128xbf16>
    %c0_8 = arith.constant 0 : index
    %c0_9 = arith.constant 0 : index
    %c0_10 = arith.constant 0 : index
    %c0_11 = arith.constant 0 : index
    %14 = vector.load %arg7[%c0_8, %c0_9, %c0_10, %c0_11] : memref<1x18x18x128xbf16, #tpu.memory_space<vmem>>, vector<1x1x18x128xbf16>
    tpu.vector_store %arg7[%c0_8, %c0_9, %c0_10, %c0_11], %13 {strides = array<i32>} : memref<1x18x18x128xbf16, #tpu.memory_space<vmem>>, vector<1x1x18x128xbf16>,
    %cst_12 = arith.constant 0.000000e+00 : bf16
    %15 = vector.broadcast %cst_12 : bf16 to vector<1x1x18x128xbf16>
    %c0_13 = arith.constant 0 : index
    %c17 = arith.constant 17 : index
    %c0_14 = arith.constant 0 : index
    %c0_15 = arith.constant 0 : index
    %16 = vector.load %arg7[%c0_13, %c17, %c0_14, %c0_15] : memref<1x18x18x128xbf16, #tpu.memory_space<vmem>>, vector<1x1x18x128xbf16>
    tpu.vector_store %arg7[%c0_13, %c17, %c0_14, %c0_15], %15 {strides = array<i32>} : memref<1x18x18x128xbf16, #tpu.memory_space<vmem>>, vector<1x1x18x128xbf16>,
    %cst_16 = arith.constant 0.000000e+00 : bf16
    %17 = vector.broadcast %cst_16 : bf16 to vector<1x16x1x128xbf16>
    %c0_17 = arith.constant 0 : index
    %c1 = arith.constant 1 : index
    %c0_18 = arith.constant 0 : index
    %c0_19 = arith.constant 0 : index
    %18 = vector.load %arg7[%c0_17, %c1, %c0_18, %c0_19] : memref<1x18x18x128xbf16, #tpu.memory_space<vmem>>, vector<1x16x1x128xbf16>
    tpu.vector_store %arg7[%c0_17, %c1, %c0_18, %c0_19], %17 {strides = array<i32>} : memref<1x18x18x128xbf16, #tpu.memory_space<vmem>>, vector<1x16x1x128xbf16>,
    %cst_20 = arith.constant 0.000000e+00 : bf16
    %19 = vector.broadcast %cst_20 : bf16 to vector<1x16x1x128xbf16>
    %c0_21 = arith.constant 0 : index
    %c1_22 = arith.constant 1 : index
    %c17_23 = arith.constant 17 : index
    %c0_24 = arith.constant 0 : index
    %20 = vector.load %arg7[%c0_21, %c1_22, %c17_23, %c0_24] : memref<1x18x18x128xbf16, #tpu.memory_space<vmem>>, vector<1x16x1x128xbf16>
    tpu.vector_store %arg7[%c0_21, %c1_22, %c17_23, %c0_24], %19 {strides = array<i32>} : memref<1x18x18x128xbf16, #tpu.memory_space<vmem>>, vector<1x16x1x128xbf16>,
    %c0_25 = arith.constant 0 : index
    %c1_26 = arith.constant 1 : index
    %c1_27 = arith.constant 1 : index
    %c0_28 = arith.constant 0 : index
    %21 = vector.load %arg7[%c0_25, %c1_26, %c1_27, %c0_28] : memref<1x18x18x128xbf16, #tpu.memory_space<vmem>>, vector<1x16x16x128xbf16>
    tpu.vector_store %arg7[%c0_25, %c1_26, %c1_27, %c0_28], %12 {strides = array<i32>} : memref<1x18x18x128xbf16, #tpu.memory_space<vmem>>, vector<1x16x16x128xbf16>,
    %c0_29 = arith.constant 0 : index
    %c0_30 = arith.constant 0 : index
    %c0_31 = arith.constant 0 : index
    %c0_32 = arith.constant 0 : index
    %22 = vector.load %arg7[%c0_29, %c0_30, %c0_31, %c0_32] : memref<1x18x18x128xbf16, #tpu.memory_space<vmem>>, vector<1x16x16x128xbf16>
    %23 = vector.shape_cast %22 : vector<1x16x16x128xbf16> to vector<256x128xbf16>
    %c0_33 = arith.constant 0 : index
    %c0_34 = arith.constant 0 : index
    %24 = vector.load %arg4[%c0_33, %c0_34] : memref<1152x128xbf16, #tpu.memory_space<vmem>>, vector<128x128xbf16>
    %cst_35 = arith.constant dense<0.000000e+00> : vector<256x128xf32>
    %25 = tpu.matmul %23, %24, %cst_35 {dimension_numbers = #tpu.dot_dimension_numbers<[1], [0], [0], [1], [0, 0, 1, 1], [], []>} : vector<256x128xbf16>, vector<128x128xbf16>, vector<256x128xf32> -> vector<256x128xf32>
    %c0_36 = arith.constant 0 : index
    %c0_37 = arith.constant 0 : index
    %c1_38 = arith.constant 1 : index
    %c0_39 = arith.constant 0 : index
    %26 = vector.load %arg7[%c0_36, %c0_37, %c1_38, %c0_39] : memref<1x18x18x128xbf16, #tpu.memory_space<vmem>>, vector<1x16x16x128xbf16>
    %27 = vector.shape_cast %26 : vector<1x16x16x128xbf16> to vector<256x128xbf16>
    %c128 = arith.constant 128 : index
    %c0_40 = arith.constant 0 : index
    %28 = vector.load %arg4[%c128, %c0_40] : memref<1152x128xbf16, #tpu.memory_space<vmem>>, vector<128x128xbf16>
    %cst_41 = arith.constant dense<0.000000e+00> : vector<256x128xf32>
    %29 = tpu.matmul %27, %28, %cst_41 {dimension_numbers = #tpu.dot_dimension_numbers<[1], [0], [0], [1], [0, 0, 1, 1], [], []>} : vector<256x128xbf16>, vector<128x128xbf16>, vector<256x128xf32> -> vector<256x128xf32>
    %30 = arith.addf %25, %29 : vector<256x128xf32>
    %c0_42 = arith.constant 0 : index
    %c0_43 = arith.constant 0 : index
    %c2 = arith.constant 2 : index
    %c0_44 = arith.constant 0 : index
    %31 = vector.load %arg7[%c0_42, %c0_43, %c2, %c0_44] : memref<1x18x18x128xbf16, #tpu.memory_space<vmem>>, vector<1x16x16x128xbf16>
    %32 = vector.shape_cast %31 : vector<1x16x16x128xbf16> to vector<256x128xbf16>
    %c256 = arith.constant 256 : index
    %c0_45 = arith.constant 0 : index
    %33 = vector.load %arg4[%c256, %c0_45] : memref<1152x128xbf16, #tpu.memory_space<vmem>>, vector<128x128xbf16>
    %cst_46 = arith.constant dense<0.000000e+00> : vector<256x128xf32>
    %34 = tpu.matmul %32, %33, %cst_46 {dimension_numbers = #tpu.dot_dimension_numbers<[1], [0], [0], [1], [0, 0, 1, 1], [], []>} : vector<256x128xbf16>, vector<128x128xbf16>, vector<256x128xf32> -> vector<256x128xf32>
    %35 = arith.addf %30, %34 : vector<256x128xf32>
    %c0_47 = arith.constant 0 : index
    %c1_48 = arith.constant 1 : index
    %c0_49 = arith.constant 0 : index
    %c0_50 = arith.constant 0 : index
    %36 = vector.load %arg7[%c0_47, %c1_48, %c0_49, %c0_50] : memref<1x18x18x128xbf16, #tpu.memory_space<vmem>>, vector<1x16x16x128xbf16>
    %37 = vector.shape_cast %36 : vector<1x16x16x128xbf16> to vector<256x128xbf16>
    %c384 = arith.constant 384 : index
    %c0_51 = arith.constant 0 : index
    %38 = vector.load %arg4[%c384, %c0_51] : memref<1152x128xbf16, #tpu.memory_space<vmem>>, vector<128x128xbf16>
    %cst_52 = arith.constant dense<0.000000e+00> : vector<256x128xf32>
    %39 = tpu.matmul %37, %38, %cst_52 {dimension_numbers = #tpu.dot_dimension_numbers<[1], [0], [0], [1], [0, 0, 1, 1], [], []>} : vector<256x128xbf16>, vector<128x128xbf16>, vector<256x128xf32> -> vector<256x128xf32>
    %40 = arith.addf %35, %39 : vector<256x128xf32>
    %c0_53 = arith.constant 0 : index
    %c1_54 = arith.constant 1 : index
    %c1_55 = arith.constant 1 : index
    %c0_56 = arith.constant 0 : index
    %41 = vector.load %arg7[%c0_53, %c1_54, %c1_55, %c0_56] : memref<1x18x18x128xbf16, #tpu.memory_space<vmem>>, vector<1x16x16x128xbf16>
    %42 = vector.shape_cast %41 : vector<1x16x16x128xbf16> to vector<256x128xbf16>
    %c512 = arith.constant 512 : index
    %c0_57 = arith.constant 0 : index
    %43 = vector.load %arg4[%c512, %c0_57] : memref<1152x128xbf16, #tpu.memory_space<vmem>>, vector<128x128xbf16>
    %cst_58 = arith.constant dense<0.000000e+00> : vector<256x128xf32>
    %44 = tpu.matmul %42, %43, %cst_58 {dimension_numbers = #tpu.dot_dimension_numbers<[1], [0], [0], [1], [0, 0, 1, 1], [], []>} : vector<256x128xbf16>, vector<128x128xbf16>, vector<256x128xf32> -> vector<256x128xf32>
    %45 = arith.addf %40, %44 : vector<256x128xf32>
    %c0_59 = arith.constant 0 : index
    %c1_60 = arith.constant 1 : index
    %c2_61 = arith.constant 2 : index
    %c0_62 = arith.constant 0 : index
    %46 = vector.load %arg7[%c0_59, %c1_60, %c2_61, %c0_62] : memref<1x18x18x128xbf16, #tpu.memory_space<vmem>>, vector<1x16x16x128xbf16>
    %47 = vector.shape_cast %46 : vector<1x16x16x128xbf16> to vector<256x128xbf16>
    %c640 = arith.constant 640 : index
    %c0_63 = arith.constant 0 : index
    %48 = vector.load %arg4[%c640, %c0_63] : memref<1152x128xbf16, #tpu.memory_space<vmem>>, vector<128x128xbf16>
    %cst_64 = arith.constant dense<0.000000e+00> : vector<256x128xf32>
    %49 = tpu.matmul %47, %48, %cst_64 {dimension_numbers = #tpu.dot_dimension_numbers<[1], [0], [0], [1], [0, 0, 1, 1], [], []>} : vector<256x128xbf16>, vector<128x128xbf16>, vector<256x128xf32> -> vector<256x128xf32>
    %50 = arith.addf %45, %49 : vector<256x128xf32>
    %c0_65 = arith.constant 0 : index
    %c2_66 = arith.constant 2 : index
    %c0_67 = arith.constant 0 : index
    %c0_68 = arith.constant 0 : index
    %51 = vector.load %arg7[%c0_65, %c2_66, %c0_67, %c0_68] : memref<1x18x18x128xbf16, #tpu.memory_space<vmem>>, vector<1x16x16x128xbf16>
    %52 = vector.shape_cast %51 : vector<1x16x16x128xbf16> to vector<256x128xbf16>
    %c768 = arith.constant 768 : index
    %c0_69 = arith.constant 0 : index
    %53 = vector.load %arg4[%c768, %c0_69] : memref<1152x128xbf16, #tpu.memory_space<vmem>>, vector<128x128xbf16>
    %cst_70 = arith.constant dense<0.000000e+00> : vector<256x128xf32>
    %54 = tpu.matmul %52, %53, %cst_70 {dimension_numbers = #tpu.dot_dimension_numbers<[1], [0], [0], [1], [0, 0, 1, 1], [], []>} : vector<256x128xbf16>, vector<128x128xbf16>, vector<256x128xf32> -> vector<256x128xf32>
    %55 = arith.addf %50, %54 : vector<256x128xf32>
    %c0_71 = arith.constant 0 : index
    %c2_72 = arith.constant 2 : index
    %c1_73 = arith.constant 1 : index
    %c0_74 = arith.constant 0 : index
    %56 = vector.load %arg7[%c0_71, %c2_72, %c1_73, %c0_74] : memref<1x18x18x128xbf16, #tpu.memory_space<vmem>>, vector<1x16x16x128xbf16>
    %57 = vector.shape_cast %56 : vector<1x16x16x128xbf16> to vector<256x128xbf16>
    %c896 = arith.constant 896 : index
    %c0_75 = arith.constant 0 : index
    %58 = vector.load %arg4[%c896, %c0_75] : memref<1152x128xbf16, #tpu.memory_space<vmem>>, vector<128x128xbf16>
    %cst_76 = arith.constant dense<0.000000e+00> : vector<256x128xf32>
    %59 = tpu.matmul %57, %58, %cst_76 {dimension_numbers = #tpu.dot_dimension_numbers<[1], [0], [0], [1], [0, 0, 1, 1], [], []>} : vector<256x128xbf16>, vector<128x128xbf16>, vector<256x128xf32> -> vector<256x128xf32>
    %60 = arith.addf %55, %59 : vector<256x128xf32>
    %c0_77 = arith.constant 0 : index
    %c2_78 = arith.constant 2 : index
    %c2_79 = arith.constant 2 : index
    %c0_80 = arith.constant 0 : index
    %61 = vector.load %arg7[%c0_77, %c2_78, %c2_79, %c0_80] : memref<1x18x18x128xbf16, #tpu.memory_space<vmem>>, vector<1x16x16x128xbf16>
    %62 = vector.shape_cast %61 : vector<1x16x16x128xbf16> to vector<256x128xbf16>
    %c1024 = arith.constant 1024 : index
    %c0_81 = arith.constant 0 : index
    %63 = vector.load %arg4[%c1024, %c0_81] : memref<1152x128xbf16, #tpu.memory_space<vmem>>, vector<128x128xbf16>
    %cst_82 = arith.constant dense<0.000000e+00> : vector<256x128xf32>
    %64 = tpu.matmul %62, %63, %cst_82 {dimension_numbers = #tpu.dot_dimension_numbers<[1], [0], [0], [1], [0, 0, 1, 1], [], []>} : vector<256x128xbf16>, vector<128x128xbf16>, vector<256x128xf32> -> vector<256x128xf32>
    %65 = arith.addf %60, %64 : vector<256x128xf32>
    %cst_83 = arith.constant dense<0.000000e+00> : vector<128xf32>
    %66 = vector.multi_reduction <add>, %65, %cst_83 [0] : vector<256x128xf32> to vector<128xf32>
    %67 = vector.shape_cast %66 : vector<128xf32> to vector<1x128xf32>
    %68 = arith.mulf %65, %65 : vector<256x128xf32>
    %cst_84 = arith.constant dense<0.000000e+00> : vector<128xf32>
    %69 = vector.multi_reduction <add>, %68, %cst_84 [0] : vector<256x128xf32> to vector<128xf32>
    %70 = vector.shape_cast %69 : vector<128xf32> to vector<1x128xf32>
    %71 = tpu.concatenate %67, %70 in 0 : vector<1x128xf32>, vector<1x128xf32> -> vector<2x128xf32>
    %72 = vector.shape_cast %71 : vector<2x128xf32> to vector<1x2x128xf32>
    %c0_85 = arith.constant 0 : index
    %c0_86 = arith.constant 0 : index
    %c0_87 = arith.constant 0 : index
    %73 = vector.load %arg6[%c0_85, %c0_86, %c0_87] : memref<1x2x128xf32, #tpu.memory_space<vmem>>, vector<1x2x128xf32>
    tpu.vector_store %arg6[%c0_85, %c0_86, %c0_87], %72 {strides = array<i32>} : memref<1x2x128xf32, #tpu.memory_space<vmem>>, vector<1x2x128xf32>,
    %74 = vector.shape_cast %65 : vector<256x128xf32> to vector<1x16x16x128xf32>
    %75 = arith.truncf %74 : vector<1x16x16x128xf32> to vector<1x16x16x128xbf16>
    %c0_88 = arith.constant 0 : index
    %c0_89 = arith.constant 0 : index
    %c0_90 = arith.constant 0 : index
    %c0_91 = arith.constant 0 : index
    %76 = vector.load %arg5[%c0_88, %c0_89, %c0_90, %c0_91] : memref<1x16x16x128xbf16, #tpu.memory_space<vmem>>, vector<1x16x16x128xbf16>
    tpu.vector_store %arg5[%c0_88, %c0_89, %c0_90, %c0_91], %75 {strides = array<i32>} : memref<1x16x16x128xbf16, #tpu.memory_space<vmem>>, vector<1x16x16x128xbf16>,
    return
  }
  func.func @transform_0(%arg0: i32) -> (i32, i32, i32, i32) {
    %c0_i32 = arith.constant 0 : i32
    %c0_i32_0 = arith.constant 0 : i32
    %c0_i32_1 = arith.constant 0 : i32
    %c0_i32_2 = arith.constant 0 : i32
    return %arg0, %c0_i32, %c0_i32_0, %c0_i32_1 : i32, i32, i32, i32
  }
  func.func @transform_1(%arg0: i32) -> (i32, i32) {
    %c0_i32 = arith.constant 0 : i32
    %c0_i32_0 = arith.constant 0 : i32
    %c0_i32_1 = arith.constant 0 : i32
    return %c0_i32, %c0_i32_0 : i32, i32
  }
  func.func @transform_2(%arg0: i32) -> (i32, i32) {
    %c0_i32 = arith.constant 0 : i32
    %c0_i32_0 = arith.constant 0 : i32
    %c0_i32_1 = arith.constant 0 : i32
    return %c0_i32, %c0_i32_0 : i32, i32
  }
  func.func @transform_3(%arg0: i32) -> (i32, i32) {
    %c0_i32 = arith.constant 0 : i32
    %c0_i32_0 = arith.constant 0 : i32
    %c0_i32_1 = arith.constant 0 : i32
    return %c0_i32, %c0_i32_0 : i32, i32
  }
  func.func @transform_4(%arg0: i32) -> (i32, i32, i32, i32) {
    %c0_i32 = arith.constant 0 : i32
    %c0_i32_0 = arith.constant 0 : i32
    %c0_i32_1 = arith.constant 0 : i32
    %c0_i32_2 = arith.constant 0 : i32
    return %arg0, %c0_i32, %c0_i32_0, %c0_i32_1 : i32, i32, i32, i32
  }
  func.func @transform_5(%arg0: i32) -> (i32, i32, i32) {
    %c0_i32 = arith.constant 0 : i32
    %c0_i32_0 = arith.constant 0 : i32
    %c0_i32_1 = arith.constant 0 : i32
    return %arg0, %c0_i32, %c0_i32_0 : i32, i32, i32
  }
}

module attributes {stable_mosaic.version = 11 : i64} {
  func.func @_bn_add_relu_kernel(%arg0: i32, %arg1: memref<256x128xbf16, #tpu.memory_space<vmem>>, %arg2: memref<256x128xf32, #tpu.memory_space<vmem>>, %arg3: memref<1x128xf32, #tpu.memory_space<vmem>>, %arg4: memref<1x128xf32, #tpu.memory_space<vmem>>, %arg5: memref<256x128xf32, #tpu.memory_space<vmem>>) attributes {dimension_semantics = [#tpu.dimension_semantics<parallel>], iteration_bounds = array<i64: 2>, scalar_prefetch = 0 : i64, scratch_operands = 0 : i64, tpu.core_type = #tpu.core_type<tc>, window_params = [{transform_indices = @transform_0, window_bounds = array<i64: 256, 128>}, {transform_indices = @transform_1, window_bounds = array<i64: 256, 128>}, {pipeline_mode = #tpu.pipeline_mode<synchronous>, transform_indices = @transform_2, window_bounds = array<i64: 1, 128>}, {pipeline_mode = #tpu.pipeline_mode<synchronous>, transform_indices = @transform_3, window_bounds = array<i64: 1, 128>}, {transform_indices = @transform_4, window_bounds = array<i64: 256, 128>}]} {
    %c0 = arith.constant 0 : index
    %c0_0 = arith.constant 0 : index
    %0 = vector.load %arg1[%c0, %c0_0] : memref<256x128xbf16, #tpu.memory_space<vmem>>, vector<256x128xbf16>
    %1 = arith.extf %0 : vector<256x128xbf16> to vector<256x128xf32>
    %c0_1 = arith.constant 0 : index
    %c0_2 = arith.constant 0 : index
    %2 = vector.load %arg3[%c0_1, %c0_2] : memref<1x128xf32, #tpu.memory_space<vmem>>, vector<1x128xf32>
    %3 = vector.broadcast %2 : vector<1x128xf32> to vector<256x128xf32>
    %4 = arith.mulf %1, %3 : vector<256x128xf32>
    %c0_3 = arith.constant 0 : index
    %c0_4 = arith.constant 0 : index
    %5 = vector.load %arg4[%c0_3, %c0_4] : memref<1x128xf32, #tpu.memory_space<vmem>>, vector<1x128xf32>
    %6 = vector.broadcast %5 : vector<1x128xf32> to vector<256x128xf32>
    %7 = arith.addf %4, %6 : vector<256x128xf32>
    %c0_5 = arith.constant 0 : index
    %c0_6 = arith.constant 0 : index
    %8 = vector.load %arg2[%c0_5, %c0_6] : memref<256x128xf32, #tpu.memory_space<vmem>>, vector<256x128xf32>
    %9 = arith.addf %7, %8 : vector<256x128xf32>
    %cst = arith.constant 0.000000e+00 : f32
    %10 = vector.broadcast %cst : f32 to vector<256x128xf32>
    %11 = arith.maximumf %9, %10 : vector<256x128xf32>
    %c0_7 = arith.constant 0 : index
    %c0_8 = arith.constant 0 : index
    %12 = vector.load %arg5[%c0_7, %c0_8] : memref<256x128xf32, #tpu.memory_space<vmem>>, vector<256x128xf32>
    tpu.vector_store %arg5[%c0_7, %c0_8], %11 {strides = array<i32>} : memref<256x128xf32, #tpu.memory_space<vmem>>, vector<256x128xf32>,
    return
  }
  func.func @transform_0(%arg0: i32) -> (i32, i32) {
    %c0_i32 = arith.constant 0 : i32
    %c0_i32_0 = arith.constant 0 : i32
    return %arg0, %c0_i32 : i32, i32
  }
  func.func @transform_1(%arg0: i32) -> (i32, i32) {
    %c0_i32 = arith.constant 0 : i32
    %c0_i32_0 = arith.constant 0 : i32
    return %arg0, %c0_i32 : i32, i32
  }
  func.func @transform_2(%arg0: i32) -> (i32, i32) {
    %c0_i32 = arith.constant 0 : i32
    %c0_i32_0 = arith.constant 0 : i32
    %c0_i32_1 = arith.constant 0 : i32
    return %c0_i32, %c0_i32_0 : i32, i32
  }
  func.func @transform_3(%arg0: i32) -> (i32, i32) {
    %c0_i32 = arith.constant 0 : i32
    %c0_i32_0 = arith.constant 0 : i32
    %c0_i32_1 = arith.constant 0 : i32
    return %c0_i32, %c0_i32_0 : i32, i32
  }
  func.func @transform_4(%arg0: i32) -> (i32, i32) {
    %c0_i32 = arith.constant 0 : i32
    %c0_i32_0 = arith.constant 0 : i32
    return %arg0, %c0_i32 : i32, i32
  }
}

</mosaic_0001>

<bundles_post_ra>
// kernel: bottleneck_adaibn_forward.7
= control target key start
LH: loop header
LB: loop body
LE: loop exit
PB: predicated region body
PF: predicated region fallthrough
CT: control target
= control target key end

     0   :  { %s696_s15 = smov 0   ;;  %s852_s0 = inlined_call_operand.vmem [shape: bf16[512,128], index: 0, kind: input, shape index: {}]   ;;  %s853_s1 = inlined_call_operand.vmem [shape: f32[512,128], index: 1, kind: input, shape index: {}, may-alias: {1,4}]   ;;  %s854_s2 = inlined_call_operand.vmem [shape: f32[1,128], index: 2, kind: input, shape index: {}]   ;;  %s855_s3 = inlined_call_operand.vmem [shape: f32[1,128], index: 3, kind: input, shape index: {}]   ;;  %s856_s4 = inlined_call_operand.vmem [shape: f32[512,128], index: 4, kind: output, shape index: {}, may-alias: {1,4}]  }
   0x1 LB: > { %s561_s16 = sadd.s32 4294967295, %s669_s15   ;;  %p565_p0 = scmp.ge.s32.totalorder %s669_s15, 1  ;;  %s669_s15 = sphi %s696_s15, %s14_s15  }
   0x2   : > { %p174_p1 = scmp.lt.s32.totalorder %s669_s15, 3 }
   0x4   : > { %p175_p2 = pnand %p565_p0, %p174_p1 }
   0x5   : > { %s566_s17 = sshll.u32 (!%p175_p2), %s561_s16, 5  ;;  %v572_v40 = vld [vmem:[%s854_s2] ss:$0 sm:$0xff] (!%p175_p2) }
   0x6   : > { %178 = sbr.rel (%p175_p2) target bundleno = 67 (0x43), region = 36  ;;  %p206_p3 = scmp.lt.s32.totalorder (!%p175_p2), %s566_s17, 63 }
   0xd   : > { %s858_s17 = smov (!%p206_p3, %s566_s17), 63 }
   0xe   : > { %s567_s18 = sshll.u32 %s858_s17, 2  ;;  %s569_s24 = sshll.u32 %s858_s17, 3 }
   0xf   : > { %s710_s21 = scalar_lea.vmem %s852_s0, %s567_s18  ;;  %s740_s29 = scalar_lea.vmem %s853_s1, %s569_s24 }
  0x10   : > { %v577_v0 = vld [vmem:[%s710_s21] sm:$0xff]   ;;  %v640_v1 = vld [vmem:[%s710_s21 + $0x8] sm:$0xff]   ;;  %v641_v2 = vld [vmem:[%s710_s21 + $0x10] sm:$0xff]   ;;  %s795_s6 = scalar_lea.vmem %s856_s4, %s569_s24 }
  0x11   : > { %v578_v3 = vunpack.c.l.bf16 %v577_v0  ;;  %v579_v4 = vunpack.c.h.bf16 %v577_v0  ;;  %v582_v5 = vunpack.c.l.bf16 %v640_v1  ;;  %v583_v6 = vunpack.c.h.bf16 %v640_v1  ;;  %v642_v7 = vld [vmem:[%s710_s21 + $0x18] sm:$0xff]   ;;  %v643_v8 = vld [vmem:[%s710_s21 + $0x20] sm:$0xff]   ;;  %v644_v9 = vld [vmem:[%s710_s21 + $0x28] sm:$0xff]  }
  0x12   : > { %v586_v10 = vunpack.c.l.bf16 %v641_v2  ;;  %v587_v11 = vunpack.c.h.bf16 %v641_v2  ;;  %v590_v12 = vunpack.c.l.bf16 %v642_v7  ;;  %v591_v13 = vunpack.c.h.bf16 %v642_v7  ;;  %v645_v14 = vld [vmem:[%s710_s21 + $0x30] sm:$0xff]   ;;  %v646_v15 = vld [vmem:[%s710_s21 + $0x38] sm:$0xff]   ;;  %v647_v16 = vld [vmem:[%s710_s21 + $0x40] sm:$0xff]  }
  0x13   : > { %v594_v17 = vunpack.c.l.bf16 %v643_v8  ;;  %v595_v18 = vunpack.c.h.bf16 %v643_v8  ;;  %v598_v19 = vunpack.c.l.bf16 %v644_v9  ;;  %v599_v20 = vunpack.c.h.bf16 %v644_v9  ;;  %v648_v21 = vld [vmem:[%s710_s21 + $0x48] sm:$0xff]   ;;  %v649_v22 = vld [vmem:[%s710_s21 + $0x50] sm:$0xff]   ;;  %v650_v23 = vld [vmem:[%s710_s21 + $0x58] sm:$0xff]  }
  0x14   : > { %v602_v24 = vunpack.c.l.bf16 %v645_v14  ;;  %v603_v25 = vunpack.c.h.bf16 %v645_v14  ;;  %v606_v26 = vunpack.c.l.bf16 %v646_v15  ;;  %v607_v27 = vunpack.c.h.bf16 %v646_v15  ;;  %v651_v28 = vld [vmem:[%s710_s21 + $0x60] sm:$0xff]   ;;  %v652_v29 = vld [vmem:[%s710_s21 + $0x68] sm:$0xff]   ;;  %v653_v34 = vld [vmem:[%s710_s21 + $0x70] sm:$0xff]  }
  0x15   : > { %v610_v30 = vunpack.c.l.bf16 %v647_v16  ;;  %v611_v31 = vunpack.c.h.bf16 %v647_v16  ;;  %v614_v32 = vunpack.c.l.bf16 %v648_v21  ;;  %v615_v33 = vunpack.c.h.bf16 %v648_v21  ;;  %v654_v35 = vld [vmem:[%s710_s21 + $0x78] sm:$0xff]   ;;  %v573_v9 = vld [vmem:[%s855_s3] ss:$0 sm:$0xff] }
  0x16   : > { %v618_v36 = vunpack.c.l.bf16 %v649_v22  ;;  %v619_v37 = vunpack.c.h.bf16 %v649_v22  ;;  %v622_v38 = vunpack.c.l.bf16 %v650_v23  ;;  %v623_v39 = vunpack.c.h.bf16 %v650_v23 }
  0x17   : > { %v626_v41 = vunpack.c.l.bf16 %v651_v28  ;;  %v627_v42 = vunpack.c.h.bf16 %v651_v28  ;;  %v630_v43 = vunpack.c.l.bf16 %v652_v29  ;;  %v631_v44 = vunpack.c.h.bf16 %v652_v29 }
  0x18   : > { %v634_v45 = vunpack.c.l.bf16 %v653_v34  ;;  %v635_v46 = vunpack.c.h.bf16 %v653_v34  ;;  %v638_v47 = vunpack.c.l.bf16 %v654_v35  ;;  %v639_v48 = vunpack.c.h.bf16 %v654_v35  ;;  %v365_v34 = vld [vmem:[%s740_s29] sm:$0xff]  ;;  %v366_v35 = vld [vmem:[%s740_s29 + $0x8] sm:$0xff] }
  0x19   : > { %v294_v49 = vmul.f32 %v578_v3, %v572_v40  ;;  %v295_v50 = vmul.f32 %v579_v4, %v572_v40  ;;  %v296_v51 = vmul.f32 %v582_v5, %v572_v40  ;;  %v297_v52 = vmul.f32 %v583_v6, %v572_v40 }
  0x1a   : > { %v298_v53 = vmul.f32 %v586_v10, %v572_v40  ;;  %v299_v54 = vmul.f32 %v587_v11, %v572_v40  ;;  %v300_v55 = vmul.f32 %v590_v12, %v572_v40  ;;  %v301_v56 = vmul.f32 %v591_v13, %v572_v40 }
  0x1b   : > { %v302_v57 = vmul.f32 %v594_v17, %v572_v40  ;;  %v303_v58 = vmul.f32 %v595_v18, %v572_v40  ;;  %v304_v59 = vmul.f32 %v598_v19, %v572_v40  ;;  %v305_v60 = vmul.f32 %v599_v20, %v572_v40 }
  0x1c   : > { %v306_v61 = vmul.f32 %v602_v24, %v572_v40  ;;  %v307_v62 = vmul.f32 %v603_v25, %v572_v40  ;;  %v308_v63 = vmul.f32 %v606_v26, %v572_v40  ;;  %v309_v0 = vmul.f32 %v607_v27, %v572_v40 }
  0x1d   : > { %v310_v1 = vmul.f32 %v610_v30, %v572_v40  ;;  %v311_v2 = vmul.f32 %v611_v31, %v572_v40  ;;  %v312_v7 = vmul.f32 %v614_v32, %v572_v40  ;;  %v313_v3 = vmul.f32 %v615_v33, %v572_v40 }
  0x1e   : > { %v314_v4 = vmul.f32 %v618_v36, %v572_v40  ;;  %v315_v5 = vmul.f32 %v619_v37, %v572_v40  ;;  %v316_v6 = vmul.f32 %v622_v38, %v572_v40  ;;  %v317_v8 = vmul.f32 %v623_v39, %v572_v40  ;;  %v367_v36 = vld [vmem:[%s740_s29 + $0x10] sm:$0xff]  ;;  %v368_v37 = vld [vmem:[%s740_s29 + $0x18] sm:$0xff] }
  0x1f   : > { %v318_v10 = vmul.f32 %v626_v41, %v572_v40  ;;  %v319_v11 = vmul.f32 %v627_v42, %v572_v40  ;;  %v320_v12 = vmul.f32 %v630_v43, %v572_v40  ;;  %v321_v13 = vmul.f32 %v631_v44, %v572_v40  ;;  %v369_v42 = vld [vmem:[%s740_s29 + $0x20] sm:$0xff]  ;;  %v370_v43 = vld [vmem:[%s740_s29 + $0x28] sm:$0xff]  ;;  %v371_v44 = vld [vmem:[%s740_s29 + $0x30] sm:$0xff] }
  0x20   : > { %v322_v14 = vmul.f32 %v634_v45, %v572_v40  ;;  %v323_v15 = vmul.f32 %v635_v46, %v572_v40  ;;  %v324_v16 = vmul.f32 %v638_v47, %v572_v40  ;;  %v325_v17 = vmul.f32 %v639_v48, %v572_v40  ;;  %v372_v45 = vld [vmem:[%s740_s29 + $0x38] sm:$0xff] }
  0x21   : > { %v333_v18 = vadd.f32 %v573_v9, %v294_v49  ;;  %v334_v19 = vadd.f32 %v573_v9, %v295_v50  ;;  %v335_v20 = vadd.f32 %v573_v9, %v296_v51  ;;  %v336_v21 = vadd.f32 %v573_v9, %v297_v52  ;;  %v373_v50 = vld [vmem:[%s740_s29 + $0x40] sm:$0xff]  ;;  %v374_v51 = vld [vmem:[%s740_s29 + $0x48] sm:$0xff]  ;;  %v375_v52 = vld [vmem:[%s740_s29 + $0x50] sm:$0xff] }
  0x22   : > { %v337_v22 = vadd.f32 %v573_v9, %v298_v53  ;;  %v338_v23 = vadd.f32 %v573_v9, %v299_v54  ;;  %v339_v24 = vadd.f32 %v573_v9, %v300_v55  ;;  %v340_v25 = vadd.f32 %v573_v9, %v301_v56 }
  0x23   : > { %v341_v26 = vadd.f32 %v573_v9, %v302_v57  ;;  %v342_v27 = vadd.f32 %v573_v9, %v303_v58  ;;  %v343_v28 = vadd.f32 %v573_v9, %v304_v59  ;;  %v344_v29 = vadd.f32 %v573_v9, %v305_v60  ;;  %v376_v57 = vld [vmem:[%s740_s29 + $0x58] sm:$0xff]  ;;  %v377_v58 = vld [vmem:[%s740_s29 + $0x60] sm:$0xff]  ;;  %v378_v59 = vld [vmem:[%s740_s29 + $0x68] sm:$0xff] }
  0x24   : > { %v345_v30 = vadd.f32 %v573_v9, %v306_v61  ;;  %v346_v31 = vadd.f32 %v573_v9, %v307_v62  ;;  %v347_v32 = vadd.f32 %v573_v9, %v308_v63  ;;  %v348_v33 = vadd.f32 %v573_v9, %v309_v0  ;;  %v379_v0 = vld [vmem:[%s740_s29 + $0x70] sm:$0xff] }
  0x25   : > { %v349_v38 = vadd.f32 %v573_v9, %v310_v1  ;;  %v350_v39 = vadd.f32 %v573_v9, %v311_v2  ;;  %v351_v40 = vadd.f32 %v573_v9, %v312_v7  ;;  %v352_v41 = vadd.f32 %v573_v9, %v313_v3  ;;  %v380_v1 = vld [vmem:[%s740_s29 + $0x78] sm:$0xff]  ;;  %v381_v2 = vld [vmem:[%s740_s29 + $0x80] sm:$0xff]  ;;  %v382_v7 = vld [vmem:[%s740_s29 + $0x88] sm:$0xff] }
  0x26   : > { %v353_v46 = vadd.f32 %v573_v9, %v314_v4  ;;  %v354_v47 = vadd.f32 %v573_v9, %v315_v5  ;;  %v355_v48 = vadd.f32 %v573_v9, %v316_v6  ;;  %v356_v49 = vadd.f32 %v573_v9, %v317_v8  ;;  %v383_v3 = vld [vmem:[%s740_s29 + $0x90] sm:$0xff]  ;;  %v384_v4 = vld [vmem:[%s740_s29 + $0x98] sm:$0xff] }
  0x27   : > { %v357_v53 = vadd.f32 %v573_v9, %v318_v10  ;;  %v358_v54 = vadd.f32 %v573_v9, %v319_v11  ;;  %v359_v55 = vadd.f32 %v573_v9, %v320_v12  ;;  %v360_v56 = vadd.f32 %v573_v9, %v321_v13  ;;  %v385_v11 = vld [vmem:[%s740_s29 + $0xa0] sm:$0xff]  ;;  %v386_v12 = vld [vmem:[%s740_s29 + $0xa8] sm:$0xff]  ;;  %v387_v13 = vld [vmem:[%s740_s29 + $0xb0] sm:$0xff] }
  0x28   : > { %v361_v60 = vadd.f32 %v573_v9, %v322_v14  ;;  %v362_v61 = vadd.f32 %v573_v9, %v323_v15  ;;  %v363_v62 = vadd.f32 %v573_v9, %v324_v16  ;;  %v364_v63 = vadd.f32 %v573_v9, %v325_v17  ;;  %v388_v17 = vld [vmem:[%s740_s29 + $0xb8] sm:$0xff] }
  0x29   : > { %v397_v5 = vadd.f32 %v365_v34, %v333_v18  ;;  %v398_v6 = vadd.f32 %v366_v35, %v334_v19  ;;  %v399_v8 = vadd.f32 %v367_v36, %v335_v20  ;;  %v400_v10 = vadd.f32 %v368_v37, %v336_v21  ;;  %v389_v18 = vld [vmem:[%s740_s29 + $0xc0] sm:$0xff]  ;;  %v390_v34 = vld [vmem:[%s740_s29 + $0xc8] sm:$0xff]  ;;  %v391_v21 = vld [vmem:[%s740_s29 + $0xd0] sm:$0xff] }
  0x2a   : > { %v401_v9 = vadd.f32 %v369_v42, %v337_v22  ;;  %v402_v14 = vadd.f32 %v370_v43, %v338_v23  ;;  %v403_v15 = vadd.f32 %v371_v44, %v339_v24  ;;  %v404_v16 = vadd.f32 %v372_v45, %v340_v25  ;;  %v392_v37 = vld [vmem:[%s740_s29 + $0xd8] sm:$0xff]  ;;  %v393_v22 = vld [vmem:[%s740_s29 + $0xe0] sm:$0xff]  ;;  %v394_v44 = vld [vmem:[%s740_s29 + $0xe8] sm:$0xff] }
  0x2b   : > { %v405_v19 = vadd.f32 %v373_v50, %v341_v26  ;;  %v406_v35 = vadd.f32 %v374_v51, %v342_v27  ;;  %v407_v20 = vadd.f32 %v375_v52, %v343_v28  ;;  %v408_v36 = vadd.f32 %v376_v57, %v344_v29  ;;  %v395_v25 = vld [vmem:[%s740_s29 + $0xf0] sm:$0xff]  ;;  %v396_v45 = vld [vmem:[%s740_s29 + $0xf8] sm:$0xff] }
  0x2c   : > { %v409_v42 = vadd.f32 %v377_v58, %v345_v30  ;;  %v410_v23 = vadd.f32 %v378_v59, %v346_v31  ;;  %v411_v43 = vadd.f32 %v379_v0, %v347_v32  ;;  %v412_v24 = vadd.f32 %v380_v1, %v348_v33 }
  0x2d   : > { %v413_v26 = vadd.f32 %v381_v2, %v349_v38  ;;  %v414_v50 = vadd.f32 %v382_v7, %v350_v39  ;;  %v415_v27 = vadd.f32 %v383_v3, %v351_v40  ;;  %v416_v51 = vadd.f32 %v384_v4, %v352_v41 }
  0x2e   : > { %v774_v28 = vadd.f32 %v385_v11, %v353_v46  ;;  %v776_v52 = vadd.f32 %v386_v12, %v354_v47  ;;  %v778_v29 = vadd.f32 %v387_v13, %v355_v48  ;;  %v780_v57 = vadd.f32 %v388_v17, %v356_v49 }
  0x2f   : > { %v782_v30 = vadd.f32 %v389_v18, %v357_v53  ;;  %v784_v31 = vadd.f32 %v390_v34, %v358_v54  ;;  %v786_v32 = vadd.f32 %v391_v21, %v359_v55  ;;  %v788_v33 = vadd.f32 %v392_v37, %v360_v56 }
  0x30   : > { %v797_v38 = vadd.f32 %v393_v22, %v361_v60  ;;  %v799_v39 = vadd.f32 %v394_v44, %v362_v61  ;;  %v801_v40 = vadd.f32 %v395_v25, %v363_v62  ;;  %v803_v41 = vadd.f32 %v396_v45, %v364_v63 }
  0x31   : > { %v429_v46 = vmax.f32 %v397_v5, 0.0  ;;  %v430_v47 = vmax.f32 %v398_v6, 0.0  ;;  %v431_v48 = vmax.f32 %v399_v8, 0.0  ;;  %v432_v49 = vmax.f32 %v400_v10, 0.0 }
  0x32   : > { %v433_v53 = vmax.f32 %v401_v9, 0.0  ;;  %v434_v54 = vmax.f32 %v402_v14, 0.0  ;;  %v435_v55 = vmax.f32 %v403_v15, 0.0  ;;  %v436_v56 = vmax.f32 %v404_v16, 0.0 }
  0x33   : > { %v437_v58 = vmax.f32 %v405_v19, 0.0  ;;  %v438_v59 = vmax.f32 %v406_v35, 0.0  ;;  %v439_v60 = vmax.f32 %v407_v20, 0.0  ;;  %v440_v61 = vmax.f32 %v408_v36, 0.0  ;;  %461 = vst [vmem:[%s795_s6] sm:$0xff] %v429_v46  ;;  %462 = vst [vmem:[%s795_s6 + $0x8] sm:$0xff] %v430_v47 }
  0x34   : > { %463 = vst [vmem:[%s795_s6 + $0x10] sm:$0xff] %v431_v48  ;;  %464 = vst [vmem:[%s795_s6 + $0x18] sm:$0xff] %v432_v49  ;;  %v441_v62 = vmax.f32 %v409_v42, 0.0  ;;  %v442_v63 = vmax.f32 %v410_v23, 0.0  ;;  %v443_v0 = vmax.f32 %v411_v43, 0.0  ;;  %v444_v1 = vmax.f32 %v412_v24, 0.0 }
  0x35   : > { %465 = vst [vmem:[%s795_s6 + $0x20] sm:$0xff] %v433_v53  ;;  %466 = vst [vmem:[%s795_s6 + $0x28] sm:$0xff] %v434_v54  ;;  %v445_v2 = vmax.f32 %v413_v26, 0.0  ;;  %v446_v7 = vmax.f32 %v414_v50, 0.0  ;;  %v447_v3 = vmax.f32 %v415_v27, 0.0  ;;  %v448_v4 = vmax.f32 %v416_v51, 0.0 }
  0x36   : > { %467 = vst [vmem:[%s795_s6 + $0x30] sm:$0xff] %v435_v55  ;;  %468 = vst [vmem:[%s795_s6 + $0x38] sm:$0xff] %v436_v56  ;;  %v449_v5 = vmax.f32 %v774_v28, 0.0  ;;  %v450_v6 = vmax.f32 %v776_v52, 0.0  ;;  %v451_v8 = vmax.f32 %v778_v29, 0.0  ;;  %v452_v10 = vmax.f32 %v780_v57, 0.0 }
  0x37   : > { %469 = vst [vmem:[%s795_s6 + $0x40] sm:$0xff] %v437_v58  ;;  %470 = vst [vmem:[%s795_s6 + $0x48] sm:$0xff] %v438_v59  ;;  %v453_v11 = vmax.f32 %v782_v30, 0.0  ;;  %v454_v12 = vmax.f32 %v784_v31, 0.0  ;;  %v455_v13 = vmax.f32 %v786_v32, 0.0  ;;  %v456_v9 = vmax.f32 %v788_v33, 0.0 }
  0x38   : > { %471 = vst [vmem:[%s795_s6 + $0x50] sm:$0xff] %v439_v60  ;;  %472 = vst [vmem:[%s795_s6 + $0x58] sm:$0xff] %v440_v61  ;;  %v457_v14 = vmax.f32 %v797_v38, 0.0  ;;  %v458_v15 = vmax.f32 %v799_v39, 0.0  ;;  %v459_v16 = vmax.f32 %v801_v40, 0.0  ;;  %v460_v17 = vmax.f32 %v803_v41, 0.0 }
  0x39   : > { %473 = vst [vmem:[%s795_s6 + $0x60] sm:$0xff] %v441_v62  ;;  %474 = vst [vmem:[%s795_s6 + $0x68] sm:$0xff] %v442_v63 }
  0x3a   : > { %475 = vst [vmem:[%s795_s6 + $0x70] sm:$0xff] %v443_v0  ;;  %476 = vst [vmem:[%s795_s6 + $0x78] sm:$0xff] %v444_v1 }
  0x3b   : > { %477 = vst [vmem:[%s795_s6 + $0x80] sm:$0xff] %v445_v2  ;;  %478 = vst [vmem:[%s795_s6 + $0x88] sm:$0xff] %v446_v7 }
  0x3c   : > { %479 = vst [vmem:[%s795_s6 + $0x90] sm:$0xff] %v447_v3  ;;  %480 = vst [vmem:[%s795_s6 + $0x98] sm:$0xff] %v448_v4 }
  0x3d   : > { %481 = vst [vmem:[%s795_s6 + $0xa0] sm:$0xff] %v449_v5  ;;  %482 = vst [vmem:[%s795_s6 + $0xa8] sm:$0xff] %v450_v6 }
  0x3e   : > { %483 = vst [vmem:[%s795_s6 + $0xb0] sm:$0xff] %v451_v8  ;;  %484 = vst [vmem:[%s795_s6 + $0xb8] sm:$0xff] %v452_v10 }
  0x3f   : > { %485 = vst [vmem:[%s795_s6 + $0xc0] sm:$0xff] %v453_v11  ;;  %486 = vst [vmem:[%s795_s6 + $0xc8] sm:$0xff] %v454_v12 }
  0x40   : > { %487 = vst [vmem:[%s795_s6 + $0xd0] sm:$0xff] %v455_v13  ;;  %488 = vst [vmem:[%s795_s6 + $0xd8] sm:$0xff] %v456_v9 }
  0x41   : > { %489 = vst [vmem:[%s795_s6 + $0xe0] sm:$0xff] %v457_v14  ;;  %490 = vst [vmem:[%s795_s6 + $0xe8] sm:$0xff] %v458_v15 }
  0x42   : > { %491 = vst [vmem:[%s795_s6 + $0xf0] sm:$0xff] %v459_v16  ;;  %492 = vst [vmem:[%s795_s6 + $0xf8] sm:$0xff] %v460_v17 }
  0x43 PF: > { %s14_s15 = sadd.s32 1, %s669_s15  }
  0x44   : > { %p11_p4 = scmp.ge.s32.totalorder %s14_s15, 4  }
  0x46   :  { %13 = sbr.rel (!%p11_p4) target bundleno = 1 (0x1), region = 69 }

// kernel: bottleneck_adaibn_forward.6
= control target key start
LH: loop header
LB: loop body
LE: loop exit
PB: predicated region body
PF: predicated region fallthrough
CT: control target
= control target key end

     0   :  { %s1413_s18 = smov 0   ;;  %s1681_s0 = inlined_call_operand.vmem [shape: bf16[512,128], index: 0, kind: input, shape index: {}]   ;;  %s1682_s1 = inlined_call_operand.vmem [shape: f32[1,128], index: 1, kind: input, shape index: {}]   ;;  %s1683_s2 = inlined_call_operand.vmem [shape: f32[1,128], index: 2, kind: input, shape index: {}]   ;;  %s1684_s3 = inlined_call_operand.vmem [shape: bf16[128,128], index: 3, kind: input, shape index: {}]   ;;  %s1685_s4 = inlined_call_operand.vmem [shape: bf16[512,128], index: 4, kind: output, shape index: {0}]   ;;  %s1686_s5 = inlined_call_operand.vmem [shape: f32[2,2,128], index: 5, kind: output, shape index: {1}]  }
   0x1 LB: > { %s1419_s19 = sadd.s32 4294967295, %s1381_s18   ;;  %p1015_p0 = scmp.ge.s32.totalorder %s1381_s18, 1  ;;  %s1381_s18 = sphi %s1413_s18, %s16_s18  }
   0x2   : > { %p191_p1 = scmp.lt.s32.totalorder %s1381_s18, 3 }
   0x4   : > { %p192_p2 = pnand %p1015_p0, %p191_p1 }
   0x5   : > { %v1367_v0 = vld [vmem:[%s1684_s3] sm:$0xff] (!%p192_p2)   ;;  %s1016_s22 = sshll.u32 (!%p192_p2), %s1419_s19, 5  ;;  %v1368_v1 = vld [vmem:[%s1684_s3 + $0x8] sm:$0xff] (!%p192_p2)   ;;  %v1369_v2 = vld [vmem:[%s1684_s3 + $0x10] sm:$0xff] (!%p192_p2)   ;;  %p235_p4 = scmp.lt.s32.totalorder (!%p192_p2), %s1419_s19, 1  ;;  %vm761_vm0 = vcmask (!%p192_p2), 1040384  }
   0x6   : > { %195 = sbr.rel (%p192_p2) target bundleno = 331 (0x14b), region = 36  ;;  %p224_p3 = scmp.lt.s32.totalorder (!%p192_p2), %s1016_s22, 63  ;;  %1295 = vmatprep.subr.bf16.mxu0 (!%p192_p2), %v1367_v0  ;;  %1343 = vmatprep.subr.bf16.mxu1 (!%p192_p2), %v1367_v0  ;;  %v1370_v3 = vld [vmem:[%s1684_s3 + $0x18] sm:$0xff] (!%p192_p2)   ;;  %v1450_v5 = vld [vmem:[%s1682_s1] ss:$0 sm:$0xff] (!%p192_p2)  ;;  %v1372_v34 = vld [vmem:[%s1684_s3 + $0x28] sm:$0xff] (!%p192_p2)  }
   0x7   : > { %1296 = vmatpush3.bf16.msra.mxu0 (!%p192_p2), %v1367_v0  ;;  %1351 = vmatpush3.bf16.msra.mxu1 (!%p192_p2), %v1367_v0  ;;  %v1458_v11 = vld [vmem:[%s1683_s2] ss:$0 sm:$0xff] (!%p192_p2)  ;;  %v1373_v49 = vld [vmem:[%s1684_s3 + $0x30] sm:$0xff] (!%p192_p2)   ;;  %v1374_v63 = vld [vmem:[%s1684_s3 + $0x38] sm:$0xff] (!%p192_p2)  }
   0x8   : > { %1297 = vmatprep.subr.bf16.mxu0 (!%p192_p2), %v1368_v1  ;;  %1344 = vmatprep.subr.bf16.mxu1 (!%p192_p2), %v1368_v1  ;;  %v1371_v20 = vld [vmem:[%s1684_s3 + $0x20] sm:$0xff] (!%p192_p2)  }
   0xb   : > { %1298 = vmatpush3.bf16.msra.mxu0 (!%p192_p2), %v1368_v1  ;;  %1352 = vmatpush3.bf16.msra.mxu1 (!%p192_p2), %v1368_v1 }
   0xc   : > { %1299 = vmatprep.subr.bf16.mxu0 (!%p192_p2), %v1369_v2  ;;  %1345 = vmatprep.subr.bf16.mxu1 (!%p192_p2), %v1369_v2 }
   0xd   : > { %s1688_s22 = smov (!%p224_p3, %s1016_s22), 63  ;;  %s1690_s19 = smov (!%p235_p4, %s1419_s19), 1 }
   0xe   : > { %s1017_s27 = sshll.u32 %s1688_s22, 2  ;;  %s1020_s22 = sshll.u32 %s1690_s19, 1 }
   0xf   : > { %s1441_s30 = scalar_lea.vmem %s1681_s0, %s1017_s27  ;;  %1300 = vmatpush3.bf16.msra.mxu0 %v1369_v2  ;;  %1353 = vmatpush3.bf16.msra.mxu1 %v1369_v2  ;;  %s1583_s25 = scalar_lea.vmem %s1685_s4, %s1017_s27 }
  0x10   : > { %v1098_v4 = vld [vmem:[%s1441_s30] sm:$0xff]   ;;  %v1241_v8 = vld [vmem:[%s1441_s30 + $0x8] sm:$0xff]   ;;  %v1242_v9 = vld [vmem:[%s1441_s30 + $0x10] sm:$0xff]   ;;  %1301 = vmatprep.subr.bf16.mxu0 %v1370_v3  ;;  %1346 = vmatprep.subr.bf16.mxu1 %v1370_v3  ;;  %s238_s28 = scalar_lea.vmem %s1686_s5, %s1020_s22 }
  0x11   : > { %v1099_v6 = vunpack.c.l.bf16 %v1098_v4  ;;  %v1100_v7 = vunpack.c.h.bf16 %v1098_v4  ;;  %v1243_v10 = vld [vmem:[%s1441_s30 + $0x18] sm:$0xff]   ;;  %v1103_v12 = vunpack.c.l.bf16 %v1241_v8  ;;  %v1104_v13 = vunpack.c.h.bf16 %v1241_v8  ;;  %v1244_v29 = vld [vmem:[%s1441_s30 + $0x20] sm:$0xff]   ;;  %v1245_v33 = vld [vmem:[%s1441_s30 + $0x28] sm:$0xff]  }
  0x12   : > { %v1107_v14 = vunpack.c.l.bf16 %v1242_v9  ;;  %v1108_v15 = vunpack.c.h.bf16 %v1242_v9  ;;  %v1111_v18 = vunpack.c.l.bf16 %v1243_v10  ;;  %v1112_v19 = vunpack.c.h.bf16 %v1243_v10  ;;  %v1246_v42 = vld [vmem:[%s1441_s30 + $0x30] sm:$0xff]   ;;  %v1487_v48 = vld [vmem:[%s1441_s30 + $0x38] sm:$0xff]   ;;  %v1248_v60 = vld [vmem:[%s1441_s30 + $0x40] sm:$0xff]  }
  0x13   : > { %v311_v16 = vmul.f32 %v1099_v6, %v1450_v5  ;;  %v312_v17 = vmul.f32 %v1100_v7, %v1450_v5  ;;  %v313_v21 = vmul.f32 %v1103_v12, %v1450_v5  ;;  %v314_v22 = vmul.f32 %v1104_v13, %v1450_v5  ;;  %1302 = vmatpush3.bf16.msra.mxu0 %v1370_v3  ;;  %v1250_v9 = vld [vmem:[%s1441_s30 + $0x50] sm:$0xff]  }
  0x14   : > { %v315_v23 = vmul.f32 %v1107_v14, %v1450_v5  ;;  %v316_v24 = vmul.f32 %v1108_v15, %v1450_v5  ;;  %v317_v27 = vmul.f32 %v1111_v18, %v1450_v5  ;;  %v318_v28 = vmul.f32 %v1112_v19, %v1450_v5  ;;  %1354 = vmatpush3.bf16.msra.mxu1 %v1370_v3  ;;  %v1249_v3 = vld [vmem:[%s1441_s30 + $0x48] sm:$0xff]   ;;  %v1251_v19 = vld [vmem:[%s1441_s30 + $0x58] sm:$0xff]  }
  0x15   : > { %v350_v25 = vadd.f32 %v1458_v11, %v311_v16  ;;  %v351_v26 = vadd.f32 %v1458_v11, %v312_v17  ;;  %v352_v32 = vadd.f32 %v1458_v11, %v313_v21  ;;  %1303 = vmatprep.subr.bf16.mxu0 %v1371_v20  ;;  %v353_v35 = vadd.f32 %v1458_v11, %v314_v22 }
  0x16   : > { %v354_v36 = vadd.f32 %v1458_v11, %v315_v23  ;;  %v355_v37 = vadd.f32 %v1458_v11, %v316_v24  ;;  %1347 = vmatprep.subr.bf16.mxu1 %v1371_v20  ;;  %v356_v39 = vadd.f32 %v1458_v11, %v317_v27  ;;  %v357_v40 = vadd.f32 %v1458_v11, %v318_v28 }
  0x17   : > { %v382_v30 = vmax.f32 %v350_v25, 0.0  ;;  %v383_v31 = vmax.f32 %v351_v26, 0.0  ;;  %v1115_v41 = vunpack.c.l.bf16 %v1244_v29  ;;  %v1116_v43 = vunpack.c.h.bf16 %v1244_v29  ;;  %1304 = vmatpush3.bf16.msra.mxu0 %v1371_v20 }
  0x18   : > { %v1119_v44 = vunpack.c.l.bf16 %v1245_v33  ;;  %v384_v45 = vmax.f32 %v352_v32, 0.0  ;;  %v1120_v47 = vunpack.c.h.bf16 %v1245_v33  ;;  %1305 = vmatprep.subr.bf16.mxu0 %v1372_v34  ;;  %v385_v50 = vmax.f32 %v353_v35, 0.0  ;;  %1355 = vmatpush3.bf16.msra.mxu1 %v1371_v20  ;;  %v1252_v32 = vld [vmem:[%s1441_s30 + $0x60] sm:$0xff]  }
  0x19   : > { %v414_v38 = vpack.c.bf16 %v383_v31, %v382_v30  ;;  %v319_v46 = vmul.f32 %v1115_v41, %v1450_v5  ;;  %v386_v51 = vmax.f32 %v354_v36, 0.0  ;;  %v387_v52 = vmax.f32 %v355_v37, 0.0  ;;  %1348 = vmatprep.subr.bf16.mxu1 %v1372_v34 }
  0x1a   : > { %v1123_v53 = vunpack.c.l.bf16 %v1246_v42  ;;  %v388_v54 = vmax.f32 %v356_v39, 0.0  ;;  %v389_v55 = vmax.f32 %v357_v40, 0.0  ;;  %v320_v56 = vmul.f32 %v1116_v43, %v1450_v5 }
  0x1b   : > { %1311 = vmatprep.mubr.bf16.mxu0 %v414_v38  ;;  %v321_v57 = vmul.f32 %v1119_v44, %v1450_v5  ;;  %v1124_v58 = vunpack.c.h.bf16 %v1246_v42  ;;  %v1127_v59 = vunpack.c.l.bf16 %v1487_v48  ;;  %1306 = vmatpush3.bf16.msra.mxu0 %v1372_v34  ;;  %v1497_v61 = vadd.f32 %v1458_v11, %v319_v46 }
  0x1c   : > { %v322_v62 = vmul.f32 %v1120_v47, %v1450_v5  ;;  %1307 = vmatprep.subr.bf16.mxu0 %v1373_v49  ;;  %v415_v0 = vpack.c.bf16 %v385_v50, %v384_v45  ;;  %v416_v1 = vpack.c.bf16 %v387_v52, %v386_v51  ;;  %1356 = vmatpush3.bf16.msra.mxu1 %v1372_v34  ;;  %v1128_v7 = vunpack.c.h.bf16 %v1487_v48  ;;  %v1253_v45 = vld [vmem:[%s1441_s30 + $0x68] sm:$0xff]  }
  0x1d   : > { %v323_v2 = vmul.f32 %v1123_v53, %v1450_v5  ;;  %v1505_v4 = vpack.c.bf16 %v389_v55, %v388_v54  ;;  %v1508_v6 = vadd.f32 %v1458_v11, %v320_v56  ;;  %1349 = vmatprep.subr.bf16.mxu1 %v1373_v49  ;;  %v1131_v8 = vunpack.c.l.bf16 %v1248_v60  ;;  %v1254_v55 = vld [vmem:[%s1441_s30 + $0x70] sm:$0xff]  }
  0x1e   : > { %v1513_v10 = vadd.f32 %v1458_v11, %v321_v57  ;;  %v1516_v12 = vmul.f32 %v1124_v58, %v1450_v5  ;;  %v1519_v13 = vmul.f32 %v1127_v59, %v1450_v5  ;;  %v1132_v14 = vunpack.c.h.bf16 %v1248_v60 }
  0x1f   : > { %1308 = vmatpush3.bf16.msra.mxu0 %v1373_v49  ;;  %v390_v15 = vmax.f32 %v1497_v61, 0.0  ;;  %v1523_v16 = vadd.f32 %v1458_v11, %v322_v62  ;;  %v327_v17 = vmul.f32 %v1131_v8, %v1450_v5  ;;  %v1135_v18 = vunpack.c.l.bf16 %v1249_v3 }
  0x20   : > { %1309 = vmatprep.subr.bf16.mxu0 %v1374_v63  ;;  %1357 = vmatpush3.bf16.msra.mxu1 %v1373_v49  ;;  %v1528_v20 = vadd.f32 %v1458_v11, %v323_v2  ;;  %v328_v21 = vmul.f32 %v1132_v14, %v1450_v5  ;;  %v1136_v22 = vunpack.c.h.bf16 %v1249_v3  ;;  %v1139_v23 = vunpack.c.l.bf16 %v1250_v9 }
  0x21   : > { %v391_v24 = vmax.f32 %v1508_v6, 0.0  ;;  %1350 = vmatprep.subr.bf16.mxu1 %v1374_v63  ;;  %v366_v25 = vadd.f32 %v1458_v11, %v327_v17  ;;  %v329_v26 = vmul.f32 %v1135_v18, %v1450_v5  ;;  %v1140_v27 = vunpack.c.h.bf16 %v1250_v9  ;;  %v1255_v17 = vld [vmem:[%s1441_s30 + $0x78] sm:$0xff]  }
  0x22   : > { %v367_v28 = vadd.f32 %v1458_v11, %v328_v21  ;;  %v330_v29 = vmul.f32 %v1136_v22, %v1450_v5  ;;  %v331_v30 = vmul.f32 %v1139_v23, %v1450_v5  ;;  %v1143_v31 = vunpack.c.l.bf16 %v1251_v19 }
  0x23   : > { %1310 = vmatpush3.bf16.msra.mxu0 %v1374_v63  ;;  %v398_v33 = vmax.f32 %v366_v25, 0.0  ;;  %v368_v34 = vadd.f32 %v1458_v11, %v329_v26  ;;  %v332_v35 = vmul.f32 %v1140_v27, %v1450_v5  ;;  %v1144_v36 = vunpack.c.h.bf16 %v1251_v19 }
  0x24   : > { %1358 = vmatpush3.bf16.msra.mxu1 %v1374_v63  ;;  %v399_v37 = vmax.f32 %v367_v28, 0.0  ;;  %v369_v38 = vadd.f32 %v1458_v11, %v330_v29  ;;  %v370_v39 = vadd.f32 %v1458_v11, %v331_v30  ;;  %v333_v40 = vmul.f32 %v1143_v31, %v1450_v5 }
  0x25   : > { %v400_v41 = vmax.f32 %v368_v34, 0.0  ;;  %v371_v42 = vadd.f32 %v1458_v11, %v332_v35  ;;  %v334_v43 = vmul.f32 %v1144_v36, %v1450_v5  ;;  %v1147_v44 = vunpack.c.l.bf16 %v1252_v32 }
  0x26   : > { %1312 = vmatmul.mubr.bf16.vlgmr.msra.gmra.mrb[0].mxu0 %v415_v0  ;;  %v422_v46 = vpack.c.bf16 %v399_v37, %v398_v33  ;;  %v401_v47 = vmax.f32 %v369_v38, 0.0  ;;  %v402_v49 = vmax.f32 %v370_v39, 0.0  ;;  %v372_v50 = vadd.f32 %v1458_v11, %v333_v40 }
  0x27   : > { %1315 = vmatprep.mubr.bf16.mxu0 %v416_v1  ;;  %v403_v51 = vmax.f32 %v371_v42, 0.0  ;;  %v373_v52 = vadd.f32 %v1458_v11, %v334_v43  ;;  %v1148_v53 = vunpack.c.h.bf16 %v1252_v32  ;;  %v335_v54 = vmul.f32 %v1147_v44, %v1450_v5 }
  0x28   : > { %1327 = vmatprep.mubr.bf16.mxu1 %v422_v46  ;;  %v423_v56 = vpack.c.bf16 %v401_v47, %v400_v41  ;;  %v404_v57 = vmax.f32 %v372_v50, 0.0  ;;  %v1151_v58 = vunpack.c.l.bf16 %v1253_v45  ;;  %v1152_v59 = vunpack.c.h.bf16 %v1253_v45 }
  0x29   : > { %v424_v60 = vpack.c.bf16 %v403_v51, %v402_v49  ;;  %v405_v61 = vmax.f32 %v373_v52, 0.0  ;;  %v336_v62 = vmul.f32 %v1148_v53, %v1450_v5  ;;  %v374_v63 = vadd.f32 %v1458_v11, %v335_v54 }
  0x2a   : > { %1328 = vmatmul.mubr.bf16.vlgmr.msra.gmra.mrb[0].mxu1 %v423_v56  ;;  %v337_v0 = vmul.f32 %v1151_v58, %v1450_v5  ;;  %v338_v1 = vmul.f32 %v1152_v59, %v1450_v5  ;;  %v1155_v2 = vunpack.c.l.bf16 %v1254_v55  ;;  %v1156_v3 = vunpack.c.h.bf16 %v1254_v55 }
  0x2b   : > { %v418_v6 = vpack.c.bf16 %v391_v24, %v390_v15  ;;  %v363_v8 = vadd.f32 %v1458_v11, %v1516_v12  ;;  %1331 = vmatprep.mubr.bf16.mxu1 %v424_v60  ;;  %v375_v9 = vadd.f32 %v1458_v11, %v336_v62  ;;  %v406_v14 = vmax.f32 %v374_v63, 0.0 }
  0x2c   : > { %v392_v18 = vmax.f32 %v1513_v10, 0.0  ;;  %v326_v19 = vmul.f32 %v1128_v7, %v1450_v5  ;;  %v339_v21 = vmul.f32 %v1155_v2, %v1450_v5  ;;  %v340_v22 = vmul.f32 %v1156_v3, %v1450_v5 }
  0x2d   : > { %v393_v15 = vmax.f32 %v1523_v16, 0.0  ;;  %v394_v23 = vmax.f32 %v1528_v20, 0.0  ;;  %v425_v12 = vpack.c.bf16 %v405_v61, %v404_v57  ;;  %v407_v24 = vmax.f32 %v375_v9, 0.0 }
  0x2e   : > { %1316 = vmatmul.mubr.bf16.gmra.mrb[4].mxu0 %v1505_v4  ;;  %v376_v25 = vadd.f32 %v1458_v11, %v337_v0  ;;  %v377_v10 = vadd.f32 %v1458_v11, %v338_v1  ;;  %v1159_v26 = vunpack.c.l.bf16 %v1255_v17  ;;  %v1160_v27 = vunpack.c.h.bf16 %v1255_v17 }
  0x2f   : > { %1319 = vmatprep.mubr.bf16.mxu0 %v418_v6  ;;  %v395_v48 = vmax.f32 %v363_v8, 0.0  ;;  %v426_v7 = vpack.c.bf16 %v407_v24, %v406_v14  ;;  %v378_v28 = vadd.f32 %v1458_v11, %v339_v21  ;;  %v379_v29 = vadd.f32 %v1458_v11, %v340_v22 }
  0x30   : > { %v419_v16 = vpack.c.bf16 %v393_v15, %v392_v18  ;;  %v364_v20 = vadd.f32 %v1458_v11, %v1519_v13  ;;  %v365_v30 = vadd.f32 %v1458_v11, %v326_v19  ;;  %v408_v4 = vmax.f32 %v376_v25, 0.0 }
  0x31   : > { %v409_v31 = vmax.f32 %v377_v10, 0.0  ;;  %v341_v32 = vmul.f32 %v1159_v26, %v1450_v5  ;;  %v342_v33 = vmul.f32 %v1160_v27, %v1450_v5  ;;  %v420_v34 = vpack.c.bf16 %v395_v48, %v394_v23 }
  0x32   : > { %1332 = vmatmul.mubr.bf16.gmra.mrb[4].mxu1 %v425_v12  ;;  %v410_v35 = vmax.f32 %v378_v28, 0.0  ;;  %v411_v36 = vmax.f32 %v379_v29, 0.0  ;;  %v396_v37 = vmax.f32 %v364_v20, 0.0  ;;  %v397_v38 = vmax.f32 %v365_v30, 0.0 }
  0x33   : > { %1335 = vmatprep.mubr.bf16.mxu1 %v426_v7  ;;  %v427_v39 = vpack.c.bf16 %v409_v31, %v408_v4  ;;  %v380_v13 = vadd.f32 %v1458_v11, %v341_v32  ;;  %v381_v40 = vadd.f32 %v1458_v11, %v342_v33 }
  0x34   : > { %v428_v41 = vpack.c.bf16 %v411_v36, %v410_v35  ;;  %v421_v42 = vpack.c.bf16 %v397_v38, %v396_v37 }
  0x35   : > { %v412_v43 = vmax.f32 %v380_v13, 0.0  ;;  %v413_v44 = vmax.f32 %v381_v40, 0.0 }
  0x36   : > { %1320 = vmatmul.mubr.bf16.gmra.mrb[8].mxu0 %v419_v16 }
  0x37   : > { %1323 = vmatprep.mubr.bf16.mxu0 %v420_v34  ;;  %v429_v5 = vpack.c.bf16 %v413_v44, %v412_v43 }
  0x3a   : > { %1336 = vmatmul.mubr.bf16.gmra.mrb[8].mxu1 %v427_v39 }
  0x3b   : > { %1339 = vmatprep.mubr.bf16.mxu1 %v428_v41 }
  0x3e   : > { %1324 = vmatmul.mubr.bf16.gmra.mrb[12].mxu0 %v421_v42 }
  0x42   : > { %1340 = vmatmul.mubr.bf16.gmra.mrb[12].mxu1 %v429_v5 }
  0xf9   : > { %v1313_v45 = vpop.f32.mrb[0].mxu0 }
  0xfa   : > { %v528_v46 = vpop.f32.mrb[1].mxu0  ;;  %v694_v56 = vmul.f32 %v1313_v45, %v1313_v45 }
  0xfb   : > { %v1314_v11 = vpop.f32.mrb[2].mxu0  ;;  %v692_v50 = vmul.f32 %v528_v46, %v528_v46 }
  0xfc   : > { %v1169_v47 = vpack.c.bf16 %v1314_v11, %v1313_v45  ;;  %v531_v49 = vpop.f32.mrb[3].mxu0  ;;  %v695_v62 = vmul.f32 %v1314_v11, %v1314_v11 }
  0xfd   : > { %v655_v51 = vadd.f32 %v531_v49, %v528_v46  ;;  %v693_v52 = vmul.f32 %v531_v49, %v531_v49  ;;  %v1164_v53 = vpack.c.bf16 %v531_v49, %v528_v46  ;;  %v1585_v54 = vpop.f32.mrb[0].mxu1 }
  0xfe   : > { %1256 = vst [vmem:[%s1583_s25 + $0x8] sm:$0xff] %v1169_v47   ;;  %v1588_v55 = vpop.f32.mrb[1].mxu1 }
  0xff   : > { %v656_v57 = vadd.f32 %v1313_v45, %v655_v51  ;;  %v724_v58 = vadd.f32 %v693_v52, %v692_v50  ;;  %1165 = vst [vmem:[%s1583_s25] sm:$0xff] %v1164_v53   ;;  %v1591_v59 = vpop.f32.mrb[2].mxu1 }
 0x100   : > { %v1209_v60 = vpack.c.bf16 %v1591_v59, %v1585_v54  ;;  %v1595_v61 = vpop.f32.mrb[3].mxu1 }
 0x101   : > { %v725_v63 = vadd.f32 %v724_v58, %v694_v56  ;;  %v1317_v0 = vpop.f32.mrb[4].mxu0  ;;  %v657_v1 = vadd.f32 %v1314_v11, %v656_v57  ;;  %v1204_v2 = vpack.c.bf16 %v1595_v61, %v1588_v55 }
 0x102   : > { %v544_v3 = vpop.f32.mrb[5].mxu0  ;;  %1264 = vst [vmem:[%s1583_s25 + $0x48] sm:$0xff] %v1209_v60   ;;  %v698_v24 = vmul.f32 %v1317_v0, %v1317_v0 }
 0x103   : > { %v658_v6 = vadd.f32 %v657_v1, %v544_v3  ;;  %v696_v8 = vmul.f32 %v544_v3, %v544_v3  ;;  %v726_v9 = vadd.f32 %v725_v63, %v695_v62  ;;  %v1318_v14 = vpop.f32.mrb[6].mxu0  ;;  %1263 = vst [vmem:[%s1583_s25 + $0x40] sm:$0xff] %v1204_v2  }
 0x104   : > { %v1179_v17 = vpack.c.bf16 %v1318_v14, %v1317_v0  ;;  %v547_v18 = vpop.f32.mrb[7].mxu0  ;;  %v699_v7 = vmul.f32 %v1318_v14, %v1318_v14 }
 0x105   : > { %v727_v19 = vadd.f32 %v726_v9, %v696_v8  ;;  %v659_v21 = vadd.f32 %v658_v6, %v547_v18  ;;  %v697_v22 = vmul.f32 %v547_v18, %v547_v18  ;;  %v1174_v15 = vpack.c.bf16 %v547_v18, %v544_v3  ;;  %v1601_v23 = vpop.f32.mrb[4].mxu1 }
 0x106   : > { %1258 = vst [vmem:[%s1583_s25 + $0x18] sm:$0xff] %v1179_v17   ;;  %v1604_v12 = vpop.f32.mrb[5].mxu1  ;;  %v708_v17 = vmul.f32 %v1588_v55, %v1588_v55 }
 0x107   : > { %v660_v25 = vadd.f32 %v1317_v0, %v659_v21  ;;  %v728_v10 = vadd.f32 %v727_v19, %v697_v22  ;;  %1257 = vst [vmem:[%s1583_s25 + $0x10] sm:$0xff] %v1174_v15   ;;  %v1607_v26 = vpop.f32.mrb[6].mxu1 }
 0x108   : > { %v1219_v27 = vpack.c.bf16 %v1607_v26, %v1601_v23  ;;  %v1611_v48 = vpop.f32.mrb[7].mxu1 }
 0x109   : > { %v729_v28 = vadd.f32 %v728_v10, %v698_v24  ;;  %v1321_v29 = vpop.f32.mrb[8].mxu0  ;;  %v661_v16 = vadd.f32 %v1318_v14, %v660_v25  ;;  %v1214_v20 = vpack.c.bf16 %v1611_v48, %v1604_v12 }
 0x10a   : > { %v560_v30 = vpop.f32.mrb[9].mxu0  ;;  %1266 = vst [vmem:[%s1583_s25 + $0x58] sm:$0xff] %v1219_v27   ;;  %v702_v41 = vmul.f32 %v1321_v29, %v1321_v29 }
 0x10b   : > { %v662_v4 = vadd.f32 %v661_v16, %v560_v30  ;;  %v700_v31 = vmul.f32 %v560_v30, %v560_v30  ;;  %v730_v32 = vadd.f32 %v729_v28, %v699_v7  ;;  %v1322_v33 = vpop.f32.mrb[10].mxu0  ;;  %1265 = vst [vmem:[%s1583_s25 + $0x50] sm:$0xff] %v1214_v20   ;;  %v709_v28 = vmul.f32 %v1595_v61, %v1595_v61 }
 0x10c   : > { %v1189_v34 = vpack.c.bf16 %v1322_v33, %v1321_v29  ;;  %v563_v35 = vpop.f32.mrb[11].mxu0  ;;  %v703_v46 = vmul.f32 %v1322_v33, %v1322_v33 }
 0x10d   : > { %v731_v36 = vadd.f32 %v730_v32, %v700_v31  ;;  %v663_v37 = vadd.f32 %v662_v4, %v563_v35  ;;  %v701_v38 = vmul.f32 %v563_v35, %v563_v35  ;;  %v1184_v39 = vpack.c.bf16 %v563_v35, %v560_v30  ;;  %v1617_v13 = vpop.f32.mrb[8].mxu1 }
 0x10e   : > { %1260 = vst [vmem:[%s1583_s25 + $0x28] sm:$0xff] %v1189_v34   ;;  %v1620_v40 = vpop.f32.mrb[9].mxu1  ;;  %v711_v30 = vmul.f32 %v1591_v59, %v1591_v59  ;;  %v712_v31 = vmul.f32 %v1604_v12, %v1604_v12  ;;  %v713_v35 = vmul.f32 %v1611_v48, %v1611_v48 }
 0x10f   : > { %v664_v42 = vadd.f32 %v1321_v29, %v663_v37  ;;  %v732_v43 = vadd.f32 %v731_v36, %v701_v38  ;;  %1259 = vst [vmem:[%s1583_s25 + $0x20] sm:$0xff] %v1184_v39   ;;  %v1623_v44 = vpop.f32.mrb[10].mxu1  ;;  %v710_v29 = vmul.f32 %v1585_v54, %v1585_v54 }
 0x110   : > { %v1229_v5 = vpack.c.bf16 %v1623_v44, %v1617_v13  ;;  %v1627_v45 = vpop.f32.mrb[11].mxu1 }
 0x111   : > { %v733_v11 = vadd.f32 %v732_v43, %v702_v41  ;;  %v1325_v47 = vpop.f32.mrb[12].mxu0  ;;  %v665_v49 = vadd.f32 %v1322_v33, %v664_v42  ;;  %v1224_v50 = vpack.c.bf16 %v1627_v45, %v1620_v40 }
 0x112   : > { %v576_v51 = vpop.f32.mrb[13].mxu0  ;;  %1268 = vst [vmem:[%s1583_s25 + $0x68] sm:$0xff] %v1229_v5   ;;  %v706_v6 = vmul.f32 %v1325_v47, %v1325_v47  ;;  %v717_v5 = vmul.f32 %v1627_v45, %v1627_v45 }
 0x113   : > { %v666_v52 = vadd.f32 %v665_v49, %v576_v51  ;;  %v704_v53 = vmul.f32 %v576_v51, %v576_v51  ;;  %v734_v56 = vadd.f32 %v733_v11, %v703_v46  ;;  %v1326_v57 = vpop.f32.mrb[14].mxu0  ;;  %1267 = vst [vmem:[%s1583_s25 + $0x60] sm:$0xff] %v1224_v50  }
 0x114   : > { %v1199_v58 = vpack.c.bf16 %v1326_v57, %v1325_v47  ;;  %v579_v60 = vpop.f32.mrb[15].mxu0  ;;  %v707_v21 = vmul.f32 %v1326_v57, %v1326_v57 }
 0x115   : > { %v735_v62 = vadd.f32 %v734_v56, %v704_v53  ;;  %v667_v63 = vadd.f32 %v666_v52, %v579_v60  ;;  %v705_v0 = vmul.f32 %v579_v60, %v579_v60  ;;  %v1194_v1 = vpack.c.bf16 %v579_v60, %v576_v51  ;;  %v1341_v2 = vpop.f32.mrb[12].mxu1 }
 0x116   : > { %1262 = vst [vmem:[%s1583_s25 + $0x38] sm:$0xff] %v1199_v58   ;;  %v640_v3 = vpop.f32.mrb[13].mxu1  ;;  %v722_v56 = vmul.f32 %v1341_v2, %v1341_v2 }
 0x117   : > { %v668_v8 = vadd.f32 %v1325_v47, %v667_v63  ;;  %v736_v9 = vadd.f32 %v735_v62, %v705_v0  ;;  %1261 = vst [vmem:[%s1583_s25 + $0x30] sm:$0xff] %v1194_v1   ;;  %v1342_v14 = vpop.f32.mrb[14].mxu1  ;;  %v720_v49 = vmul.f32 %v640_v3, %v640_v3 }
 0x118   : > { %v1239_v18 = vpack.c.bf16 %v1342_v14, %v1341_v2  ;;  %v643_v19 = vpop.f32.mrb[15].mxu1  ;;  %v723_v60 = vmul.f32 %v1342_v14, %v1342_v14 }
 0x119   : > { %v737_v22 = vadd.f32 %v736_v9, %v706_v6  ;;  %v669_v15 = vadd.f32 %v1326_v57, %v668_v8  ;;  %v1234_v24 = vpack.c.bf16 %v643_v19, %v640_v3 }
 0x11a   : > { %1270 = vst [vmem:[%s1583_s25 + $0x78] sm:$0xff] %v1239_v18  }
 0x11b   : > { %v670_v25 = vadd.f32 %v669_v15, %v1588_v55  ;;  %v738_v10 = vadd.f32 %v737_v22, %v707_v21  ;;  %1269 = vst [vmem:[%s1583_s25 + $0x70] sm:$0xff] %v1234_v24  }
 0x11d   : > { %v739_v27 = vadd.f32 %v738_v10, %v708_v17  ;;  %v671_v7 = vadd.f32 %v670_v25, %v1595_v61 }
 0x11f   : > { %v672_v16 = vadd.f32 %v1585_v54, %v671_v7  ;;  %v740_v20 = vadd.f32 %v739_v27, %v709_v28  ;;  %v714_v54 = vmul.f32 %v1601_v23, %v1601_v23 }
 0x121   : > { %v741_v4 = vadd.f32 %v740_v20, %v710_v29  ;;  %v673_v55 = vadd.f32 %v1591_v59, %v672_v16  ;;  %v715_v59 = vmul.f32 %v1607_v26, %v1607_v26 }
 0x123   : > { %v674_v32 = vadd.f32 %v673_v55, %v1604_v12  ;;  %v742_v33 = vadd.f32 %v741_v4, %v711_v30  ;;  %v716_v12 = vmul.f32 %v1620_v40, %v1620_v40 }
 0x125   : > { %v743_v34 = vadd.f32 %v742_v33, %v712_v31  ;;  %v675_v61 = vadd.f32 %v674_v32, %v1611_v48 }
 0x127   : > { %v676_v36 = vadd.f32 %v1601_v23, %v675_v61  ;;  %v744_v37 = vadd.f32 %v743_v34, %v713_v35  ;;  %v718_v23 = vmul.f32 %v1617_v13, %v1617_v13 }
 0x129   : > { %v745_v38 = vadd.f32 %v744_v37, %v714_v54  ;;  %v677_v39 = vadd.f32 %v1607_v26, %v676_v36  ;;  %v719_v26 = vmul.f32 %v1623_v44, %v1623_v44 }
 0x12b   : > { %v678_v41 = vadd.f32 %v677_v39, %v1620_v40  ;;  %v746_v42 = vadd.f32 %v745_v38, %v715_v59 }
 0x12d   : > { %v747_v43 = vadd.f32 %v746_v42, %v716_v12  ;;  %v679_v48 = vadd.f32 %v678_v41, %v1627_v45  ;;  %v721_v45 = vmul.f32 %v643_v19, %v643_v19 }
 0x12f   : > { %v680_v46 = vadd.f32 %v1617_v13, %v679_v48  ;;  %v748_v11 = vadd.f32 %v747_v43, %v717_v5 }
 0x131   : > { %v749_v47 = vadd.f32 %v748_v11, %v718_v23  ;;  %v681_v40 = vadd.f32 %v1623_v44, %v680_v46 }
 0x133   : > { %v682_v50 = vadd.f32 %v681_v40, %v640_v3  ;;  %v750_v51 = vadd.f32 %v749_v47, %v719_v26 }
 0x135   : > { %v751_v52 = vadd.f32 %v750_v51, %v720_v49  ;;  %v683_v53 = vadd.f32 %v682_v50, %v643_v19 }
 0x137   : > { %v684_v57 = vadd.f32 %v1341_v2, %v683_v53  ;;  %v752_v58 = vadd.f32 %v751_v52, %v721_v45 }
 0x139   : > { %v685_v13 = vadd.f32 %v1342_v14, %v684_v57  ;;  %v753_v62 = vadd.f32 %v752_v58, %v722_v56 }
 0x13b   : > { %v686_v63 = vrot.slane %v685_v13, 4  ;;  %v754_v0 = vadd.f32 %v753_v62, %v723_v60 }
 0x13d   : > { %v687_v1 = vadd.f32 %v686_v63, %v685_v13  ;;  %v755_v6 = vrot.slane %v754_v0, 4 }
 0x13f   : > { %v688_v8 = vrot.slane %v687_v1, 2  ;;  %v756_v44 = vadd.f32 %v755_v6, %v754_v0 }
 0x141   : > { %v689_v3 = vadd.f32 %v688_v8, %v687_v1  ;;  %v757_v9 = vrot.slane %v756_v44, 2 }
 0x143   : > { %v690_v17 = vrot.slane %v689_v3, 1  ;;  %v758_v18 = vadd.f32 %v757_v9, %v756_v44 }
 0x145   : > { %v759_v19 = vrot.slane %v758_v18, 1  ;;  %v691_v2 = vadd.f32 %v690_v17, %v689_v3 }
 0x147   : > { %v760_v14 = vadd.f32 %v759_v19, %v758_v18 }
 0x149   : > { %v762_v21 = vsel %vm761_vm0, %v691_v2, %v760_v14 }
 0x14a   : > { %763 = vst [vmem:[%s238_s28] sm:$0x3] %v762_v21 }
 0x14b PF: > { %s16_s18 = sadd.s32 1, %s1381_s18  }
 0x14c   : > { %p13_p5 = scmp.ge.s32.totalorder %s16_s18, 4  }
 0x14e   :  { %15 = sbr.rel (!%p13_p5) target bundleno = 1 (0x1), region = 78 }

// kernel: bottleneck_adaibn_forward.4
= control target key start
LH: loop header
LB: loop body
LE: loop exit
PB: predicated region body
PF: predicated region fallthrough
CT: control target
= control target key end

     0   :  { %s1126_s12 = smov 0   ;;  %s1315_s0 = inlined_call_operand.vmem [shape: f32[512,128], index: 0, kind: input, shape index: {}]   ;;  %s1316_s1 = inlined_call_operand.vmem [shape: bf16[128,128], index: 1, kind: input, shape index: {}]   ;;  %s1317_s2 = inlined_call_operand.vmem [shape: bf16[512,128], index: 2, kind: output, shape index: {0}]   ;;  %s1318_s3 = inlined_call_operand.vmem [shape: f32[2,2,128], index: 3, kind: output, shape index: {1}]  }
   0x1 LB: > { %s1132_s13 = sadd.s32 4294967295, %s1104_s12   ;;  %p819_p0 = scmp.ge.s32.totalorder %s1104_s12, 1  ;;  %s1104_s12 = sphi %s1126_s12, %s14_s12  }
   0x2   : > { %p141_p1 = scmp.lt.s32.totalorder %s1104_s12, 3 }
   0x4   : > { %p142_p2 = pnand %p819_p0, %p141_p1 }
   0x5   : > { %v1090_v0 = vld [vmem:[%s1316_s1] sm:$0xff] (!%p142_p2)   ;;  %s820_s16 = sshll.u32 (!%p142_p2), %s1132_s13, 5  ;;  %v1091_v1 = vld [vmem:[%s1316_s1 + $0x8] sm:$0xff] (!%p142_p2)   ;;  %v1092_v2 = vld [vmem:[%s1316_s1 + $0x10] sm:$0xff] (!%p142_p2)   ;;  %p181_p4 = scmp.lt.s32.totalorder (!%p142_p2), %s1132_s13, 1  ;;  %vm565_vm0 = vcmask (!%p142_p2), 1040384  }
   0x6   : > { %145 = sbr.rel (%p142_p2) target bundleno = 331 (0x14b), region = 28  ;;  %p170_p3 = scmp.lt.s32.totalorder (!%p142_p2), %s820_s16, 63  ;;  %1018 = vmatprep.subr.bf16.mxu0 (!%p142_p2), %v1090_v0  ;;  %1066 = vmatprep.subr.bf16.mxu1 (!%p142_p2), %v1090_v0  ;;  %v1093_v3 = vld [vmem:[%s1316_s1 + $0x18] sm:$0xff] (!%p142_p2)   ;;  %v1094_v7 = vld [vmem:[%s1316_s1 + $0x20] sm:$0xff] (!%p142_p2)   ;;  %v1095_v11 = vld [vmem:[%s1316_s1 + $0x28] sm:$0xff] (!%p142_p2)  }
   0x7   : > { %1019 = vmatpush3.bf16.msra.mxu0 (!%p142_p2), %v1090_v0  ;;  %1074 = vmatpush3.bf16.msra.mxu1 (!%p142_p2), %v1090_v0  ;;  %v1096_v12 = vld [vmem:[%s1316_s1 + $0x30] sm:$0xff] (!%p142_p2)   ;;  %v1097_v13 = vld [vmem:[%s1316_s1 + $0x38] sm:$0xff] (!%p142_p2)  }
   0x8   : > { %1020 = vmatprep.subr.bf16.mxu0 (!%p142_p2), %v1091_v1  ;;  %1067 = vmatprep.subr.bf16.mxu1 (!%p142_p2), %v1091_v1 }
   0xb   : > { %1021 = vmatpush3.bf16.msra.mxu0 (!%p142_p2), %v1091_v1  ;;  %1075 = vmatpush3.bf16.msra.mxu1 (!%p142_p2), %v1091_v1 }
   0xc   : > { %1022 = vmatprep.subr.bf16.mxu0 (!%p142_p2), %v1092_v2  ;;  %1068 = vmatprep.subr.bf16.mxu1 (!%p142_p2), %v1092_v2 }
   0xd   : > { %s1320_s16 = smov (!%p170_p3, %s820_s16), 63  ;;  %s1322_s13 = smov (!%p181_p4, %s1132_s13), 1 }
   0xe   : > { %s821_s21 = sshll.u32 %s1320_s16, 3  ;;  %s823_s8 = sshll.u32 %s1320_s16, 2 }
   0xf   : > { %s1152_s24 = scalar_lea.vmem %s1315_s0, %s821_s21  ;;  %1023 = vmatpush3.bf16.msra.mxu0 %v1092_v2  ;;  %1076 = vmatpush3.bf16.msra.mxu1 %v1092_v2  ;;  %s1207_s11 = scalar_lea.vmem %s1317_s2, %s823_s8 }
  0x10   : > { %v186_v4 = vld [vmem:[%s1152_s24] sm:$0xff]  ;;  %v187_v5 = vld [vmem:[%s1152_s24 + $0x8] sm:$0xff]  ;;  %1024 = vmatprep.subr.bf16.mxu0 %v1093_v3  ;;  %1069 = vmatprep.subr.bf16.mxu1 %v1093_v3  ;;  %v188_v14 = vld [vmem:[%s1152_s24 + $0x10] sm:$0xff]  ;;  %s824_s14 = sshll.u32 %s1322_s13, 1 }
  0x11   : > { %v218_v6 = vpack.c.bf16 %v187_v5, %v186_v4  ;;  %v202_v8 = vld [vmem:[%s1152_s24 + $0x80] sm:$0xff]  ;;  %v203_v9 = vld [vmem:[%s1152_s24 + $0x88] sm:$0xff]  ;;  %v189_v15 = vld [vmem:[%s1152_s24 + $0x18] sm:$0xff]  ;;  %s184_s17 = scalar_lea.vmem %s1318_s3, %s824_s14 }
  0x12   : > { %v226_v10 = vpack.c.bf16 %v203_v9, %v202_v8  ;;  %v190_v16 = vld [vmem:[%s1152_s24 + $0x20] sm:$0xff]  ;;  %v191_v17 = vld [vmem:[%s1152_s24 + $0x28] sm:$0xff]  ;;  %v204_v18 = vld [vmem:[%s1152_s24 + $0x90] sm:$0xff]  ;;  %v219_v22 = vpack.c.bf16 %v189_v15, %v188_v14 }
  0x13   : > { %1034 = vmatprep.mubr.bf16.mxu0 %v218_v6  ;;  %1025 = vmatpush3.bf16.msra.mxu0 %v1093_v3  ;;  %v205_v19 = vld [vmem:[%s1152_s24 + $0x98] sm:$0xff]  ;;  %v206_v20 = vld [vmem:[%s1152_s24 + $0xa0] sm:$0xff]  ;;  %v207_v21 = vld [vmem:[%s1152_s24 + $0xa8] sm:$0xff]  ;;  %v220_v23 = vpack.c.bf16 %v191_v17, %v190_v16 }
  0x14   : > { %1026 = vmatprep.subr.bf16.mxu0 %v1094_v7  ;;  %1077 = vmatpush3.bf16.msra.mxu1 %v1093_v3  ;;  %v227_v24 = vpack.c.bf16 %v205_v19, %v204_v18  ;;  %v228_v25 = vpack.c.bf16 %v207_v21, %v206_v20  ;;  %v192_v26 = vld [vmem:[%s1152_s24 + $0x30] sm:$0xff]  ;;  %v193_v27 = vld [vmem:[%s1152_s24 + $0x38] sm:$0xff]  ;;  %v194_v28 = vld [vmem:[%s1152_s24 + $0x40] sm:$0xff] }
  0x15   : > { %1070 = vmatprep.subr.bf16.mxu1 %v1094_v7  ;;  %1050 = vmatprep.mubr.bf16.mxu1 %v226_v10  ;;  %v195_v29 = vld [vmem:[%s1152_s24 + $0x48] sm:$0xff]  ;;  %v208_v30 = vld [vmem:[%s1152_s24 + $0xb0] sm:$0xff]  ;;  %v209_v31 = vld [vmem:[%s1152_s24 + $0xb8] sm:$0xff]  ;;  %v221_v34 = vpack.c.bf16 %v193_v27, %v192_v26 }
  0x16   : > { %v210_v32 = vld [vmem:[%s1152_s24 + $0xc0] sm:$0xff]  ;;  %v211_v33 = vld [vmem:[%s1152_s24 + $0xc8] sm:$0xff]  ;;  %v222_v35 = vpack.c.bf16 %v195_v29, %v194_v28  ;;  %v229_v36 = vpack.c.bf16 %v209_v31, %v208_v30  ;;  %v196_v38 = vld [vmem:[%s1152_s24 + $0x50] sm:$0xff] }
  0x17   : > { %1027 = vmatpush3.bf16.msra.mxu0 %v1094_v7  ;;  %v230_v37 = vpack.c.bf16 %v211_v33, %v210_v32  ;;  %v197_v39 = vld [vmem:[%s1152_s24 + $0x58] sm:$0xff]  ;;  %v198_v40 = vld [vmem:[%s1152_s24 + $0x60] sm:$0xff]  ;;  %v199_v41 = vld [vmem:[%s1152_s24 + $0x68] sm:$0xff] }
  0x18   : > { %1028 = vmatprep.subr.bf16.mxu0 %v1095_v11  ;;  %1078 = vmatpush3.bf16.msra.mxu1 %v1094_v7  ;;  %v212_v42 = vld [vmem:[%s1152_s24 + $0xd0] sm:$0xff]  ;;  %v213_v43 = vld [vmem:[%s1152_s24 + $0xd8] sm:$0xff]  ;;  %v214_v44 = vld [vmem:[%s1152_s24 + $0xe0] sm:$0xff]  ;;  %v223_v46 = vpack.c.bf16 %v197_v39, %v196_v38  ;;  %v224_v47 = vpack.c.bf16 %v199_v41, %v198_v40 }
  0x19   : > { %1071 = vmatprep.subr.bf16.mxu1 %v1095_v11  ;;  %v215_v45 = vld [vmem:[%s1152_s24 + $0xe8] sm:$0xff]  ;;  %v231_v48 = vpack.c.bf16 %v213_v43, %v212_v42  ;;  %v200_v50 = vld [vmem:[%s1152_s24 + $0x70] sm:$0xff]  ;;  %v201_v51 = vld [vmem:[%s1152_s24 + $0x78] sm:$0xff] }
  0x1a   : > { %v232_v49 = vpack.c.bf16 %v215_v45, %v214_v44  ;;  %v216_v52 = vld [vmem:[%s1152_s24 + $0xf0] sm:$0xff]  ;;  %v217_v53 = vld [vmem:[%s1152_s24 + $0xf8] sm:$0xff]  ;;  %v225_v54 = vpack.c.bf16 %v201_v51, %v200_v50 }
  0x1b   : > { %1029 = vmatpush3.bf16.msra.mxu0 %v1095_v11  ;;  %v233_v55 = vpack.c.bf16 %v217_v53, %v216_v52 }
  0x1c   : > { %1030 = vmatprep.subr.bf16.mxu0 %v1096_v12  ;;  %1079 = vmatpush3.bf16.msra.mxu1 %v1095_v11 }
  0x1d   : > { %1072 = vmatprep.subr.bf16.mxu1 %v1096_v12 }
  0x1f   : > { %1031 = vmatpush3.bf16.msra.mxu0 %v1096_v12 }
  0x20   : > { %1032 = vmatprep.subr.bf16.mxu0 %v1097_v13  ;;  %1080 = vmatpush3.bf16.msra.mxu1 %v1096_v12 }
  0x21   : > { %1073 = vmatprep.subr.bf16.mxu1 %v1097_v13 }
  0x23   : > { %1033 = vmatpush3.bf16.msra.mxu0 %v1097_v13 }
  0x24   : > { %1081 = vmatpush3.bf16.msra.mxu1 %v1097_v13 }
  0x26   : > { %1035 = vmatmul.mubr.bf16.vlgmr.msra.gmra.mrb[0].mxu0 %v219_v22 }
  0x27   : > { %1038 = vmatprep.mubr.bf16.mxu0 %v220_v23  ;;  %1051 = vmatmul.mubr.bf16.vlgmr.msra.gmra.mrb[0].mxu1 %v227_v24 }
  0x28   : > { %1054 = vmatprep.mubr.bf16.mxu1 %v228_v25 }
  0x2e   : > { %1039 = vmatmul.mubr.bf16.gmra.mrb[4].mxu0 %v221_v34 }
  0x2f   : > { %1042 = vmatprep.mubr.bf16.mxu0 %v222_v35  ;;  %1055 = vmatmul.mubr.bf16.gmra.mrb[4].mxu1 %v229_v36 }
  0x30   : > { %1058 = vmatprep.mubr.bf16.mxu1 %v230_v37 }
  0x36   : > { %1043 = vmatmul.mubr.bf16.gmra.mrb[8].mxu0 %v223_v46 }
  0x37   : > { %1046 = vmatprep.mubr.bf16.mxu0 %v224_v47  ;;  %1059 = vmatmul.mubr.bf16.gmra.mrb[8].mxu1 %v231_v48 }
  0x38   : > { %1062 = vmatprep.mubr.bf16.mxu1 %v232_v49 }
  0x3e   : > { %1047 = vmatmul.mubr.bf16.gmra.mrb[12].mxu0 %v225_v54 }
  0x3f   : > { %1063 = vmatmul.mubr.bf16.gmra.mrb[12].mxu1 %v233_v55 }
  0xf9   : > { %v1036_v56 = vpop.f32.mrb[0].mxu0 }
  0xfa   : > { %v332_v57 = vpop.f32.mrb[1].mxu0  ;;  %v1202_v58 = vpop.f32.mrb[0].mxu1  ;;  %v498_v7 = vmul.f32 %v1036_v56, %v1036_v56 }
  0xfb   : > { %v1037_v59 = vpop.f32.mrb[2].mxu0  ;;  %v1209_v60 = vpop.f32.mrb[1].mxu1  ;;  %v496_v0 = vmul.f32 %v332_v57, %v332_v57 }
  0xfc   : > { %v907_v61 = vpack.c.bf16 %v1037_v59, %v1036_v56  ;;  %v335_v62 = vpop.f32.mrb[3].mxu0  ;;  %v1211_v63 = vpop.f32.mrb[2].mxu1  ;;  %v499_v10 = vmul.f32 %v1037_v59, %v1037_v59 }
  0xfd   : > { %v459_v1 = vadd.f32 %v335_v62, %v332_v57  ;;  %v497_v2 = vmul.f32 %v335_v62, %v335_v62  ;;  %v902_v3 = vpack.c.bf16 %v335_v62, %v332_v57  ;;  %v1213_v4 = vpop.f32.mrb[3].mxu1  ;;  %v947_v5 = vpack.c.bf16 %v1211_v63, %v1202_v58 }
  0xfe   : > { %979 = vst [vmem:[%s1207_s11 + $0x8] sm:$0xff] %v907_v61   ;;  %v942_v6 = vpack.c.bf16 %v1213_v4, %v1209_v60 }
  0xff   : > { %v460_v8 = vadd.f32 %v1036_v56, %v459_v1  ;;  %v528_v9 = vadd.f32 %v497_v2, %v496_v0  ;;  %903 = vst [vmem:[%s1207_s11] sm:$0xff] %v902_v3   ;;  %987 = vst [vmem:[%s1207_s11 + $0x48] sm:$0xff] %v947_v5  }
 0x100   : > { %986 = vst [vmem:[%s1207_s11 + $0x40] sm:$0xff] %v942_v6  }
 0x101   : > { %v529_v11 = vadd.f32 %v528_v9, %v498_v7  ;;  %v1040_v12 = vpop.f32.mrb[4].mxu0  ;;  %v461_v13 = vadd.f32 %v1037_v59, %v460_v8 }
 0x102   : > { %v348_v14 = vpop.f32.mrb[5].mxu0  ;;  %v1223_v15 = vpop.f32.mrb[4].mxu1  ;;  %v502_v31 = vmul.f32 %v1040_v12, %v1040_v12 }
 0x103   : > { %v462_v16 = vadd.f32 %v461_v13, %v348_v14  ;;  %v500_v17 = vmul.f32 %v348_v14, %v348_v14  ;;  %v530_v18 = vadd.f32 %v529_v11, %v499_v10  ;;  %v1041_v19 = vpop.f32.mrb[6].mxu0  ;;  %v1225_v20 = vpop.f32.mrb[5].mxu1 }
 0x104   : > { %v917_v21 = vpack.c.bf16 %v1041_v19, %v1040_v12  ;;  %v351_v22 = vpop.f32.mrb[7].mxu0  ;;  %v1227_v23 = vpop.f32.mrb[6].mxu1  ;;  %v503_v34 = vmul.f32 %v1041_v19, %v1041_v19 }
 0x105   : > { %v531_v24 = vadd.f32 %v530_v18, %v500_v17  ;;  %v463_v25 = vadd.f32 %v462_v16, %v351_v22  ;;  %v501_v26 = vmul.f32 %v351_v22, %v351_v22  ;;  %v912_v27 = vpack.c.bf16 %v351_v22, %v348_v14  ;;  %v1229_v28 = vpop.f32.mrb[7].mxu1 }
 0x106   : > { %981 = vst [vmem:[%s1207_s11 + $0x18] sm:$0xff] %v917_v21   ;;  %v957_v29 = vpack.c.bf16 %v1227_v23, %v1223_v15  ;;  %v952_v30 = vpack.c.bf16 %v1229_v28, %v1225_v20 }
 0x107   : > { %v464_v32 = vadd.f32 %v1040_v12, %v463_v25  ;;  %v532_v33 = vadd.f32 %v531_v24, %v501_v26  ;;  %980 = vst [vmem:[%s1207_s11 + $0x10] sm:$0xff] %v912_v27  }
 0x108   : > { %989 = vst [vmem:[%s1207_s11 + $0x58] sm:$0xff] %v957_v29   ;;  %988 = vst [vmem:[%s1207_s11 + $0x50] sm:$0xff] %v952_v30   ;;  %v512_v29 = vmul.f32 %v1209_v60, %v1209_v60 }
 0x109   : > { %v533_v35 = vadd.f32 %v532_v33, %v502_v31  ;;  %v1044_v36 = vpop.f32.mrb[8].mxu0  ;;  %v465_v37 = vadd.f32 %v1041_v19, %v464_v32 }
 0x10a   : > { %v364_v38 = vpop.f32.mrb[9].mxu0  ;;  %v1239_v39 = vpop.f32.mrb[8].mxu1  ;;  %v506_v55 = vmul.f32 %v1044_v36, %v1044_v36 }
 0x10b   : > { %v466_v40 = vadd.f32 %v465_v37, %v364_v38  ;;  %v504_v41 = vmul.f32 %v364_v38, %v364_v38  ;;  %v534_v42 = vadd.f32 %v533_v35, %v503_v34  ;;  %v1045_v43 = vpop.f32.mrb[10].mxu0  ;;  %v1241_v44 = vpop.f32.mrb[9].mxu1  ;;  %v513_v34 = vmul.f32 %v1213_v4, %v1213_v4 }
 0x10c   : > { %v927_v45 = vpack.c.bf16 %v1045_v43, %v1044_v36  ;;  %v367_v46 = vpop.f32.mrb[11].mxu0  ;;  %v1243_v47 = vpop.f32.mrb[10].mxu1  ;;  %v507_v59 = vmul.f32 %v1045_v43, %v1045_v43  ;;  %v514_v35 = vmul.f32 %v1202_v58, %v1202_v58 }
 0x10d   : > { %v535_v48 = vadd.f32 %v534_v42, %v504_v41  ;;  %v467_v49 = vadd.f32 %v466_v40, %v367_v46  ;;  %v505_v50 = vmul.f32 %v367_v46, %v367_v46  ;;  %v922_v51 = vpack.c.bf16 %v367_v46, %v364_v38  ;;  %v1245_v52 = vpop.f32.mrb[11].mxu1 }
 0x10e   : > { %983 = vst [vmem:[%s1207_s11 + $0x28] sm:$0xff] %v927_v45   ;;  %v967_v53 = vpack.c.bf16 %v1243_v47, %v1239_v39  ;;  %v962_v54 = vpack.c.bf16 %v1245_v52, %v1241_v44  ;;  %v515_v38 = vmul.f32 %v1211_v63, %v1211_v63  ;;  %v517_v46 = vmul.f32 %v1229_v28, %v1229_v28 }
 0x10f   : > { %v468_v56 = vadd.f32 %v1044_v36, %v467_v49  ;;  %v536_v57 = vadd.f32 %v535_v48, %v505_v50  ;;  %982 = vst [vmem:[%s1207_s11 + $0x20] sm:$0xff] %v922_v51  }
 0x110   : > { %991 = vst [vmem:[%s1207_s11 + $0x68] sm:$0xff] %v967_v53   ;;  %990 = vst [vmem:[%s1207_s11 + $0x60] sm:$0xff] %v962_v54  }
 0x111   : > { %v537_v61 = vadd.f32 %v536_v57, %v506_v55  ;;  %v1048_v62 = vpop.f32.mrb[12].mxu0  ;;  %v469_v0 = vadd.f32 %v1045_v43, %v468_v56  ;;  %v521_v56 = vmul.f32 %v1245_v52, %v1245_v52 }
 0x112   : > { %v380_v1 = vpop.f32.mrb[13].mxu0  ;;  %v1255_v2 = vpop.f32.mrb[12].mxu1  ;;  %v510_v21 = vmul.f32 %v1048_v62, %v1048_v62 }
 0x113   : > { %v470_v3 = vadd.f32 %v469_v0, %v380_v1  ;;  %v508_v5 = vmul.f32 %v380_v1, %v380_v1  ;;  %v538_v6 = vadd.f32 %v537_v61, %v507_v59  ;;  %v1049_v7 = vpop.f32.mrb[14].mxu0  ;;  %v444_v8 = vpop.f32.mrb[13].mxu1 }
 0x114   : > { %v937_v9 = vpack.c.bf16 %v1049_v7, %v1048_v62  ;;  %v383_v10 = vpop.f32.mrb[15].mxu0  ;;  %v1257_v11 = vpop.f32.mrb[14].mxu1  ;;  %v511_v25 = vmul.f32 %v1049_v7, %v1049_v7 }
 0x115   : > { %v539_v12 = vadd.f32 %v538_v6, %v508_v5  ;;  %v471_v13 = vadd.f32 %v470_v3, %v383_v10  ;;  %v509_v14 = vmul.f32 %v383_v10, %v383_v10  ;;  %v932_v16 = vpack.c.bf16 %v383_v10, %v380_v1  ;;  %v447_v17 = vpop.f32.mrb[15].mxu1 }
 0x116   : > { %985 = vst [vmem:[%s1207_s11 + $0x38] sm:$0xff] %v937_v9   ;;  %v977_v18 = vpack.c.bf16 %v1257_v11, %v1255_v2  ;;  %v972_v19 = vpack.c.bf16 %v447_v17, %v444_v8  ;;  %v526_v6 = vmul.f32 %v1255_v2, %v1255_v2  ;;  %v527_v9 = vmul.f32 %v1257_v11, %v1257_v11 }
 0x117   : > { %v472_v22 = vadd.f32 %v1048_v62, %v471_v13  ;;  %v540_v24 = vadd.f32 %v539_v12, %v509_v14  ;;  %984 = vst [vmem:[%s1207_s11 + $0x30] sm:$0xff] %v932_v16   ;;  %v524_v62 = vmul.f32 %v444_v8, %v444_v8 }
 0x118   : > { %993 = vst [vmem:[%s1207_s11 + $0x78] sm:$0xff] %v977_v18   ;;  %992 = vst [vmem:[%s1207_s11 + $0x70] sm:$0xff] %v972_v19  }
 0x119   : > { %v541_v26 = vadd.f32 %v540_v24, %v510_v21  ;;  %v473_v27 = vadd.f32 %v1049_v7, %v472_v22 }
 0x11b   : > { %v474_v30 = vadd.f32 %v473_v27, %v1209_v60  ;;  %v542_v31 = vadd.f32 %v541_v26, %v511_v25  ;;  %v516_v60 = vmul.f32 %v1225_v20, %v1225_v20 }
 0x11d   : > { %v543_v32 = vadd.f32 %v542_v31, %v512_v29  ;;  %v475_v33 = vadd.f32 %v474_v30, %v1213_v4 }
 0x11f   : > { %v476_v36 = vadd.f32 %v1202_v58, %v475_v33  ;;  %v544_v37 = vadd.f32 %v543_v32, %v513_v34  ;;  %v518_v58 = vmul.f32 %v1223_v15, %v1223_v15 }
 0x121   : > { %v545_v40 = vadd.f32 %v544_v37, %v514_v35  ;;  %v477_v41 = vadd.f32 %v1211_v63, %v476_v36  ;;  %v519_v63 = vmul.f32 %v1227_v23, %v1227_v23 }
 0x123   : > { %v478_v42 = vadd.f32 %v477_v41, %v1225_v20  ;;  %v546_v43 = vadd.f32 %v545_v40, %v515_v38  ;;  %v520_v20 = vmul.f32 %v1241_v44, %v1241_v44 }
 0x125   : > { %v547_v45 = vadd.f32 %v546_v43, %v516_v60  ;;  %v479_v4 = vadd.f32 %v478_v42, %v1229_v28 }
 0x127   : > { %v480_v48 = vadd.f32 %v1223_v15, %v479_v4  ;;  %v548_v49 = vadd.f32 %v547_v45, %v517_v46  ;;  %v522_v15 = vmul.f32 %v1239_v39, %v1239_v39 }
 0x129   : > { %v549_v50 = vadd.f32 %v548_v49, %v518_v58  ;;  %v481_v51 = vadd.f32 %v1227_v23, %v480_v48  ;;  %v523_v23 = vmul.f32 %v1243_v47, %v1243_v47 }
 0x12b   : > { %v482_v53 = vadd.f32 %v481_v51, %v1241_v44  ;;  %v550_v54 = vadd.f32 %v549_v50, %v519_v63 }
 0x12d   : > { %v551_v55 = vadd.f32 %v550_v54, %v520_v20  ;;  %v483_v28 = vadd.f32 %v482_v53, %v1245_v52  ;;  %v525_v52 = vmul.f32 %v447_v17, %v447_v17 }
 0x12f   : > { %v484_v57 = vadd.f32 %v1239_v39, %v483_v28  ;;  %v552_v59 = vadd.f32 %v551_v55, %v521_v56 }
 0x131   : > { %v553_v61 = vadd.f32 %v552_v59, %v522_v15  ;;  %v485_v44 = vadd.f32 %v1243_v47, %v484_v57 }
 0x133   : > { %v486_v0 = vadd.f32 %v485_v44, %v444_v8  ;;  %v554_v1 = vadd.f32 %v553_v61, %v523_v23 }
 0x135   : > { %v555_v3 = vadd.f32 %v554_v1, %v524_v62  ;;  %v487_v5 = vadd.f32 %v486_v0, %v447_v17 }
 0x137   : > { %v488_v39 = vadd.f32 %v1255_v2, %v487_v5  ;;  %v556_v7 = vadd.f32 %v555_v3, %v525_v52 }
 0x139   : > { %v489_v10 = vadd.f32 %v1257_v11, %v488_v39  ;;  %v557_v12 = vadd.f32 %v556_v7, %v526_v6 }
 0x13b   : > { %v490_v47 = vrot.slane %v489_v10, 4  ;;  %v558_v13 = vadd.f32 %v557_v12, %v527_v9 }
 0x13d   : > { %v491_v8 = vadd.f32 %v490_v47, %v489_v10  ;;  %v559_v14 = vrot.slane %v558_v13, 4 }
 0x13f   : > { %v492_v16 = vrot.slane %v491_v8, 2  ;;  %v560_v18 = vadd.f32 %v559_v14, %v558_v13 }
 0x141   : > { %v493_v17 = vadd.f32 %v492_v16, %v491_v8  ;;  %v561_v19 = vrot.slane %v560_v18, 2 }
 0x143   : > { %v494_v21 = vrot.slane %v493_v17, 1  ;;  %v562_v22 = vadd.f32 %v561_v19, %v560_v18 }
 0x145   : > { %v563_v2 = vrot.slane %v562_v22, 1  ;;  %v495_v11 = vadd.f32 %v494_v21, %v493_v17 }
 0x147   : > { %v564_v24 = vadd.f32 %v563_v2, %v562_v22 }
 0x149   : > { %v566_v25 = vsel %vm565_vm0, %v495_v11, %v564_v24 }
 0x14a   : > { %567 = vst [vmem:[%s184_s17] sm:$0x3] %v566_v25 }
 0x14b PF: > { %s14_s12 = sadd.s32 1, %s1104_s12  }
 0x14c   : > { %p11_p5 = scmp.ge.s32.totalorder %s14_s12, 4  }
 0x14e   :  { %13 = sbr.rel (!%p11_p5) target bundleno = 1 (0x1), region = 70 }

// kernel: bottleneck_adaibn_forward.5
= control target key start
LH: loop header
LB: loop body
LE: loop exit
PB: predicated region body
PF: predicated region fallthrough
CT: control target
= control target key end

     0   :  { %s7965_s18 = smov 0   ;;  %s9894_s0 = inlined_call_operand.vmem [shape: bf16[2,16,16,128], index: 0, kind: input, shape index: {}]   ;;  %s9895_s1 = inlined_call_operand.vmem [shape: f32[1,128], index: 1, kind: input, shape index: {}]   ;;  %s9896_s2 = inlined_call_operand.vmem [shape: f32[1,128], index: 2, kind: input, shape index: {}]   ;;  %s9897_s3 = inlined_call_operand.vmem [shape: bf16[1152,128], index: 3, kind: input, shape index: {}]   ;;  %s9898_s4 = inlined_call_operand.vmem [shape: bf16[2,16,16,128], index: 4, kind: output, shape index: {0}]   ;;  %s9899_s5 = inlined_call_operand.vmem [shape: f32[2,2,128], index: 5, kind: output, shape index: {1}]  }
   0x1 LB: > { %s6207_s19 = sadd.s32 4294967295, %s7932_s18   ;;  %p6211_p0 = scmp.ge.s32.totalorder %s7932_s18, 1  ;;  %s7932_s18 = sphi %s7965_s18, %s16_s18  }
   0x2   : > { %p190_p1 = scmp.lt.s32.totalorder %s7932_s18, 3 }
   0x4   : > { %p191_p2 = pnand %p6211_p0, %p190_p1 }
   0x6   : > { %194 = sbr.rel (%p191_p2) target bundleno = 717 (0x2cd), region = 36 }
   0xd   : > { %v7718_v0 = vld [vmem:[%s9897_s3 + $0x40] sm:$0xff]   ;;  %v7934_v2 = vmov 0   ;;  %v7720_v3 = vld [vmem:[%s9897_s3 + $0x48] sm:$0xff]   ;;  %v7722_v5 = vld [vmem:[%s9897_s3 + $0x50] sm:$0xff]   ;;  %p222_p3 = scmp.lt.s32.totalorder %s6207_s19, 1  ;;  %vm435_vm1 = vcmask 1040384  }
   0xe   : > { %v7719_v1 = vld [vmem:[%s9897_s3 + $0x100] sm:$0xff]   ;;  %427 = vst [vmem:[#allocation2] sm:$0xf] %v7934_v2  ;;  %428 = vst [vmem:[#allocation2 + $0x4] sm:$0xf] %v7934_v2  ;;  %7005 = vmatprep.subr.bf16.mxu1 %v7718_v0  ;;  %v7721_v4 = vld [vmem:[%s9897_s3 + $0x108] sm:$0xff]  }
   0xf   : > { %429 = vst [vmem:[#allocation2 + $0x8] sm:$0x1] %v7934_v2  ;;  %431 = vst [vmem:[#allocation2 + $0xcc] sm:$0xf] %v7934_v2  ;;  %7197 = vmatprep.subr.bf16.mxu0 %v7719_v1  ;;  %7006 = vmatpush3.bf16.msra.mxu1 %v7718_v0  ;;  %v7723_v6 = vld [vmem:[%s9897_s3 + $0x110] sm:$0xff]   ;;  %v7724_v7 = vld [vmem:[%s9897_s3 + $0x58] sm:$0xff]  }
  0x10   : > { %432 = vst [vmem:[#allocation2 + $0xd0] sm:$0xf] %v7934_v2  ;;  %433 = vst [vmem:[#allocation2 + $0xd4] sm:$0x1] %v7934_v2  ;;  %7198 = vmatpush3.bf16.msra.mxu0 %v7719_v1  ;;  %7007 = vmatprep.subr.bf16.mxu1 %v7720_v3  ;;  %v7725_v8 = vld [vmem:[%s9897_s3 + $0x118] sm:$0xff]   ;;  %s9993_s19 = smov (!%p222_p3, %s6207_s19), 1 }
  0x11   : > { %7199 = vmatprep.subr.bf16.mxu0 %v7721_v4  ;;  %v7726_v9 = vld [vmem:[%s9897_s3 + $0x60] sm:$0xff]   ;;  %s6549_s15 = sshll.u32 %s9993_s19, 7  ;;  %v7728_v11 = vld [vmem:[%s9897_s3 + $0x68] sm:$0xff]   ;;  %vm1116_vm0 = vsmask.f32 3328  ;;  %v7730_v18 = vld [vmem:[%s9897_s3 + $0x70] sm:$0xff]  }
  0x12   : > { %v7727_v10 = vld [vmem:[%s9897_s3 + $0x120] sm:$0xff]   ;;  %s8018_s22 = scalar_lea.vmem %s9894_s0, %s6549_s15  ;;  %v7729_v15 = vld [vmem:[%s9897_s3 + $0x128] sm:$0xff]   ;;  %vm1117_vm2 = vsmask.f32 7440  ;;  %v7731_v22 = vld [vmem:[%s9897_s3 + $0x130] sm:$0xff]   ;;  %vm938_vm7 = vcmask 1043456   ;;  %s9864_s26 = scalar_lea.vmem %s9898_s4, %s6549_s15 }
  0x13   : > { %7008 = vmatpush3.bf16.msra.mxu1 %v7720_v3  ;;  %v8032_v25 = vld [vmem:[%s9895_s1] ss:$0 sm:$0xff]  ;;  %v438_v31 = vld [vmem:[#allocation2 + $0xc] sm:$0x1]  ;;  %vm8042_vm3 = vmor %vm1116_vm0, %vm1117_vm2  ;;  %vm436_vm4 = vsmask.f32 256 }
  0x14   : > { %7200 = vmatpush3.bf16.msra.mxu0 %v7721_v4  ;;  %7009 = vmatprep.subr.bf16.mxu1 %v7722_v5  ;;  %v6616_v26 = vld [vmem:[%s8018_s22] sm:$0xff]   ;;  %vm486_vm5 = vsmask.f32 7938  ;;  %v488_v35 = vld [vmem:[#allocation2 + $0x14] sm:$0x1]  ;;  %vm8049_vm6 = vmand %vm435_vm1, %vm436_vm4  ;;  %vm2145_vm12 = vcmask 1042432  }
  0x15   : > { %7201 = vmatprep.subr.bf16.mxu0 %v7723_v6  ;;  %v1052_v12 = vld [vmem:[#allocation2] sm:$0xf]  ;;  %v1053_v13 = vld [vmem:[#allocation2 + $0x4] sm:$0xf]  ;;  %v6617_v30 = vunpack.c.l.bf16 %v6616_v26  ;;  %v6618_v34 = vunpack.c.h.bf16 %v6616_v26  ;;  %v439_v42 = vsel %vm8049_vm6, 0, %v438_v31  ;;  %vm8058_vm8 = vmand %vm435_vm1, %vm486_vm5  ;;  %vm2146_vm13 = vcmask 1046532  }
  0x16   : > { %v1100_v14 = vld [vmem:[#allocation2 + $0x8] sm:$0x1]  ;;  %v1120_v16 = vshrl.u32 %v1052_v12, 16  ;;  %v1123_v17 = vshll.u32 %v1052_v12, 16  ;;  %v1129_v19 = vshll.u32 %v1053_v13, 16  ;;  %v1133_v20 = vshrl.u32 %v1053_v13, 16  ;;  %vm8108_vm10 = vmand %vm938_vm7, %vm486_vm5 }
  0x17   : > { %7010 = vmatpush3.bf16.msra.mxu1 %v7722_v5  ;;  %v1139_v21 = vshll.u32 %v1100_v14, 16  ;;  %v8038_v29 = vld [vmem:[%s9896_s2] ss:$0 sm:$0xff]  ;;  %v309_v38 = vmul.f32 %v6617_v30, %v8032_v25  ;;  %v310_v41 = vmul.f32 %v6618_v34, %v8032_v25  ;;  %vm616_vm9 = vsmask.f32 4368  ;;  %v7732_v44 = vld [vmem:[%s9897_s3 + $0x78] sm:$0xff]   ;;  %vm8453_vm14 = vmor %vm2145_vm12, %vm2146_vm13 }
  0x18   : > { %7202 = vmatpush3.bf16.msra.mxu0 %v7723_v6  ;;  %7011 = vmatprep.subr.bf16.mxu1 %v7724_v7  ;;  %v1122_v23 = vrot.slane %v1120_v16, 4  ;;  %v1125_v24 = vrot.slane %v1123_v17, 5  ;;  %v1131_v27 = vrot.slane %v1129_v19, 5  ;;  %v1135_v28 = vrot.slane %v1133_v20, 4  ;;  %440 = vst [vmem:[#allocation2 + $0xc] sm:$0x1] %v439_v42  ;;  %vm8115_vm11 = vmor %vm436_vm4, %vm616_vm9 }
  0x19   : > { %7203 = vmatprep.subr.bf16.mxu0 %v7725_v8  ;;  %v1141_v37 = vrot.slane %v1139_v21, 5  ;;  %v347_v46 = vadd.f32 %v8038_v29, %v309_v38  ;;  %v489_v47 = vsel %vm8058_vm8, 0, %v488_v35  ;;  %v6759_v48 = vld [vmem:[%s8018_s22 + $0x8] sm:$0xff]   ;;  %v441_v49 = vld [vmem:[#allocation2 + $0x18] sm:$0x1]  ;;  %v348_v52 = vadd.f32 %v8038_v29, %v310_v41  ;;  %v6760_v0 = vld [vmem:[%s8018_s22 + $0x10] sm:$0xff]  }
  0x1a   : > { %v1126_v33 = vor.u32 %v1125_v24, %v1122_v23  ;;  %v1136_v36 = vor.u32 %v1135_v28, %v1131_v27  ;;  %v7733_v50 = vld [vmem:[%s9897_s3 + $0x138] sm:$0xff]   ;;  %490 = vst [vmem:[#allocation2 + $0x14] sm:$0x1] %v489_v47  ;;  %v6621_v53 = vunpack.c.l.bf16 %v6759_v48  ;;  %v6622_v54 = vunpack.c.h.bf16 %v6759_v48  ;;  %v491_v55 = vld [vmem:[#allocation2 + $0x20] sm:$0x1]  ;;  %v7778_v39 = vld [vmem:[%s9897_s3 + $0xa8] sm:$0xff]  }
  0x1b   : > { %7012 = vmatpush3.bf16.msra.mxu1 %v7724_v7  ;;  %v379_v57 = vmax.f32 %v347_v46, 0.0  ;;  %v442_v58 = vsel %vm8049_vm6, 0, %v441_v49  ;;  %v492_v59 = vsel %vm8058_vm8, 0, %v491_v55  ;;  %v380_v61 = vmax.f32 %v348_v52, 0.0  ;;  %v444_v1 = vld [vmem:[#allocation2 + $0x24] sm:$0x1] }
  0x1c   : > { %7204 = vmatpush3.bf16.msra.mxu0 %v7725_v8  ;;  %7013 = vmatprep.subr.bf16.mxu1 %v7726_v9  ;;  %v1127_v40 = vrot.slane %v1126_v33, 4  ;;  %v1137_v45 = vrot.slane %v1136_v36, 4  ;;  %v311_v62 = vmul.f32 %v6621_v53, %v8032_v25  ;;  %v312_v63 = vmul.f32 %v6622_v54, %v8032_v25  ;;  %443 = vst [vmem:[#allocation2 + $0x18] sm:$0x1] %v442_v58  ;;  %v494_v2 = vld [vmem:[#allocation2 + $0x2c] sm:$0x1] }
  0x1d   : > { %7205 = vmatprep.subr.bf16.mxu0 %v7727_v10  ;;  %493 = vst [vmem:[#allocation2 + $0x20] sm:$0x1] %v492_v59  ;;  %v6551_v3 = vpack.c.bf16 %v379_v57, %v379_v57  ;;  %v8087_v4 = vld [vmem:[%s9897_s3] sm:$0xff]   ;;  %v6625_v5 = vunpack.c.l.bf16 %v6760_v0  ;;  %v6626_v6 = vunpack.c.h.bf16 %v6760_v0  ;;  %v445_v7 = vsel %vm8049_vm6, 0, %v444_v1  ;;  %v6761_v17 = vld [vmem:[%s8018_s22 + $0x18] sm:$0xff]   ;;  %s6216_s15 = sshll.u32 %s9993_s19, 1 }
  0x1e   : > { %v1132_v51 = vsel %vm8042_vm3, %v1127_v40, %v1131_v27  ;;  %v1142_v56 = vsel %vm8042_vm3, %v1137_v45, %v1141_v37  ;;  %v6552_v8 = vpack.c.bf16 %v380_v61, %v380_v61  ;;  %446 = vst [vmem:[#allocation2 + $0x24] sm:$0x1] %v445_v7  ;;  %v495_v12 = vsel %vm8058_vm8, 0, %v494_v2  ;;  %v447_v57 = vld [vmem:[#allocation2 + $0x30] sm:$0x1]  ;;  %s235_s29 = scalar_lea.vmem %s9899_s5, %s6216_s15 }
  0x1f   : > { %7014 = vmatpush3.bf16.msra.mxu1 %v7726_v9  ;;  %v6251_v60 = vcombine.low %v1132_v51, %v1142_v56  ;;  %v8094_v9 = vld [vmem:[%s9897_s3 + $0x140] sm:$0xff]   ;;  %v619_v13 = vshrl.u32 %v6551_v3, 16  ;;  %v622_v14 = vshll.u32 %v6551_v3, 16  ;;  %v314_v16 = vmul.f32 %v6626_v6, %v8032_v25  ;;  %496 = vst [vmem:[#allocation2 + $0x2c] sm:$0x1] %v495_v12 }
  0x20   : > { %7206 = vmatpush3.bf16.msra.mxu0 %v7727_v10  ;;  %7015 = vmatprep.subr.bf16.mxu1 %v7728_v11  ;;  %v349_v10 = vadd.f32 %v8038_v29, %v311_v62  ;;  %v630_v19 = vshll.u32 %v6552_v8, 16  ;;  %v940_v23 = vld [vmem:[#allocation2 + $0xc] sm:$0xf]  ;;  %v6629_v27 = vunpack.c.l.bf16 %v6761_v17  ;;  %v6630_v34 = vunpack.c.h.bf16 %v6761_v17  ;;  %v497_v62 = vld [vmem:[#allocation2 + $0x38] sm:$0x1] }
  0x21   : > { %7207 = vmatprep.subr.bf16.mxu0 %v7729_v15  ;;  %7021 = vmatprep.mubr.bf16.mxu1 %v6251_v60  ;;  %v352_v26 = vadd.f32 %v8038_v29, %v314_v16  ;;  %v944_v38 = vld [vmem:[#allocation2 + $0x14] sm:$0x1] }
  0x22   : > { %v381_v20 = vmax.f32 %v349_v10, 0.0  ;;  %v315_v41 = vmul.f32 %v6629_v27, %v8032_v25  ;;  %v316_v60 = vmul.f32 %v6630_v34, %v8032_v25 }
  0x23   : > { %7016 = vmatpush3.bf16.msra.mxu1 %v7728_v11  ;;  %v350_v11 = vadd.f32 %v8038_v29, %v312_v63  ;;  %v947_v54 = vld [vmem:[#allocation2 + $0x18] sm:$0xf] }
  0x24   : > { %7208 = vmatpush3.bf16.msra.mxu0 %v7729_v15  ;;  %7017 = vmatprep.subr.bf16.mxu1 %v7730_v18  ;;  %v313_v15 = vmul.f32 %v6625_v5, %v8032_v25  ;;  %v6553_v31 = vpack.c.bf16 %v381_v20, %v381_v20  ;;  %v951_v55 = vld [vmem:[#allocation2 + $0x20] sm:$0x1]  ;;  %v353_v61 = vadd.f32 %v8038_v29, %v315_v41 }
  0x25   : > { %7209 = vmatprep.subr.bf16.mxu0 %v7731_v22  ;;  %v382_v21 = vmax.f32 %v350_v11, 0.0  ;;  %v954_v11 = vld [vmem:[#allocation2 + $0x24] sm:$0xf]  ;;  %v354_v12 = vadd.f32 %v8038_v29, %v316_v60 }
  0x26   : > { %v351_v24 = vadd.f32 %v8038_v29, %v313_v15  ;;  %v636_v45 = vshrl.u32 %v6553_v31, 16  ;;  %v639_v46 = vshll.u32 %v6553_v31, 16 }
  0x27   : > { %7018 = vmatpush3.bf16.msra.mxu1 %v7730_v18  ;;  %v627_v18 = vshrl.u32 %v6552_v8, 16  ;;  %v6554_v33 = vpack.c.bf16 %v382_v21, %v382_v21  ;;  %v386_v20 = vmax.f32 %v354_v12, 0.0  ;;  %v498_v21 = vsel %vm8058_vm8, 0, %v497_v62 }
  0x28   : > { %7210 = vmatpush3.bf16.msra.mxu0 %v7731_v22  ;;  %7019 = vmatprep.subr.bf16.mxu1 %v7732_v44  ;;  %v621_v22 = vrot.slane %v619_v13, 7  ;;  %v383_v40 = vmax.f32 %v351_v24, 0.0  ;;  %v638_v53 = vrot.slane %v636_v45, 7  ;;  %v385_v13 = vmax.f32 %v353_v61, 0.0  ;;  %499 = vst [vmem:[#allocation2 + $0x38] sm:$0x1] %v498_v21 }
  0x29   : > { %7211 = vmatprep.subr.bf16.mxu0 %v7733_v50  ;;  %v629_v28 = vrot.slane %v627_v18, 7  ;;  %v644_v48 = vshrl.u32 %v6554_v33, 16  ;;  %v647_v49 = vshll.u32 %v6554_v33, 16  ;;  %v448_v18 = vsel %vm8049_vm6, 0, %v447_v57 }
  0x2a   : > { %v624_v36 = vor.u32 %v622_v14, %v621_v22  ;;  %v625_v37 = vrot.slane %v621_v22, 4  ;;  %v6555_v56 = vpack.c.bf16 %v383_v40, %v383_v40  ;;  %v641_v63 = vor.u32 %v639_v46, %v638_v53  ;;  %v8134_v14 = vld [vmem:[%s8018_s22 + $0x20] sm:$0xff]   ;;  %449 = vst [vmem:[#allocation2 + $0x30] sm:$0x1] %v448_v18 }
  0x2b   : > { %7020 = vmatpush3.bf16.msra.mxu1 %v7732_v44  ;;  %v632_v42 = vor.u32 %v630_v19, %v629_v28  ;;  %v634_v44 = vrot.slane %v629_v28, 4  ;;  %v646_v58 = vrot.slane %v644_v48, 7  ;;  %v642_v0 = vrot.slane %v638_v53, 4 }
  0x2c   : > { %7212 = vmatpush3.bf16.msra.mxu0 %v7733_v50  ;;  %7053 = vmatprep.subr.bf16.mxu1 %v8087_v4  ;;  %v941_v47 = vsel %vm8108_vm10, %v624_v36, %v940_v23  ;;  %v384_v50 = vmax.f32 %v352_v26, 0.0  ;;  %v653_v1 = vshrl.u32 %v6555_v56, 16  ;;  %v656_v2 = vshll.u32 %v6555_v56, 16 }
  0x2d   : > { %7245 = vmatprep.subr.bf16.mxu0 %v8094_v9  ;;  %v633_v51 = vsel %vm8115_vm11, %v625_v37, %v632_v42  ;;  %942 = vst [vmem:[#allocation2 + $0xc] sm:$0xf] %v941_v47  ;;  %v945_v52 = vsel %vm8049_vm6, %v634_v44, %v944_v38  ;;  %v649_v3 = vor.u32 %v647_v49, %v646_v58  ;;  %v651_v5 = vrot.slane %v646_v58, 4 }
  0x2e   : > { %943 = vst [vmem:[#allocation2 + $0x10] sm:$0xf] %v633_v51  ;;  %946 = vst [vmem:[#allocation2 + $0x14] sm:$0x1] %v945_v52  ;;  %v6556_v59 = vpack.c.bf16 %v384_v50, %v384_v50  ;;  %v948_v8 = vsel %vm8108_vm10, %v641_v63, %v947_v54  ;;  %v8130_v10 = vrot.slane %v653_v1, 7  ;;  %v8152_v28 = vpack.c.bf16 %v385_v13, %v385_v13 }
  0x2f   : > { %v650_v15 = vsel %vm8115_vm11, %v642_v0, %v649_v3  ;;  %949 = vst [vmem:[#allocation2 + $0x18] sm:$0xf] %v948_v8  ;;  %v952_v16 = vsel %vm8049_vm6, %v651_v5, %v951_v55  ;;  %v6633_v38 = vunpack.c.l.bf16 %v8134_v14  ;;  %v8157_v45 = vpack.c.bf16 %v386_v20, %v386_v20 }
  0x30   : > { %v661_v6 = vshrl.u32 %v6556_v59, 16  ;;  %v664_v7 = vshll.u32 %v6556_v59, 16  ;;  %950 = vst [vmem:[#allocation2 + $0x1c] sm:$0xf] %v650_v15  ;;  %953 = vst [vmem:[#allocation2 + $0x20] sm:$0x1] %v952_v16  ;;  %v658_v19 = vor.u32 %v656_v2, %v8130_v10 }
  0x31   : > { %v659_v24 = vrot.slane %v8130_v10, 4 }
  0x32   : > { %v8140_v17 = vrot.slane %v661_v6, 7  ;;  %v955_v37 = vsel %vm8108_vm10, %v658_v19, %v954_v11 }
  0x33   : > { %956 = vst [vmem:[#allocation2 + $0x24] sm:$0xf] %v955_v37 }
  0x34   : > { %v1054_v22 = vld [vmem:[#allocation2 + $0xc] sm:$0xf]  ;;  %v8149_v26 = vor.u32 %v664_v7, %v8140_v17  ;;  %v668_v27 = vrot.slane %v8140_v17, 4  ;;  %v7743_v17 = vld [vmem:[%s9897_s3 + $0x18] sm:$0xff]  }
  0x35   : > { %v2966_v23 = vld [vmem:[#allocation2 + $0xc] sm:$0xf]  ;;  %v1055_v31 = vld [vmem:[#allocation2 + $0x10] sm:$0xf]  ;;  %v1101_v33 = vld [vmem:[#allocation2 + $0x14] sm:$0x1] }
  0x36   : > { %v1144_v34 = vshrl.u32 %v1054_v22, 16  ;;  %v1147_v36 = vshll.u32 %v1054_v22, 16  ;;  %v1153_v40 = vshll.u32 %v1055_v31, 16  ;;  %v1157_v41 = vshrl.u32 %v1055_v31, 16  ;;  %v2967_v44 = vld [vmem:[#allocation2 + $0x10] sm:$0xf] }
  0x37   : > { %v1163_v42 = vshll.u32 %v1101_v33, 16  ;;  %v8159_v48 = vld [vmem:[#allocation2 + $0x14] sm:$0x1]  ;;  %v3015_v49 = vshrl.u32 %v2966_v23, 16  ;;  %v3018_v50 = vshll.u32 %v2966_v23, 16  ;;  %v3024_v54 = vshll.u32 %v2967_v44, 16 }
  0x38   : > { %v1146_v46 = vrot.slane %v1144_v34, 4  ;;  %v1149_v47 = vrot.slane %v1147_v36, 5  ;;  %v1155_v51 = vrot.slane %v1153_v40, 5  ;;  %v1159_v52 = vrot.slane %v1157_v41, 4  ;;  %v2969_v59 = vld [vmem:[#allocation2 + $0x18] sm:$0xf] }
  0x39   : > { %v1165_v53 = vrot.slane %v1163_v42, 5  ;;  %v3017_v56 = vrot.slane %v3015_v49, 4  ;;  %v3020_v57 = vrot.slane %v3018_v50, 5  ;;  %v3028_v58 = vshrl.u32 %v2967_v44, 16  ;;  %v8163_v0 = vld [vmem:[#allocation2 + $0x1c] sm:$0xf] }
  0x3a   : > { %v1150_v55 = vor.u32 %v1149_v47, %v1146_v46  ;;  %v1160_v60 = vor.u32 %v1159_v52, %v1155_v51  ;;  %v3026_v61 = vrot.slane %v3024_v54, 5  ;;  %v3034_v62 = vshll.u32 %v8159_v48, 16  ;;  %v8165_v8 = vld [vmem:[#allocation2 + $0x20] sm:$0x1]  ;;  %v1056_v23 = vld [vmem:[#allocation2 + $0x18] sm:$0xf] }
  0x3b   : > { %v3788_v63 = vrot.slane %v8159_v48, 5  ;;  %v3021_v2 = vor.u32 %v3020_v57, %v3017_v56  ;;  %v3030_v3 = vrot.slane %v3028_v58, 4  ;;  %v3039_v5 = vshrl.u32 %v2969_v59, 16  ;;  %v1057_v37 = vld [vmem:[#allocation2 + $0x1c] sm:$0xf]  ;;  %v7737_v40 = vld [vmem:[%s9897_s3 + $0x8] sm:$0xff]  }
  0x3c   : > { %v1151_v1 = vrot.slane %v1150_v55, 4  ;;  %v1161_v6 = vrot.slane %v1160_v60, 4  ;;  %v3036_v7 = vrot.slane %v3034_v62, 5  ;;  %v3042_v11 = vshll.u32 %v2969_v59, 16  ;;  %v1102_v47 = vld [vmem:[#allocation2 + $0x20] sm:$0x1] }
  0x3d   : > { %v3048_v12 = vshll.u32 %v8163_v0, 16  ;;  %v3022_v15 = vrot.slane %v3021_v2, 4  ;;  %v3031_v16 = vor.u32 %v3030_v3, %v3026_v61  ;;  %v3041_v18 = vrot.slane %v3039_v5, 4  ;;  %v958_v49 = vld [vmem:[#allocation2 + $0x2c] sm:$0x1]  ;;  %v7740_v55 = vld [vmem:[%s9897_s3 + $0x10] sm:$0xff]  }
  0x3e   : > { %v1156_v13 = vsel %vm8042_vm3, %v1151_v1, %v1155_v51  ;;  %v1166_v19 = vsel %vm8042_vm3, %v1161_v6, %v1165_v53  ;;  %v3044_v20 = vrot.slane %v3042_v11, 5  ;;  %v3052_v22 = vshrl.u32 %v8163_v0, 16  ;;  %v1058_v54 = vld [vmem:[#allocation2 + $0x24] sm:$0xf] }
  0x3f   : > { %v3050_v21 = vrot.slane %v3048_v12, 5  ;;  %v6252_v31 = vcombine.low %v1156_v13, %v1166_v19  ;;  %v3027_v33 = vsel %vm8042_vm3, %v3022_v15, %v3026_v61  ;;  %v3032_v34 = vrot.slane %v3031_v16, 4  ;;  %v2972_v6 = vld [vmem:[#allocation2 + $0x24] sm:$0xf] }
  0x40   : > { %v3058_v36 = vshll.u32 %v8165_v8, 16  ;;  %v3045_v41 = vor.u32 %v3044_v20, %v3041_v18  ;;  %v3054_v42 = vrot.slane %v3052_v22, 4  ;;  %v3792_v44 = vrot.slane %v8163_v0, 5 }
  0x41   : > { %v3795_v46 = vrot.slane %v8165_v8, 5  ;;  %7022 = vmatmul.mubr.bf16.vlgmr.msra.gmra.mrb[0].mxu1 %v6252_v31  ;;  %v3037_v50 = vsel %vm8042_vm3, %v3032_v34, %v3036_v7  ;;  %v1168_v52 = vshrl.u32 %v1056_v23, 16  ;;  %v1171_v53 = vshll.u32 %v1056_v23, 16 }
  0x42   : > { %v3060_v51 = vrot.slane %v3058_v36, 5  ;;  %v6363_v56 = vcombine.low %v3027_v33, %v3037_v50  ;;  %7054 = vmatpush3.bf16.msra.mxu1 %v8087_v4  ;;  %v3046_v57 = vrot.slane %v3045_v41, 4  ;;  %v3055_v58 = vor.u32 %v3054_v42, %v3050_v21  ;;  %v7738_v50 = vld [vmem:[%s9897_s3 + $0x150] sm:$0xff]  }
  0x43   : > { %v8189_v59 = vrot.slane %v3792_v44, 4  ;;  %v1170_v60 = vrot.slane %v1168_v52, 4  ;;  %v1173_v61 = vrot.slane %v1171_v53, 5  ;;  %v1177_v62 = vshll.u32 %v1057_v37, 16  ;;  %7055 = vmatprep.subr.bf16.mxu1 %v7737_v40 }
  0x44   : > { %v1181_v1 = vshrl.u32 %v1057_v37, 16  ;;  %7213 = vmatprep.mubr.bf16.mxu0 %v6363_v56  ;;  %v3051_v2 = vsel %vm8042_vm3, %v3046_v57, %v3050_v21  ;;  %v3056_v3 = vrot.slane %v3055_v58, 4  ;;  %v1187_v5 = vshll.u32 %v1102_v47, 16  ;;  %v7746_v58 = vld [vmem:[%s9897_s3 + $0x20] sm:$0xff]  }
  0x45   : > { %v667_v4 = vsel %vm8115_vm11, %v659_v24, %v8149_v26  ;;  %v1174_v7 = vor.u32 %v1173_v61, %v1170_v60  ;;  %v1179_v11 = vrot.slane %v1177_v62, 5  ;;  %v959_v13 = vsel %vm8049_vm6, %v668_v27, %v958_v49  ;;  %v7736_v24 = vld [vmem:[%s9897_s3 + $0x148] sm:$0xff]  }
  0x46   : > { %v1183_v12 = vrot.slane %v1181_v1, 4  ;;  %957 = vst [vmem:[#allocation2 + $0x28] sm:$0xf] %v667_v4  ;;  %v3061_v15 = vsel %vm8042_vm3, %v3056_v3, %v3060_v51  ;;  %v1189_v16 = vrot.slane %v1187_v5, 5  ;;  %960 = vst [vmem:[#allocation2 + $0x2c] sm:$0x1] %v959_v13  ;;  %7056 = vmatpush3.bf16.msra.mxu1 %v7737_v40 }
  0x47   : > { %v1192_v18 = vshrl.u32 %v1058_v54, 16  ;;  %v1195_v10 = vshll.u32 %v1058_v54, 16  ;;  %v6364_v19 = vcombine.low %v3051_v2, %v3061_v15  ;;  %v1175_v26 = vrot.slane %v1174_v7, 4  ;;  %7057 = vmatprep.subr.bf16.mxu1 %v7740_v55  ;;  %v450_v7 = vld [vmem:[#allocation2 + $0x3c] sm:$0x1] }
  0x48   : > { %v1184_v20 = vor.u32 %v1183_v12, %v1179_v11  ;;  %v3063_v21 = vshrl.u32 %v2972_v6, 16  ;;  %v3066_v23 = vshll.u32 %v2972_v6, 16  ;;  %v670_v31 = vshrl.u32 %v8152_v28, 16  ;;  %v961_v6 = vld [vmem:[#allocation2 + $0x30] sm:$0xf] }
  0x49   : > { %v1194_v27 = vrot.slane %v1192_v18, 4  ;;  %v1197_v22 = vrot.slane %v1195_v10, 5  ;;  %7214 = vmatmul.mubr.bf16.vlgmr.msra.gmra.mrb[0].mxu0 %v6364_v19  ;;  %v1180_v33 = vsel %vm8042_vm3, %v1175_v26, %v1179_v11  ;;  %v673_v37 = vshll.u32 %v8152_v28, 16  ;;  %v7748_v26 = vld [vmem:[%s9897_s3 + $0x28] sm:$0xff]  }
  0x4a   : > { %v1185_v34 = vrot.slane %v1184_v20, 4  ;;  %v3065_v36 = vrot.slane %v3063_v21, 4  ;;  %7246 = vmatpush3.bf16.msra.mxu0 %v8094_v9  ;;  %v3068_v41 = vrot.slane %v3066_v23, 5  ;;  %v8215_v42 = vrot.slane %v670_v31, 7  ;;  %7058 = vmatpush3.bf16.msra.mxu1 %v7740_v55 }
  0x4b   : > { %v1198_v40 = vor.u32 %v1197_v22, %v1194_v27  ;;  %v678_v47 = vshrl.u32 %v8157_v45, 16  ;;  %7247 = vmatprep.subr.bf16.mxu0 %v7736_v24  ;;  %v681_v51 = vshll.u32 %v8157_v45, 16  ;;  %v6634_v28 = vunpack.c.h.bf16 %v8134_v14  ;;  %7059 = vmatprep.subr.bf16.mxu1 %v7743_v17  ;;  %v7739_v14 = vld [vmem:[%s9897_s3 + $0x158] sm:$0xff]  }
  0x4c   : > { %v1190_v49 = vsel %vm8042_vm3, %v1185_v34, %v1189_v16  ;;  %v317_v9 = vmul.f32 %v6633_v38, %v8032_v25  ;;  %v3069_v56 = vor.u32 %v3068_v41, %v3065_v36  ;;  %v675_v57 = vor.u32 %v673_v37, %v8215_v42  ;;  %v500_v16 = vld [vmem:[#allocation2 + $0x44] sm:$0x1]  ;;  %v6763_v36 = vld [vmem:[%s8018_s22 + $0x28] sm:$0xff]  }
  0x4d   : > { %v6253_v52 = vcombine.low %v1180_v33, %v1190_v49  ;;  %v1059_v53 = vld [vmem:[#allocation2 + $0x28] sm:$0xf]  ;;  %v8228_v54 = vrot.slane %v1198_v40, 4  ;;  %v1103_v45 = vld [vmem:[#allocation2 + $0x2c] sm:$0x1]  ;;  %v318_v38 = vmul.f32 %v6634_v28, %v8032_v25  ;;  %v676_v15 = vrot.slane %v8215_v42, 4 }
  0x4e   : > { %v2973_v55 = vld [vmem:[#allocation2 + $0x28] sm:$0xf]  ;;  %v1201_v60 = vshll.u32 %v1059_v53, 16  ;;  %v1205_v61 = vshrl.u32 %v1059_v53, 16  ;;  %v2974_v62 = vld [vmem:[#allocation2 + $0x2c] sm:$0x1]  ;;  %v355_v1 = vadd.f32 %v8038_v29, %v317_v9  ;;  %7248 = vmatpush3.bf16.msra.mxu0 %v7736_v24  ;;  %7060 = vmatpush3.bf16.msra.mxu1 %v7743_v17  ;;  %v962_v22 = vsel %vm8108_vm10, %v675_v57, %v961_v6 }
  0x4f   : > { %7025 = vmatprep.mubr.bf16.mxu1 %v6253_v52  ;;  %v1211_v2 = vshll.u32 %v1103_v45, 16  ;;  %v3070_v3 = vrot.slane %v3069_v56, 4  ;;  %v3072_v5 = vshll.u32 %v2973_v55, 16  ;;  %v3076_v4 = vshrl.u32 %v2973_v55, 16  ;;  %7249 = vmatprep.subr.bf16.mxu0 %v7738_v50  ;;  %v965_v17 = vld [vmem:[#allocation2 + $0x38] sm:$0x1] }
  0x50   : > { %v1203_v11 = vrot.slane %v1201_v60, 5  ;;  %v1207_v12 = vrot.slane %v1205_v61, 4  ;;  %v3082_v13 = vshll.u32 %v2974_v62, 16  ;;  %v680_v24 = vrot.slane %v678_v47, 7  ;;  %7061 = vmatprep.subr.bf16.mxu1 %v7746_v58  ;;  %963 = vst [vmem:[#allocation2 + $0x30] sm:$0xf] %v962_v22 }
  0x51   : > { %v1213_v18 = vrot.slane %v1211_v2, 5  ;;  %v3074_v10 = vrot.slane %v3072_v5, 5  ;;  %v3078_v19 = vrot.slane %v3076_v4, 4  ;;  %v453_v37 = vld [vmem:[#allocation2 + $0x48] sm:$0x1]  ;;  %v356_v41 = vadd.f32 %v8038_v29, %v318_v38  ;;  %v7741_v49 = vld [vmem:[%s9897_s3 + $0x160] sm:$0xff]  }
  0x52   : > { %v1204_v20 = vsel %vm8042_vm3, %v8228_v54, %v1203_v11  ;;  %v1208_v21 = vor.u32 %v1207_v12, %v1203_v11  ;;  %v3084_v27 = vrot.slane %v3082_v13, 5  ;;  %v683_v33 = vor.u32 %v681_v51, %v680_v24  ;;  %7250 = vmatpush3.bf16.msra.mxu0 %v7738_v50  ;;  %7062 = vmatpush3.bf16.msra.mxu1 %v7746_v58  ;;  %v503_v56 = vld [vmem:[#allocation2 + $0x50] sm:$0x1]  ;;  %v7742_v62 = vld [vmem:[%s9897_s3 + $0x168] sm:$0xff]   ;;  %v8276_v38 = vld [vmem:[%s8018_s22 + $0x38] sm:$0xff]  }
  0x53   : > { %v3075_v23 = vsel %vm8042_vm3, %v3070_v3, %v3074_v10  ;;  %v3079_v31 = vor.u32 %v3078_v19, %v3074_v10  ;;  %v685_v34 = vrot.slane %v680_v24, 4  ;;  %7251 = vmatprep.subr.bf16.mxu0 %v7739_v14  ;;  %v387_v42 = vmax.f32 %v355_v1, 0.0  ;;  %7063 = vmatprep.subr.bf16.mxu1 %v7748_v26  ;;  %v8266_v57 = vld [vmem:[%s8018_s22 + $0x30] sm:$0xff]  }
  0x54   : > { %v1209_v40 = vrot.slane %v1208_v21, 4  ;;  %v451_v47 = vsel %vm8049_vm6, 0, %v450_v7  ;;  %v684_v50 = vsel %vm8115_vm11, %v676_v15, %v683_v33  ;;  %v501_v9 = vsel %vm8058_vm8, 0, %v500_v16 }
  0x55   : > { %v3080_v51 = vrot.slane %v3079_v31, 4  ;;  %v966_v28 = vsel %vm8049_vm6, %v685_v34, %v965_v17  ;;  %452 = vst [vmem:[#allocation2 + $0x3c] sm:$0x1] %v451_v47  ;;  %964 = vst [vmem:[#allocation2 + $0x34] sm:$0xf] %v684_v50  ;;  %v388_v53 = vmax.f32 %v356_v41, 0.0  ;;  %v6559_v54 = vpack.c.bf16 %v387_v42, %v387_v42 }
  0x56   : > { %v1214_v52 = vsel %vm8042_vm3, %v1209_v40, %v1213_v18  ;;  %967 = vst [vmem:[#allocation2 + $0x38] sm:$0x1] %v966_v28  ;;  %502 = vst [vmem:[#allocation2 + $0x44] sm:$0x1] %v501_v9  ;;  %v6637_v55 = vunpack.c.l.bf16 %v6763_v36  ;;  %7252 = vmatpush3.bf16.msra.mxu0 %v7739_v14  ;;  %v6638_v60 = vunpack.c.h.bf16 %v6763_v36  ;;  %v454_v61 = vsel %vm8049_vm6, 0, %v453_v37  ;;  %7064 = vmatpush3.bf16.msra.mxu1 %v7748_v26  ;;  %v7744_v17 = vld [vmem:[%s9897_s3 + $0x170] sm:$0xff]  }
  0x57   : > { %v6254_v58 = vcombine.low %v1204_v20, %v1214_v52  ;;  %v3085_v45 = vsel %vm8042_vm3, %v3080_v51, %v3084_v27  ;;  %v6560_v2 = vpack.c.bf16 %v388_v53, %v388_v53  ;;  %v687_v3 = vshrl.u32 %v6559_v54, 16  ;;  %7253 = vmatprep.subr.bf16.mxu0 %v7741_v49  ;;  %455 = vst [vmem:[#allocation2 + $0x48] sm:$0x1] %v454_v61  ;;  %v2975_v11 = vld [vmem:[#allocation2 + $0x30] sm:$0xf]  ;;  %v7745_v53 = vld [vmem:[%s9897_s3 + $0x178] sm:$0xff]  }
  0x58   : > { %v6365_v1 = vcombine.low %v3075_v23, %v3085_v45  ;;  %v690_v5 = vshll.u32 %v6559_v54, 16  ;;  %v319_v14 = vmul.f32 %v6637_v55, %v8032_v25  ;;  %v320_v4 = vmul.f32 %v6638_v60, %v8032_v25  ;;  %v1060_v12 = vld [vmem:[#allocation2 + $0x30] sm:$0xf] }
  0x59   : > { %7026 = vmatmul.mubr.bf16.gmra.mrb[4].mxu1 %v6254_v58  ;;  %v504_v6 = vsel %vm8058_vm8, 0, %v503_v56  ;;  %v6641_v7 = vunpack.c.l.bf16 %v8266_v57  ;;  %v689_v13 = vrot.slane %v687_v3, 7  ;;  %v695_v15 = vshrl.u32 %v6560_v2, 16 }
  0x5a   : > { %7217 = vmatprep.mubr.bf16.mxu0 %v6365_v1  ;;  %505 = vst [vmem:[#allocation2 + $0x50] sm:$0x1] %v504_v6  ;;  %v6642_v16 = vunpack.c.h.bf16 %v8266_v57  ;;  %v6645_v18 = vunpack.c.l.bf16 %v8276_v38  ;;  %v3087_v10 = vshrl.u32 %v2975_v11, 16  ;;  %v3090_v19 = vshll.u32 %v2975_v11, 16  ;;  %7254 = vmatpush3.bf16.msra.mxu0 %v7741_v49 }
  0x5b   : > { %v1216_v24 = vshrl.u32 %v1060_v12, 16  ;;  %v1219_v26 = vshll.u32 %v1060_v12, 16  ;;  %v692_v20 = vor.u32 %v690_v5, %v689_v13  ;;  %v693_v21 = vrot.slane %v689_v13, 4  ;;  %7255 = vmatprep.subr.bf16.mxu0 %v7742_v62 }
  0x5c   : > { %v697_v27 = vrot.slane %v695_v15, 7  ;;  %v698_v22 = vshll.u32 %v6560_v2, 16  ;;  %v2976_v23 = vld [vmem:[#allocation2 + $0x34] sm:$0xf]  ;;  %v3089_v33 = vrot.slane %v3087_v10, 4  ;;  %v3092_v34 = vrot.slane %v3090_v19, 5 }
  0x5d   : > { %v2977_v31 = vld [vmem:[#allocation2 + $0x38] sm:$0x1]  ;;  %v357_v36 = vadd.f32 %v8038_v29, %v319_v14  ;;  %v358_v37 = vadd.f32 %v8038_v29, %v320_v4  ;;  %v3096_v40 = vshll.u32 %v2976_v23, 16  ;;  %v3100_v41 = vshrl.u32 %v2976_v23, 16  ;;  %v1061_v47 = vld [vmem:[#allocation2 + $0x34] sm:$0xf] }
  0x5e   : > { %v3106_v42 = vshll.u32 %v2977_v31, 16  ;;  %v1218_v49 = vrot.slane %v1216_v24, 4  ;;  %v3093_v51 = vor.u32 %v3092_v34, %v3089_v33  ;;  %v1104_v50 = vld [vmem:[#allocation2 + $0x38] sm:$0x1]  ;;  %v1221_v28 = vrot.slane %v1219_v26, 5  ;;  %7256 = vmatpush3.bf16.msra.mxu0 %v7742_v62  ;;  %v7750_v10 = vld [vmem:[%s9897_s3 + $0x30] sm:$0xff]  }
  0x5f   : > { %v1225_v9 = vshll.u32 %v1061_v47, 16  ;;  %v1229_v52 = vshrl.u32 %v1061_v47, 16  ;;  %v3098_v54 = vrot.slane %v3096_v40, 5  ;;  %v3102_v55 = vrot.slane %v3100_v41, 4  ;;  %v968_v45 = vld [vmem:[#allocation2 + $0x3c] sm:$0xf]  ;;  %7257 = vmatprep.subr.bf16.mxu0 %v7744_v17  ;;  %7065 = vmatprep.subr.bf16.mxu1 %v7750_v10 }
  0x60   : > { %v3108_v56 = vrot.slane %v3106_v42, 5  ;;  %v1235_v58 = vshll.u32 %v1104_v50, 16  ;;  %v3094_v60 = vrot.slane %v3093_v51, 4  ;;  %v1222_v61 = vor.u32 %v1221_v28, %v1218_v49  ;;  %v972_v3 = vld [vmem:[#allocation2 + $0x44] sm:$0x1]  ;;  %7066 = vmatpush3.bf16.msra.mxu1 %v7750_v10 }
  0x61   : > { %v1227_v1 = vrot.slane %v1225_v9, 5  ;;  %v1231_v2 = vrot.slane %v1229_v52, 4  ;;  %v3103_v5 = vor.u32 %v3102_v55, %v3098_v54  ;;  %v700_v4 = vor.u32 %v698_v22, %v697_v27  ;;  %v456_v15 = vld [vmem:[#allocation2 + $0x54] sm:$0x1]  ;;  %v506_v22 = vld [vmem:[#allocation2 + $0x5c] sm:$0x1] }
  0x62   : > { %v1237_v14 = vrot.slane %v1235_v58, 5  ;;  %v702_v6 = vrot.slane %v697_v27, 4  ;;  %v3099_v62 = vsel %vm8042_vm3, %v3094_v60, %v3098_v54  ;;  %v1223_v11 = vrot.slane %v1222_v61, 4  ;;  %7258 = vmatpush3.bf16.msra.mxu0 %v7744_v17  ;;  %v459_v41 = vld [vmem:[#allocation2 + $0x60] sm:$0x1] }
  0x63   : > { %v1232_v12 = vor.u32 %v1231_v2, %v1227_v1  ;;  %v969_v13 = vsel %vm8108_vm10, %v692_v20, %v968_v45  ;;  %v3104_v19 = vrot.slane %v3103_v5, 4  ;;  %v701_v24 = vsel %vm8115_vm11, %v693_v21, %v700_v4  ;;  %7259 = vmatprep.subr.bf16.mxu0 %v7745_v53  ;;  %v8307_v20 = vld [vmem:[%s9897_s3 + $0x180] sm:$0xff]  }
  0x64   : > { %970 = vst [vmem:[#allocation2 + $0x3c] sm:$0xf] %v969_v13  ;;  %v973_v26 = vsel %vm8049_vm6, %v702_v6, %v972_v3  ;;  %v389_v27 = vmax.f32 %v357_v36, 0.0  ;;  %v1228_v17 = vsel %vm8042_vm3, %v1223_v11, %v1227_v1  ;;  %971 = vst [vmem:[#allocation2 + $0x40] sm:$0xf] %v701_v24  ;;  %v390_v21 = vmax.f32 %v358_v37, 0.0 }
  0x65   : > { %v1233_v23 = vrot.slane %v1232_v12, 4  ;;  %974 = vst [vmem:[#allocation2 + $0x44] sm:$0x1] %v973_v26  ;;  %v321_v31 = vmul.f32 %v6641_v7, %v8032_v25  ;;  %v3109_v33 = vsel %vm8042_vm3, %v3104_v19, %v3108_v56  ;;  %v322_v36 = vmul.f32 %v6642_v16, %v8032_v25  ;;  %v8322_v42 = vld [vmem:[%s8018_s22 + $0x40] sm:$0xff]  }
  0x66   : > { %v6561_v34 = vpack.c.bf16 %v389_v27, %v389_v27  ;;  %v457_v40 = vsel %vm8049_vm6, 0, %v456_v15  ;;  %v6366_v37 = vcombine.low %v3099_v62, %v3109_v33  ;;  %v6562_v47 = vpack.c.bf16 %v390_v21, %v390_v21  ;;  %7260 = vmatpush3.bf16.msra.mxu0 %v7745_v53  ;;  %v8335_v56 = vld [vmem:[%s9895_s1] ss:$0 sm:$0xff] }
  0x67   : > { %v1238_v7 = vsel %vm8042_vm3, %v1233_v23, %v1237_v14  ;;  %v359_v49 = vadd.f32 %v8038_v29, %v321_v31  ;;  %458 = vst [vmem:[#allocation2 + $0x54] sm:$0x1] %v457_v40  ;;  %v360_v25 = vadd.f32 %v8038_v29, %v322_v36  ;;  %7293 = vmatprep.subr.bf16.mxu0 %v8307_v20  ;;  %v507_v52 = vsel %vm8058_vm8, 0, %v506_v22  ;;  %v975_v40 = vld [vmem:[#allocation2 + $0x48] sm:$0xf] }
  0x68   : > { %v6255_v51 = vcombine.low %v1228_v17, %v1238_v7  ;;  %v704_v50 = vshrl.u32 %v6561_v34, 16  ;;  %v707_v57 = vshll.u32 %v6561_v34, 16  ;;  %7218 = vmatmul.mubr.bf16.gmra.mrb[4].mxu0 %v6366_v37  ;;  %v712_v16 = vshrl.u32 %v6562_v47, 16  ;;  %508 = vst [vmem:[#allocation2 + $0x5c] sm:$0x1] %v507_v52 }
  0x69   : > { %v715_v28 = vshll.u32 %v6562_v47, 16  ;;  %v391_v9 = vmax.f32 %v359_v49, 0.0  ;;  %v392_v55 = vmax.f32 %v360_v25, 0.0  ;;  %v6646_v53 = vunpack.c.h.bf16 %v8276_v38  ;;  %v979_v49 = vld [vmem:[#allocation2 + $0x50] sm:$0x1] }
  0x6a   : > { %7029 = vmatprep.mubr.bf16.mxu1 %v6255_v51  ;;  %v706_v54 = vrot.slane %v704_v50, 7  ;;  %v8340_v29 = vmul.f32 %v8335_v56, %v6645_v18  ;;  %v714_v60 = vrot.slane %v712_v16, 7  ;;  %v460_v1 = vsel %vm8049_vm6, 0, %v459_v41 }
  0x6b   : > { %v1062_v58 = vld [vmem:[#allocation2 + $0x3c] sm:$0xf]  ;;  %v8342_v61 = vpack.c.bf16 %v391_v9, %v391_v9  ;;  %v6649_v2 = vunpack.c.l.bf16 %v8322_v42  ;;  %v1063_v3 = vld [vmem:[#allocation2 + $0x40] sm:$0xf]  ;;  %v8347_v62 = vpack.c.bf16 %v392_v55, %v392_v55  ;;  %461 = vst [vmem:[#allocation2 + $0x60] sm:$0x1] %v460_v1  ;;  %v6650_v38 = vunpack.c.h.bf16 %v8322_v42 }
  0x6c   : > { %v2978_v45 = vld [vmem:[#allocation2 + $0x3c] sm:$0xf]  ;;  %v1105_v5 = vld [vmem:[#allocation2 + $0x44] sm:$0x1]  ;;  %v1240_v14 = vshrl.u32 %v1062_v58, 16  ;;  %v1243_v4 = vshll.u32 %v1062_v58, 16  ;;  %v709_v6 = vor.u32 %v707_v57, %v706_v54  ;;  %v717_v47 = vor.u32 %v715_v28, %v714_v60 }
  0x6d   : > { %v1249_v18 = vshll.u32 %v1063_v3, 16  ;;  %v1253_v11 = vshrl.u32 %v1063_v3, 16  ;;  %v1259_v12 = vshll.u32 %v1105_v5, 16  ;;  %v2979_v13 = vld [vmem:[#allocation2 + $0x40] sm:$0xf]  ;;  %v3111_v15 = vshrl.u32 %v2978_v45, 16 }
  0x6e   : > { %v1242_v10 = vrot.slane %v1240_v14, 4  ;;  %v1245_v19 = vrot.slane %v1243_v4, 5  ;;  %v2980_v24 = vld [vmem:[#allocation2 + $0x44] sm:$0x1]  ;;  %v3114_v26 = vshll.u32 %v2978_v45, 16  ;;  %v3120_v27 = vshll.u32 %v2979_v13, 16 }
  0x6f   : > { %v1251_v22 = vrot.slane %v1249_v18, 5  ;;  %v1255_v17 = vrot.slane %v1253_v11, 4  ;;  %v1261_v23 = vrot.slane %v1259_v12, 5  ;;  %v3113_v21 = vrot.slane %v3111_v15, 4  ;;  %v509_v58 = vld [vmem:[#allocation2 + $0x68] sm:$0x1] }
  0x70   : > { %v1246_v31 = vor.u32 %v1245_v19, %v1242_v10  ;;  %v3116_v33 = vrot.slane %v3114_v26, 5  ;;  %v3122_v34 = vrot.slane %v3120_v27, 5  ;;  %v3124_v36 = vshrl.u32 %v2979_v13, 16  ;;  %v982_v12 = vld [vmem:[#allocation2 + $0x54] sm:$0xf]  ;;  %v8384_v27 = vld [vmem:[%s8018_s22 + $0x48] sm:$0xff]  }
  0x71   : > { %v1256_v41 = vor.u32 %v1255_v17, %v1251_v22  ;;  %v3130_v37 = vshll.u32 %v2980_v24, 16  ;;  %v710_v7 = vrot.slane %v706_v54, 4  ;;  %v719_v25 = vrot.slane %v714_v60, 4 }
  0x72   : > { %v1247_v51 = vrot.slane %v1246_v31, 4  ;;  %v3117_v50 = vor.u32 %v3116_v33, %v3113_v21  ;;  %v3126_v57 = vrot.slane %v3124_v36, 4  ;;  %v976_v55 = vsel %vm8108_vm10, %v709_v6, %v975_v40 }
  0x73   : > { %v1257_v16 = vrot.slane %v1256_v41, 4  ;;  %v3132_v9 = vrot.slane %v3130_v37, 5  ;;  %v718_v52 = vsel %vm8115_vm11, %v710_v7, %v717_v47  ;;  %977 = vst [vmem:[#allocation2 + $0x48] sm:$0xf] %v976_v55  ;;  %v980_v28 = vsel %vm8049_vm6, %v719_v25, %v979_v49 }
  0x74   : > { %v1252_v45 = vsel %vm8042_vm3, %v1247_v51, %v1251_v22  ;;  %v3118_v1 = vrot.slane %v3117_v50, 4  ;;  %v3127_v54 = vor.u32 %v3126_v57, %v3122_v34  ;;  %978 = vst [vmem:[#allocation2 + $0x4c] sm:$0xf] %v718_v52  ;;  %981 = vst [vmem:[#allocation2 + $0x50] sm:$0x1] %v980_v28  ;;  %v721_v3 = vshrl.u32 %v8342_v61, 16 }
  0x75   : > { %v1262_v60 = vsel %vm8042_vm3, %v1257_v16, %v1261_v23  ;;  %v724_v5 = vshll.u32 %v8342_v61, 16  ;;  %v729_v14 = vshrl.u32 %v8347_v62, 16  ;;  %v732_v11 = vshll.u32 %v8347_v62, 16  ;;  %v8371_v61 = vld [vmem:[%s9896_s2] ss:$0 sm:$0xff] }
  0x76   : > { %v6256_v4 = vcombine.low %v1252_v45, %v1262_v60  ;;  %v3123_v6 = vsel %vm8042_vm3, %v3118_v1, %v3122_v34  ;;  %v3128_v18 = vrot.slane %v3127_v54, 4  ;;  %v723_v13 = vrot.slane %v721_v3, 7  ;;  %v986_v62 = vld [vmem:[#allocation2 + $0x5c] sm:$0x1] }
  0x77   : > { %v731_v15 = vrot.slane %v729_v14, 7  ;;  %v324_v10 = vmul.f32 %v8335_v56, %v6646_v53  ;;  %v361_v19 = vadd.f32 %v8371_v61, %v8340_v29  ;;  %v510_v26 = vsel %vm8058_vm8, 0, %v509_v58 }
  0x78   : > { %7030 = vmatmul.mubr.bf16.gmra.mrb[8].mxu1 %v6256_v4  ;;  %v3133_v24 = vsel %vm8042_vm3, %v3128_v18, %v3132_v9  ;;  %v325_v53 = vmul.f32 %v8335_v56, %v6649_v2  ;;  %v726_v17 = vor.u32 %v724_v5, %v723_v13  ;;  %v727_v23 = vrot.slane %v723_v13, 4  ;;  %511 = vst [vmem:[#allocation2 + $0x68] sm:$0x1] %v510_v26  ;;  %v7752_v4 = vld [vmem:[%s9897_s3 + $0x38] sm:$0xff]  }
  0x79   : > { %v6367_v22 = vcombine.low %v3123_v6, %v3133_v24  ;;  %v734_v29 = vor.u32 %v732_v11, %v731_v15  ;;  %v736_v21 = vrot.slane %v731_v15, 4  ;;  %v362_v31 = vadd.f32 %v8371_v61, %v324_v10  ;;  %7067 = vmatprep.subr.bf16.mxu1 %v7752_v4 }
  0x7a   : > { %v393_v33 = vmax.f32 %v361_v19, 0.0  ;;  %v326_v34 = vmul.f32 %v8335_v56, %v6650_v38  ;;  %v2981_v36 = vld [vmem:[#allocation2 + $0x48] sm:$0xf]  ;;  %v983_v41 = vsel %vm8108_vm10, %v726_v17, %v982_v12  ;;  %v8395_v37 = vadd.f32 %v8371_v61, %v325_v53  ;;  %7068 = vmatpush3.bf16.msra.mxu1 %v7752_v4 }
  0x7b   : > { %7221 = vmatprep.mubr.bf16.mxu0 %v6367_v22  ;;  %v8388_v40 = vld [vmem:[#allocation2 + $0x4c] sm:$0xf]  ;;  %v1064_v42 = vld [vmem:[#allocation2 + $0x48] sm:$0xf]  ;;  %v735_v2 = vsel %vm8115_vm11, %v727_v23, %v734_v29  ;;  %v6653_v7 = vunpack.c.l.bf16 %v8384_v27  ;;  %v8398_v47 = vld [vmem:[#allocation2 + $0x50] sm:$0x1]  ;;  %v987_v55 = vsel %vm8049_vm6, %v736_v21, %v986_v62  ;;  %v6654_v21 = vunpack.c.h.bf16 %v8384_v27 }
  0x7c   : > { %v3135_v49 = vshrl.u32 %v2981_v36, 16  ;;  %v3138_v51 = vshll.u32 %v2981_v36, 16  ;;  %v3144_v50 = vshll.u32 %v8388_v40, 16  ;;  %v3148_v57 = vshrl.u32 %v8388_v40, 16  ;;  %984 = vst [vmem:[#allocation2 + $0x54] sm:$0xf] %v983_v41 }
  0x7d   : > { %985 = vst [vmem:[#allocation2 + $0x58] sm:$0xf] %v735_v2  ;;  %v3154_v25 = vshll.u32 %v8398_v47, 16  ;;  %v1065_v16 = vld [vmem:[#allocation2 + $0x4c] sm:$0xf]  ;;  %v1264_v52 = vshrl.u32 %v1064_v42, 16  ;;  %v8405_v58 = vpack.c.bf16 %v393_v33, %v393_v33  ;;  %v8414_v29 = vadd.f32 %v8371_v61, %v326_v34 }
  0x7e   : > { %v1106_v9 = vld [vmem:[#allocation2 + $0x50] sm:$0x1]  ;;  %v3137_v45 = vrot.slane %v3135_v49, 4  ;;  %v3140_v1 = vrot.slane %v3138_v51, 5  ;;  %v3146_v54 = vrot.slane %v3144_v50, 5  ;;  %v3150_v28 = vrot.slane %v3148_v57, 4 }
  0x7f   : > { %988 = vst [vmem:[#allocation2 + $0x5c] sm:$0x1] %v987_v55  ;;  %v3156_v60 = vrot.slane %v3154_v25, 5  ;;  %v1266_v3 = vrot.slane %v1264_v52, 4  ;;  %v1267_v5 = vshll.u32 %v1064_v42, 16  ;;  %v1273_v14 = vshll.u32 %v1065_v16, 16 }
  0x80   : > { %v3141_v6 = vor.u32 %v3140_v1, %v3137_v45  ;;  %v3151_v18 = vor.u32 %v3150_v28, %v3146_v54  ;;  %v1277_v11 = vshrl.u32 %v1065_v16, 16  ;;  %v1283_v12 = vshll.u32 %v1106_v9, 16  ;;  %v7756_v34 = vld [vmem:[%s9897_s3 + $0x80] sm:$0xff]  }
  0x81   : > { %v1269_v13 = vrot.slane %v1267_v5, 5  ;;  %v1275_v15 = vrot.slane %v1273_v14, 5  ;;  %v394_v10 = vmax.f32 %v362_v31, 0.0  ;;  %v738_v19 = vshrl.u32 %v8405_v58, 16  ;;  %7101 = vmatprep.subr.bf16.mxu1 %v7756_v34 }
  0x82   : > { %v3142_v24 = vrot.slane %v3141_v6, 4  ;;  %v3152_v62 = vrot.slane %v3151_v18, 4  ;;  %v1279_v26 = vrot.slane %v1277_v11, 4  ;;  %v1285_v38 = vrot.slane %v1283_v12, 5 }
  0x83   : > { %v1270_v53 = vor.u32 %v1269_v13, %v1266_v3  ;;  %v1066_v22 = vld [vmem:[#allocation2 + $0x54] sm:$0xf]  ;;  %v8411_v23 = vpack.c.bf16 %v394_v10, %v394_v10 }
  0x84   : > { %v1067_v17 = vld [vmem:[#allocation2 + $0x58] sm:$0xf]  ;;  %v3147_v31 = vsel %vm8042_vm3, %v3142_v24, %v3146_v54  ;;  %v3157_v33 = vsel %vm8042_vm3, %v3152_v62, %v3156_v60  ;;  %v1280_v36 = vor.u32 %v1279_v26, %v1275_v15  ;;  %v1288_v42 = vshrl.u32 %v1066_v22, 16  ;;  %v2984_v2 = vld [vmem:[#allocation2 + $0x54] sm:$0xf] }
  0x85   : > { %v6368_v41 = vcombine.low %v3147_v31, %v3157_v33  ;;  %v1271_v49 = vrot.slane %v1270_v53, 4  ;;  %v1291_v50 = vshll.u32 %v1066_v22, 16  ;;  %v1297_v57 = vshll.u32 %v1067_v17, 16  ;;  %v2985_v55 = vld [vmem:[#allocation2 + $0x58] sm:$0xf] }
  0x86   : > { %v1107_v51 = vld [vmem:[#allocation2 + $0x5c] sm:$0x1]  ;;  %v1281_v25 = vrot.slane %v1280_v36, 4  ;;  %v1290_v16 = vrot.slane %v1288_v42, 4  ;;  %v1301_v9 = vshrl.u32 %v1067_v17, 16  ;;  %v3159_v60 = vshrl.u32 %v2984_v2, 16 }
  0x87   : > { %v1307_v52 = vshll.u32 %v1107_v51, 16  ;;  %7222 = vmatmul.mubr.bf16.gmra.mrb[8].mxu0 %v6368_v41  ;;  %v1276_v45 = vsel %vm8042_vm3, %v1271_v49, %v1275_v15  ;;  %v1293_v1 = vrot.slane %v1291_v50, 5  ;;  %v1299_v54 = vrot.slane %v1297_v57, 5  ;;  %v2986_v28 = vld [vmem:[#allocation2 + $0x5c] sm:$0x1] }
  0x88   : > { %v1286_v3 = vsel %vm8042_vm3, %v1281_v25, %v1285_v38  ;;  %v1303_v5 = vrot.slane %v1301_v9, 4  ;;  %v3162_v4 = vshll.u32 %v2984_v2, 16  ;;  %v3161_v11 = vrot.slane %v3159_v60, 4  ;;  %v989_v15 = vld [vmem:[#allocation2 + $0x60] sm:$0xf] }
  0x89   : > { %v1309_v14 = vrot.slane %v1307_v52, 5  ;;  %v6257_v6 = vcombine.low %v1276_v45, %v1286_v3  ;;  %v1294_v18 = vor.u32 %v1293_v1, %v1290_v16  ;;  %v3168_v12 = vshll.u32 %v2985_v55, 16  ;;  %v462_v31 = vld [vmem:[#allocation2 + $0x6c] sm:$0x1]  ;;  %v512_v50 = vld [vmem:[#allocation2 + $0x74] sm:$0x1] }
  0x8a   : > { %v1304_v13 = vor.u32 %v1303_v5, %v1299_v54  ;;  %v3164_v10 = vrot.slane %v3162_v4, 5  ;;  %v3172_v24 = vshrl.u32 %v2985_v55, 16  ;;  %v3178_v62 = vshll.u32 %v2986_v28, 16  ;;  %v993_v25 = vld [vmem:[#allocation2 + $0x68] sm:$0x1] }
  0x8b   : > { %7033 = vmatprep.mubr.bf16.mxu1 %v6257_v6  ;;  %v1295_v26 = vrot.slane %v1294_v18, 4  ;;  %v3170_v53 = vrot.slane %v3168_v12, 5  ;;  %v740_v22 = vrot.slane %v738_v19, 7  ;;  %v741_v17 = vshll.u32 %v8405_v58, 16  ;;  %v3719_v45 = vld [vmem:[#allocation2 + $0xc] sm:$0xe] }
  0x8c   : > { %v1305_v38 = vrot.slane %v1304_v13, 4  ;;  %v3165_v33 = vor.u32 %v3164_v10, %v3161_v11  ;;  %v3174_v36 = vrot.slane %v3172_v24, 4  ;;  %v3180_v42 = vrot.slane %v3178_v62, 5  ;;  %v465_v4 = vld [vmem:[#allocation2 + $0x78] sm:$0x1] }
  0x8d   : > { %v1300_v2 = vsel %vm8042_vm3, %v1295_v26, %v1299_v54  ;;  %v743_v41 = vor.u32 %v741_v17, %v740_v22  ;;  %v744_v49 = vrot.slane %v740_v22, 4  ;;  %v746_v51 = vshrl.u32 %v8411_v23, 16  ;;  %v7840_v22 = vld [vmem:[#allocation2 + $0x10] sm:$0xf] }
  0x8e   : > { %v1310_v57 = vsel %vm8042_vm3, %v1305_v38, %v1309_v14  ;;  %v3166_v34 = vrot.slane %v3165_v33, 4  ;;  %v3175_v19 = vor.u32 %v3174_v36, %v3170_v53  ;;  %v749_v58 = vshll.u32 %v8411_v23, 16  ;;  %v8443_v23 = vld [vmem:[#allocation2 + $0x18] sm:$0xe] }
  0x8f   : > { %v6258_v16 = vcombine.low %v1300_v2, %v1310_v57  ;;  %v748_v9 = vrot.slane %v746_v51, 7  ;;  %v990_v52 = vsel %vm8108_vm10, %v743_v41, %v989_v15  ;;  %v395_v55 = vmax.f32 %v8395_v37, 0.0 }
  0x90   : > { %v3171_v1 = vsel %vm8042_vm3, %v3166_v34, %v3170_v53  ;;  %v3176_v54 = vrot.slane %v3175_v19, 4  ;;  %991 = vst [vmem:[#allocation2 + $0x60] sm:$0xf] %v990_v52  ;;  %v396_v28 = vmax.f32 %v8414_v29, 0.0  ;;  %v463_v60 = vsel %vm8049_vm6, 0, %v462_v31 }
  0x91   : > { %7034 = vmatmul.mubr.bf16.gmra.mrb[12].mxu1 %v6258_v16  ;;  %v751_v3 = vor.u32 %v749_v58, %v748_v9  ;;  %v753_v5 = vrot.slane %v748_v9, 4  ;;  %464 = vst [vmem:[#allocation2 + $0x6c] sm:$0x1] %v463_v60  ;;  %v513_v37 = vsel %vm8058_vm8, 0, %v512_v50  ;;  %v6567_v14 = vpack.c.bf16 %v395_v55, %v395_v55 }
  0x92   : > { %v3181_v6 = vsel %vm8042_vm3, %v3176_v54, %v3180_v42  ;;  %514 = vst [vmem:[#allocation2 + $0x74] sm:$0x1] %v513_v37  ;;  %v6568_v18 = vpack.c.bf16 %v396_v28, %v396_v28  ;;  %v9926_v10 = vmov 0  ;;  %v6387_v26 = vrot.slane %v3719_v45, 9 }
  0x93   : > { %v6369_v29 = vcombine.low %v3171_v1, %v3181_v6  ;;  %v752_v11 = vsel %vm8115_vm11, %v744_v49, %v751_v3  ;;  %v994_v12 = vsel %vm8049_vm6, %v753_v5, %v993_v25  ;;  %v755_v13 = vshrl.u32 %v6567_v14, 16 }
  0x94   : > { %v9927_v10 = vsel %vm8453_vm14, 4294967295, %v9926_v10  ;;  %992 = vst [vmem:[#allocation2 + $0x64] sm:$0xf] %v752_v11  ;;  %995 = vst [vmem:[#allocation2 + $0x68] sm:$0x1] %v994_v12  ;;  %v758_v24 = vshll.u32 %v6567_v14, 16  ;;  %v8463_v38 = vsel %vm8453_vm14, %v8189_v59, %v3795_v46  ;;  %v327_v36 = vmul.f32 %v8335_v56, %v6653_v7 }
  0x95   : > { %9928 = vst [vmem:[#allocation3_spill] sm:$0xff] %v9927_v10  ;;  %v763_v62 = vshrl.u32 %v6568_v18, 16  ;;  %v766_v15 = vshll.u32 %v6568_v18, 16  ;;  %7225 = vmatprep.mubr.bf16.mxu0 %v6369_v29  ;;  %v757_v53 = vrot.slane %v755_v13, 7  ;;  %v3785_v17 = vrot.slane %v7840_v22, 5 }
  0x96   : > { %v6388_v31 = vrot.slane %v8443_v23, 9  ;;  %v328_v42 = vmul.f32 %v8335_v56, %v6654_v21  ;;  %v466_v2 = vsel %vm8049_vm6, 0, %v465_v4 }
  0x97   : > { %v765_v33 = vrot.slane %v763_v62, 7  ;;  %v2987_v41 = vld [vmem:[#allocation2 + $0x60] sm:$0xf]  ;;  %v760_v8 = vor.u32 %v758_v24, %v757_v53  ;;  %v761_v51 = vrot.slane %v757_v53, 4  ;;  %v8475_v46 = vsel %vm8453_vm14, %v6387_v26, %v3785_v17  ;;  %467 = vst [vmem:[#allocation2 + $0x78] sm:$0x1] %v466_v2 }
  0x98   : > { %v1068_v49 = vld [vmem:[#allocation2 + $0x60] sm:$0xf]  ;;  %v3787_v59 = vrot.slane %v3785_v17, 4  ;;  %v3183_v50 = vshrl.u32 %v2987_v41, 16  ;;  %v3186_v57 = vshll.u32 %v2987_v41, 16  ;;  %v8499_v23 = vsel %vm8453_vm14, %v6388_v31, %v3792_v44  ;;  %v6768_v62 = vld [vmem:[%s8018_s22 + $0x50] sm:$0xff]  }
  0x99   : > { %v1312_v7 = vshrl.u32 %v1068_v49, 16  ;;  %v1315_v34 = vshll.u32 %v1068_v49, 16  ;;  %v996_v27 = vld [vmem:[#allocation2 + $0x6c] sm:$0xf]  ;;  %v768_v19 = vor.u32 %v766_v15, %v765_v33  ;;  %v770_v21 = vrot.slane %v765_v33, 4 }
  0x9a   : > { %v997_v58 = vsel %vm8108_vm10, %v760_v8, %v996_v27  ;;  %v1000_v25 = vld [vmem:[#allocation2 + $0x74] sm:$0x1]  ;;  %v8483_v16 = vsel %vm8453_vm14, %v3787_v59, %v3788_v63  ;;  %v3185_v9 = vrot.slane %v3183_v50, 4  ;;  %v3188_v52 = vrot.slane %v3186_v57, 5  ;;  %v515_v24 = vld [vmem:[#allocation2 + $0x80] sm:$0x1] }
  0x9b   : > { %v1314_v55 = vrot.slane %v1312_v7, 4  ;;  %v1317_v45 = vrot.slane %v1315_v34, 5  ;;  %998 = vst [vmem:[#allocation2 + $0x6c] sm:$0xf] %v997_v58  ;;  %v8485_v1 = vld [vmem:[#allocation2 + $0x64] sm:$0xf]  ;;  %v769_v60 = vsel %vm8115_vm11, %v761_v51, %v768_v19  ;;  %v1001_v48 = vsel %vm8049_vm6, %v770_v21, %v1000_v25 }
  0x9c   : > { %v8487_v54 = vld [vmem:[#allocation2 + $0x68] sm:$0x1]  ;;  %v1069_v28 = vld [vmem:[#allocation2 + $0x64] sm:$0xf]  ;;  %v6403_v63 = vcombine.low %v8475_v46, %v8483_v16  ;;  %v3189_v3 = vor.u32 %v3188_v52, %v3185_v9  ;;  %v3192_v5 = vshll.u32 %v8485_v1, 16  ;;  %v3196_v37 = vshrl.u32 %v8485_v1, 16 }
  0x9d   : > { %v3202_v14 = vshll.u32 %v8487_v54, 16  ;;  %v1108_v4 = vld [vmem:[#allocation2 + $0x68] sm:$0x1]  ;;  %999 = vst [vmem:[#allocation2 + $0x70] sm:$0xf] %v769_v60  ;;  %v1318_v6 = vor.u32 %v1317_v45, %v1314_v55  ;;  %v1321_v18 = vshll.u32 %v1069_v28, 16  ;;  %v6404_v33 = vcombine.low %v8499_v23, %v8463_v38 }
  0x9e   : > { %1002 = vst [vmem:[#allocation2 + $0x74] sm:$0x1] %v1001_v48  ;;  %v1325_v29 = vshrl.u32 %v1069_v28, 16  ;;  %v1331_v11 = vshll.u32 %v1108_v4, 16  ;;  %v3190_v0 = vrot.slane %v3189_v3, 4  ;;  %v3194_v12 = vrot.slane %v3192_v5, 5 }
  0x9f   : > { %v3198_v13 = vrot.slane %v3196_v37, 4  ;;  %v3204_v44 = vrot.slane %v3202_v14, 5  ;;  %v1319_v15 = vrot.slane %v1318_v6, 4  ;;  %v1323_v26 = vrot.slane %v1321_v18, 5  ;;  %v468_v3 = vld [vmem:[#allocation2 + $0x84] sm:$0x1] }
  0xa0   : > { %v1327_v53 = vrot.slane %v1325_v29, 4  ;;  %v1333_v22 = vrot.slane %v1331_v11, 5  ;;  %v3195_v17 = vsel %vm8042_vm3, %v3190_v0, %v3194_v12  ;;  %v365_v2 = vadd.f32 %v8371_v61, %v327_v36  ;;  %v518_v6 = vld [vmem:[#allocation2 + $0x8c] sm:$0x1] }
  0xa1   : > { %v3199_v31 = vor.u32 %v3198_v13, %v3194_v12  ;;  %v1324_v41 = vsel %vm8042_vm3, %v1319_v15, %v1323_v26  ;;  %v366_v51 = vadd.f32 %v8371_v61, %v328_v42  ;;  %v516_v59 = vsel %vm8058_vm8, 0, %v515_v24  ;;  %v3721_v12 = vld [vmem:[#allocation2 + $0x24] sm:$0xe] }
  0xa2   : > { %v1328_v49 = vor.u32 %v1327_v53, %v1323_v26  ;;  %v1070_v8 = vld [vmem:[#allocation2 + $0x6c] sm:$0xf]  ;;  %v397_v34 = vmax.f32 %v365_v2, 0.0  ;;  %517 = vst [vmem:[#allocation2 + $0x80] sm:$0x1] %v516_v59  ;;  %v6657_v36 = vunpack.c.l.bf16 %v6768_v62  ;;  %v6658_v25 = vunpack.c.h.bf16 %v6768_v62 }
  0xa3   : > { %v3200_v50 = vrot.slane %v3199_v31, 4  ;;  %v1336_v57 = vshrl.u32 %v1070_v8, 16  ;;  %v1339_v7 = vshll.u32 %v1070_v8, 16  ;;  %v398_v58 = vmax.f32 %v366_v51, 0.0 }
  0xa4   : > { %v1329_v27 = vrot.slane %v1328_v49, 4  ;;  %v1071_v19 = vld [vmem:[#allocation2 + $0x70] sm:$0xf]  ;;  %v6569_v4 = vpack.c.bf16 %v397_v34, %v397_v34  ;;  %v329_v0 = vmul.f32 %v8335_v56, %v6657_v36  ;;  %v330_v62 = vmul.f32 %v8335_v56, %v6658_v25 }
  0xa5   : > { %v1109_v21 = vld [vmem:[#allocation2 + $0x74] sm:$0x1]  ;;  %v3205_v9 = vsel %vm8042_vm3, %v3200_v50, %v3204_v44  ;;  %v1338_v52 = vrot.slane %v1336_v57, 4  ;;  %v1341_v55 = vrot.slane %v1339_v7, 5  ;;  %v1345_v42 = vshll.u32 %v1071_v19, 16 }
  0xa6   : > { %v6370_v45 = vcombine.low %v3195_v17, %v3205_v9  ;;  %v1334_v28 = vsel %vm8042_vm3, %v1329_v27, %v1333_v22  ;;  %v1349_v60 = vshrl.u32 %v1071_v19, 16  ;;  %v1355_v48 = vshll.u32 %v1109_v21, 16  ;;  %v1003_v22 = vld [vmem:[#allocation2 + $0x78] sm:$0xf]  ;;  %v3722_v36 = vld [vmem:[#allocation2 + $0x30] sm:$0xe] }
  0xa7   : > { %v6259_v5 = vcombine.low %v1324_v41, %v1334_v28  ;;  %v1342_v37 = vor.u32 %v1341_v55, %v1338_v52  ;;  %v1347_v14 = vrot.slane %v1345_v42, 5  ;;  %v6570_v11 = vpack.c.bf16 %v398_v58, %v398_v58  ;;  %v7749_v58 = vld [vmem:[%s9897_s3 + $0x188] sm:$0xff]  }
  0xa8   : > { %7226 = vmatmul.mubr.bf16.gmra.mrb[12].mxu0 %v6370_v45  ;;  %v1351_v18 = vrot.slane %v1349_v60, 4  ;;  %v1357_v29 = vrot.slane %v1355_v48, 5  ;;  %v772_v44 = vshrl.u32 %v6569_v4, 16  ;;  %v775_v24 = vshll.u32 %v6569_v4, 16  ;;  %v7841_v55 = vld [vmem:[#allocation2 + $0x28] sm:$0xf] }
  0xa9   : > { %7037 = vmatprep.mubr.bf16.mxu1 %v6259_v5  ;;  %v1343_v13 = vrot.slane %v1342_v37, 4  ;;  %7261 = vmatprep.mubr.bf16.mxu0 %v6403_v63  ;;  %v780_v26 = vshrl.u32 %v6570_v11, 16  ;;  %v783_v53 = vshll.u32 %v6570_v11, 16  ;;  %v367_v17 = vadd.f32 %v8371_v61, %v329_v0  ;;  %v1007_v49 = vld [vmem:[#allocation2 + $0x80] sm:$0x1]  ;;  %v6769_v45 = vld [vmem:[%s8018_s22 + $0x58] sm:$0xff]  }
  0xaa   : > { %v1352_v15 = vor.u32 %v1351_v18, %v1347_v14  ;;  %v774_v2 = vrot.slane %v772_v44, 7  ;;  %v368_v41 = vadd.f32 %v8371_v61, %v330_v62  ;;  %v469_v46 = vsel %vm8049_vm6, 0, %v468_v3  ;;  %v7843_v11 = vld [vmem:[#allocation2 + $0x34] sm:$0xf]  ;;  %v521_v0 = vld [vmem:[#allocation2 + $0x98] sm:$0x1] }
  0xab   : > { %v1348_v31 = vsel %vm8042_vm3, %v1343_v13, %v1347_v14  ;;  %v782_v63 = vrot.slane %v780_v26, 7  ;;  %v399_v8 = vmax.f32 %v367_v17, 0.0  ;;  %470 = vst [vmem:[#allocation2 + $0x84] sm:$0x1] %v469_v46  ;;  %v519_v51 = vsel %vm8058_vm8, 0, %v518_v6  ;;  %v7751_v14 = vld [vmem:[%s9897_s3 + $0x190] sm:$0xff]  }
  0xac   : > { %v1353_v16 = vrot.slane %v1352_v15, 4  ;;  %v777_v59 = vor.u32 %v775_v24, %v774_v2  ;;  %v778_v50 = vrot.slane %v774_v2, 4  ;;  %v400_v57 = vmax.f32 %v368_v41, 0.0  ;;  %520 = vst [vmem:[#allocation2 + $0x8c] sm:$0x1] %v519_v51 }
  0xad   : > { %v6389_v7 = vrot.slane %v3721_v12, 9  ;;  %v785_v27 = vor.u32 %v783_v53, %v782_v63  ;;  %v787_v19 = vrot.slane %v782_v63, 4  ;;  %v6571_v21 = vpack.c.bf16 %v399_v8, %v399_v8  ;;  %v7842_v6 = vld [vmem:[#allocation2 + $0x2c] sm:$0x1]  ;;  %v7844_v44 = vld [vmem:[#allocation2 + $0x38] sm:$0x1] }
  0xae   : > { %v1358_v34 = vsel %vm8042_vm3, %v1353_v16, %v1357_v29  ;;  %v1004_v9 = vsel %vm8108_vm10, %v777_v59, %v1003_v22  ;;  %v6572_v52 = vpack.c.bf16 %v400_v57, %v400_v57  ;;  %v3799_v42 = vrot.slane %v7841_v55, 5  ;;  %v7753_v59 = vld [vmem:[%s9897_s3 + $0x198] sm:$0xff]  }
  0xaf   : > { %v6260_v25 = vcombine.low %v1348_v31, %v1358_v34  ;;  %v786_v28 = vsel %vm8115_vm11, %v778_v50, %v785_v27  ;;  %1005 = vst [vmem:[#allocation2 + $0x78] sm:$0xf] %v1004_v9  ;;  %v1008_v60 = vsel %vm8049_vm6, %v787_v19, %v1007_v49  ;;  %v789_v48 = vshrl.u32 %v6571_v21, 16  ;;  %v6770_v19 = vld [vmem:[%s8018_s22 + $0x60] sm:$0xff]  }
  0xb0   : > { %7262 = vmatmul.mubr.bf16.vlgmr.msra.gmra.mrb[0].mxu0 %v6404_v33  ;;  %v792_v3 = vshll.u32 %v6571_v21, 16  ;;  %1006 = vst [vmem:[#allocation2 + $0x7c] sm:$0xf] %v786_v28  ;;  %1009 = vst [vmem:[#allocation2 + $0x80] sm:$0x1] %v1008_v60  ;;  %v797_v5 = vshrl.u32 %v6572_v52, 16  ;;  %v3800_v38 = vsel %vm8453_vm14, %v6389_v7, %v3799_v42  ;;  %v6661_v62 = vunpack.c.l.bf16 %v6769_v45 }
  0xb1   : > { %7038 = vmatmul.mubr.bf16.gmra.mrb[16].mxu1 %v6260_v25  ;;  %7294 = vmatpush3.bf16.msra.mxu0 %v8307_v20  ;;  %v800_v37 = vshll.u32 %v6572_v52, 16  ;;  %v3801_v23 = vrot.slane %v3799_v42, 4  ;;  %v471_v33 = vld [vmem:[#allocation2 + $0x90] sm:$0x1]  ;;  %v791_v4 = vrot.slane %v789_v48, 7  ;;  %v3802_v18 = vrot.slane %v7842_v6, 5 }
  0xb2   : > { %7295 = vmatprep.subr.bf16.mxu0 %v7749_v58  ;;  %v6390_v29 = vrot.slane %v3722_v36, 9  ;;  %v3806_v20 = vrot.slane %v7843_v11, 5  ;;  %v799_v12 = vrot.slane %v797_v5, 7  ;;  %v1010_v13 = vld [vmem:[#allocation2 + $0x84] sm:$0xf]  ;;  %v3809_v24 = vrot.slane %v7844_v44, 5 }
  0xb3   : > { %v6662_v15 = vunpack.c.h.bf16 %v6769_v45  ;;  %v794_v26 = vor.u32 %v792_v3, %v791_v4  ;;  %v795_v53 = vrot.slane %v791_v4, 4  ;;  %v1014_v22 = vld [vmem:[#allocation2 + $0x8c] sm:$0x1]  ;;  %v3803_v17 = vsel %vm8453_vm14, %v3801_v23, %v3802_v18  ;;  %v474_v60 = vld [vmem:[#allocation2 + $0x9c] sm:$0x1]  ;;  %v7757_v23 = vld [vmem:[%s9897_s3 + $0x1a0] sm:$0xff]  }
  0xb4   : > { %v3807_v31 = vsel %vm8453_vm14, %v6390_v29, %v3806_v20  ;;  %v802_v2 = vor.u32 %v800_v37, %v799_v12  ;;  %v804_v41 = vrot.slane %v799_v12, 4  ;;  %v6405_v46 = vcombine.low %v3800_v38, %v3803_v17  ;;  %v524_v38 = vld [vmem:[#allocation2 + $0xa4] sm:$0x1]  ;;  %v7761_v17 = vld [vmem:[%s9897_s3 + $0x1a8] sm:$0xff]  }
  0xb5   : > { %v3808_v16 = vrot.slane %v3806_v20, 4  ;;  %7296 = vmatpush3.bf16.msra.mxu0 %v7749_v58  ;;  %v1011_v63 = vsel %vm8108_vm10, %v794_v26, %v1010_v13  ;;  %v331_v49 = vmul.f32 %v8335_v56, %v6661_v62  ;;  %v332_v8 = vmul.f32 %v8335_v56, %v6662_v15 }
  0xb6   : > { %v472_v51 = vsel %vm8049_vm6, 0, %v471_v33  ;;  %7297 = vmatprep.subr.bf16.mxu0 %v7751_v14  ;;  %v1072_v50 = vld [vmem:[#allocation2 + $0x78] sm:$0xf]  ;;  %v803_v57 = vsel %vm8115_vm11, %v795_v53, %v802_v2  ;;  %1012 = vst [vmem:[#allocation2 + $0x84] sm:$0xf] %v1011_v63  ;;  %v1015_v7 = vsel %vm8049_vm6, %v804_v41, %v1014_v22  ;;  %7265 = vmatprep.mubr.bf16.mxu0 %v6405_v46  ;;  %v522_v27 = vsel %vm8058_vm8, 0, %v521_v0 }
  0xb7   : > { %v3810_v34 = vsel %vm8453_vm14, %v3808_v16, %v3809_v24  ;;  %473 = vst [vmem:[#allocation2 + $0x90] sm:$0x1] %v472_v51  ;;  %v1073_v21 = vld [vmem:[#allocation2 + $0x7c] sm:$0xf]  ;;  %v1110_v58 = vld [vmem:[#allocation2 + $0x80] sm:$0x1]  ;;  %v369_v52 = vadd.f32 %v8371_v61, %v331_v49  ;;  %v370_v28 = vadd.f32 %v8371_v61, %v332_v8  ;;  %v6665_v37 = vunpack.c.l.bf16 %v6770_v19 }
  0xb8   : > { %v1360_v36 = vshrl.u32 %v1072_v50, 16  ;;  %v1363_v25 = vshll.u32 %v1072_v50, 16  ;;  %1013 = vst [vmem:[#allocation2 + $0x88] sm:$0xf] %v803_v57  ;;  %1016 = vst [vmem:[#allocation2 + $0x8c] sm:$0x1] %v1015_v7  ;;  %v6406_v9 = vcombine.low %v3807_v31, %v3810_v34  ;;  %v6666_v20 = vunpack.c.h.bf16 %v6770_v19 }
  0xb9   : > { %523 = vst [vmem:[#allocation2 + $0x98] sm:$0x1] %v522_v27  ;;  %v1369_v55 = vshll.u32 %v1073_v21, 16  ;;  %v1373_v42 = vshrl.u32 %v1073_v21, 16  ;;  %v1379_v45 = vshll.u32 %v1110_v58, 16  ;;  %7298 = vmatpush3.bf16.msra.mxu0 %v7751_v14  ;;  %v401_v5 = vmax.f32 %v369_v52, 0.0 }
  0xba   : > { %v1362_v48 = vrot.slane %v1360_v36, 4  ;;  %v1365_v3 = vrot.slane %v1363_v25, 5  ;;  %7266 = vmatmul.mubr.bf16.gmra.mrb[4].mxu0 %v6406_v9  ;;  %7299 = vmatprep.subr.bf16.mxu0 %v7753_v59  ;;  %v402_v18 = vmax.f32 %v370_v28, 0.0  ;;  %v333_v14 = vmul.f32 %v8335_v56, %v6665_v37  ;;  %v8582_v0 = vld [vmem:[%s8018_s22 + $0x68] sm:$0xff]   ;;  %v8591_v22 = vld [vmem:[%s9895_s1] ss:$0 sm:$0xff] }
  0xbb   : > { %v1371_v33 = vrot.slane %v1369_v55, 5  ;;  %v1375_v4 = vrot.slane %v1373_v42, 4  ;;  %v1381_v6 = vrot.slane %v1379_v45, 5  ;;  %v6573_v11 = vpack.c.bf16 %v401_v5, %v401_v5  ;;  %v7765_v25 = vld [vmem:[%s9897_s3 + $0x1b0] sm:$0xff]   ;;  %v3723_v45 = vld [vmem:[#allocation2 + $0x3c] sm:$0xe] }
  0xbc   : > { %v1366_v29 = vor.u32 %v1365_v3, %v1362_v48  ;;  %v6574_v13 = vpack.c.bf16 %v402_v18, %v402_v18  ;;  %v475_v44 = vsel %vm8049_vm6, 0, %v474_v60  ;;  %v525_v24 = vsel %vm8058_vm8, 0, %v524_v38 }
  0xbd   : > { %v1376_v12 = vor.u32 %v1375_v4, %v1371_v33  ;;  %7300 = vmatpush3.bf16.msra.mxu0 %v7753_v59  ;;  %v1074_v15 = vld [vmem:[#allocation2 + $0x84] sm:$0xf]  ;;  %v806_v26 = vshrl.u32 %v6573_v11, 16  ;;  %v809_v53 = vshll.u32 %v6573_v11, 16  ;;  %v334_v56 = vmul.f32 %v8591_v22, %v6666_v20  ;;  %476 = vst [vmem:[#allocation2 + $0x9c] sm:$0x1] %v475_v44 }
  0xbe   : > { %v1367_v62 = vrot.slane %v1366_v29, 4  ;;  %526 = vst [vmem:[#allocation2 + $0xa4] sm:$0x1] %v525_v24  ;;  %7301 = vmatprep.subr.bf16.mxu0 %v7757_v23  ;;  %v1384_v46 = vshrl.u32 %v1074_v15, 16  ;;  %v371_v16 = vadd.f32 %v8371_v61, %v333_v14  ;;  %v6669_v63 = vunpack.c.l.bf16 %v8582_v0  ;;  %v1017_v36 = vld [vmem:[#allocation2 + $0x90] sm:$0xf] }
  0xbf   : > { %v1377_v31 = vrot.slane %v1376_v12, 4  ;;  %v8597_v2 = vld [vmem:[#allocation2 + $0x88] sm:$0xf]  ;;  %v1111_v41 = vld [vmem:[#allocation2 + $0x8c] sm:$0x1]  ;;  %v1387_v8 = vshll.u32 %v1074_v15, 16  ;;  %v372_v3 = vadd.f32 %v8371_v61, %v334_v56 }
  0xc0   : > { %v1372_v49 = vsel %vm8042_vm3, %v1367_v62, %v1371_v33  ;;  %v1393_v51 = vshll.u32 %v8597_v2, 16  ;;  %v1397_v59 = vshrl.u32 %v8597_v2, 16  ;;  %v1386_v57 = vrot.slane %v1384_v46, 4  ;;  %v7769_v33 = vld [vmem:[%s9897_s3 + $0x1b8] sm:$0xff]   ;;  %v7846_v12 = vld [vmem:[#allocation2 + $0x40] sm:$0xf] }
  0xc1   : > { %v1382_v50 = vsel %vm8042_vm3, %v1377_v31, %v1381_v6  ;;  %v1403_v7 = vshll.u32 %v1111_v41, 16  ;;  %v808_v34 = vrot.slane %v806_v26, 7  ;;  %7302 = vmatpush3.bf16.msra.mxu0 %v7757_v23  ;;  %v1389_v19 = vrot.slane %v1387_v8, 5  ;;  %v1021_v18 = vld [vmem:[#allocation2 + $0x98] sm:$0x1] }
  0xc2   : > { %v6261_v27 = vcombine.low %v1372_v49, %v1382_v50  ;;  %v1395_v21 = vrot.slane %v1393_v51, 5  ;;  %v1399_v58 = vrot.slane %v1397_v59, 4  ;;  %7303 = vmatprep.subr.bf16.mxu0 %v7761_v17  ;;  %v814_v42 = vshrl.u32 %v6574_v13, 16  ;;  %v7847_v15 = vld [vmem:[#allocation2 + $0x44] sm:$0x1] }
  0xc3   : > { %v1405_v9 = vrot.slane %v1403_v7, 5  ;;  %v811_v52 = vor.u32 %v809_v53, %v808_v34  ;;  %v812_v55 = vrot.slane %v808_v34, 4  ;;  %v1390_v28 = vor.u32 %v1389_v19, %v1386_v57  ;;  %v3724_v53 = vld [vmem:[#allocation2 + $0x48] sm:$0xe]  ;;  %v8630_v59 = vld [vmem:[%s9897_s3 + $0x1c0] sm:$0xff]  }
  0xc4   : > { %7041 = vmatprep.mubr.bf16.mxu1 %v6261_v27  ;;  %v1400_v60 = vor.u32 %v1399_v58, %v1395_v21  ;;  %v817_v48 = vshll.u32 %v6574_v13, 16  ;;  %v816_v5 = vrot.slane %v814_v42, 7  ;;  %v403_v38 = vmax.f32 %v371_v16, 0.0  ;;  %v1024_v8 = vld [vmem:[#allocation2 + $0x9c] sm:$0xf] }
  0xc5   : > { %v1018_v37 = vsel %vm8108_vm10, %v811_v52, %v1017_v36  ;;  %v6670_v23 = vunpack.c.h.bf16 %v8582_v0  ;;  %7304 = vmatpush3.bf16.msra.mxu0 %v7761_v17  ;;  %v1391_v4 = vrot.slane %v1390_v28, 4  ;;  %v404_v29 = vmax.f32 %v372_v3, 0.0  ;;  %v477_v36 = vld [vmem:[#allocation2 + $0xa8] sm:$0x1]  ;;  %v8652_v3 = vld [vmem:[%s9896_s2] ss:$0 sm:$0xff] }
  0xc6   : > { %v1401_v6 = vrot.slane %v1400_v60, 4  ;;  %1019 = vst [vmem:[#allocation2 + $0x90] sm:$0xf] %v1018_v37  ;;  %v6391_v11 = vrot.slane %v3723_v45, 9  ;;  %7305 = vmatprep.subr.bf16.mxu0 %v7765_v25  ;;  %v819_v61 = vor.u32 %v817_v48, %v816_v5  ;;  %v821_v20 = vrot.slane %v816_v5, 4 }
  0xc7   : > { %v6575_v14 = vpack.c.bf16 %v403_v38, %v403_v38  ;;  %v3813_v13 = vrot.slane %v7846_v12, 5  ;;  %v1396_v44 = vsel %vm8042_vm3, %v1391_v4, %v1395_v21  ;;  %v6576_v62 = vpack.c.bf16 %v404_v29, %v404_v29  ;;  %v527_v37 = vld [vmem:[#allocation2 + $0xb0] sm:$0x1] }
  0xc8   : > { %v1406_v24 = vsel %vm8042_vm3, %v1401_v6, %v1405_v9  ;;  %v3816_v26 = vrot.slane %v7847_v15, 5  ;;  %v820_v17 = vsel %vm8115_vm11, %v812_v55, %v819_v61  ;;  %v1022_v31 = vsel %vm8049_vm6, %v821_v20, %v1021_v18  ;;  %v1028_v55 = vld [vmem:[#allocation2 + $0xa4] sm:$0x1] }
  0xc9   : > { %v6262_v56 = vcombine.low %v1396_v44, %v1406_v24  ;;  %v823_v41 = vshrl.u32 %v6575_v14, 16  ;;  %7306 = vmatpush3.bf16.msra.mxu0 %v7765_v25  ;;  %1020 = vst [vmem:[#allocation2 + $0x94] sm:$0xf] %v820_v17  ;;  %1023 = vst [vmem:[#allocation2 + $0x98] sm:$0x1] %v1022_v31  ;;  %v826_v46 = vshll.u32 %v6575_v14, 16  ;;  %v3814_v51 = vsel %vm8453_vm14, %v6391_v11, %v3813_v13 }
  0xca   : > { %v831_v16 = vshrl.u32 %v6576_v62, 16  ;;  %v834_v49 = vshll.u32 %v6576_v62, 16  ;;  %7307 = vmatprep.subr.bf16.mxu0 %v7769_v33  ;;  %v3815_v57 = vrot.slane %v3813_v13, 4  ;;  %v6392_v7 = vrot.slane %v3724_v53, 9  ;;  %v6772_v24 = vld [vmem:[%s8018_s22 + $0x70] sm:$0xff]  }
  0xcb   : > { %7042 = vmatmul.mubr.bf16.gmra.mrb[20].mxu1 %v6262_v56  ;;  %v825_v50 = vrot.slane %v823_v41, 7  ;;  %v3820_v34 = vrot.slane %v8388_v40, 5  ;;  %v3823_v19 = vrot.slane %v8398_v47, 5  ;;  %v335_v21 = vmul.f32 %v8591_v22, %v6669_v63  ;;  %v480_v56 = vld [vmem:[#allocation2 + $0xb4] sm:$0x1] }
  0xcc   : > { %v833_v27 = vrot.slane %v831_v16, 7  ;;  %v336_v58 = vmul.f32 %v8591_v22, %v6670_v23  ;;  %v3817_v42 = vsel %vm8453_vm14, %v3815_v57, %v3816_v26  ;;  %v478_v20 = vsel %vm8049_vm6, 0, %v477_v36 }
  0xcd   : > { %v8638_v25 = vld [vmem:[#allocation2 + $0x90] sm:$0xf]  ;;  %v828_v9 = vor.u32 %v826_v46, %v825_v50  ;;  %v829_v52 = vrot.slane %v825_v50, 4  ;;  %v3821_v40 = vsel %vm8453_vm14, %v6392_v7, %v3820_v34  ;;  %7308 = vmatpush3.bf16.msra.mxu0 %v7769_v33  ;;  %v6407_v60 = vcombine.low %v3814_v51, %v3817_v42  ;;  %479 = vst [vmem:[#allocation2 + $0xa8] sm:$0x1] %v478_v20 }
  0xce   : > { %v1408_v47 = vshrl.u32 %v8638_v25, 16  ;;  %v1411_v0 = vshll.u32 %v8638_v25, 16  ;;  %v836_v63 = vor.u32 %v834_v49, %v833_v27  ;;  %v838_v45 = vrot.slane %v833_v27, 4  ;;  %7341 = vmatprep.subr.bf16.mxu0 %v8630_v59 }
  0xcf   : > { %v1025_v28 = vsel %vm8108_vm10, %v828_v9, %v1024_v8  ;;  %v3822_v48 = vrot.slane %v3820_v34, 4  ;;  %v373_v5 = vadd.f32 %v8652_v3, %v335_v21  ;;  %7269 = vmatprep.mubr.bf16.mxu0 %v6407_v60  ;;  %v374_v11 = vadd.f32 %v8652_v3, %v336_v58 }
  0xd0   : > { %v1410_v38 = vrot.slane %v1408_v47, 4  ;;  %v1413_v23 = vrot.slane %v1411_v0, 5  ;;  %v837_v33 = vsel %vm8115_vm11, %v829_v52, %v836_v63  ;;  %1026 = vst [vmem:[#allocation2 + $0x9c] sm:$0xf] %v1025_v28  ;;  %v1029_v4 = vsel %vm8049_vm6, %v838_v45, %v1028_v55  ;;  %v8659_v6 = vld [vmem:[#allocation2 + $0x94] sm:$0xf] }
  0xd1   : > { %v1112_v18 = vld [vmem:[#allocation2 + $0x98] sm:$0x1]  ;;  %1027 = vst [vmem:[#allocation2 + $0xa0] sm:$0xf] %v837_v33  ;;  %1030 = vst [vmem:[#allocation2 + $0xa4] sm:$0x1] %v1029_v4  ;;  %v3824_v29 = vsel %vm8453_vm14, %v3822_v48, %v3823_v19  ;;  %v6673_v8 = vunpack.c.l.bf16 %v6772_v24  ;;  %v6674_v57 = vunpack.c.h.bf16 %v6772_v24 }
  0xd2   : > { %v405_v61 = vmax.f32 %v373_v5, 0.0  ;;  %v1414_v14 = vor.u32 %v1413_v23, %v1410_v38  ;;  %v1417_v12 = vshll.u32 %v8659_v6, 16  ;;  %v1421_v13 = vshrl.u32 %v8659_v6, 16  ;;  %v530_v38 = vld [vmem:[#allocation2 + $0xbc] sm:$0x1] }
  0xd3   : > { %v1427_v44 = vshll.u32 %v1112_v18, 16  ;;  %v6408_v62 = vcombine.low %v3821_v40, %v3824_v29  ;;  %v406_v15 = vmax.f32 %v374_v11, 0.0  ;;  %v528_v26 = vsel %vm8058_vm8, 0, %v527_v37  ;;  %v3725_v29 = vld [vmem:[#allocation2 + $0x54] sm:$0xe] }
  0xd4   : > { %v6577_v53 = vpack.c.bf16 %v405_v61, %v405_v61  ;;  %v1415_v17 = vrot.slane %v1414_v14, 4  ;;  %v1419_v31 = vrot.slane %v1417_v12, 5  ;;  %v1423_v41 = vrot.slane %v1421_v13, 4  ;;  %529 = vst [vmem:[#allocation2 + $0xb0] sm:$0x1] %v528_v26 }
  0xd5   : > { %v1429_v46 = vrot.slane %v1427_v44, 5  ;;  %7270 = vmatmul.mubr.bf16.gmra.mrb[8].mxu0 %v6408_v62  ;;  %v6578_v16 = vpack.c.bf16 %v406_v15, %v406_v15  ;;  %v481_v7 = vsel %vm8049_vm6, 0, %v480_v56  ;;  %v337_v42 = vmul.f32 %v8591_v22, %v6673_v8  ;;  %v1031_v28 = vld [vmem:[#allocation2 + $0xa8] sm:$0xf] }
  0xd6   : > { %v840_v49 = vshrl.u32 %v6577_v53, 16  ;;  %v1424_v51 = vor.u32 %v1423_v41, %v1419_v31  ;;  %v843_v50 = vshll.u32 %v6577_v53, 16  ;;  %v1420_v34 = vsel %vm8042_vm3, %v1415_v17, %v1419_v31  ;;  %482 = vst [vmem:[#allocation2 + $0xb4] sm:$0x1] %v481_v7  ;;  %v3726_v7 = vld [vmem:[#allocation2 + $0x60] sm:$0xe] }
  0xd7   : > { %v8675_v27 = vld [vmem:[#allocation2 + $0x9c] sm:$0xf]  ;;  %v848_v21 = vshrl.u32 %v6578_v16, 16  ;;  %v851_v58 = vshll.u32 %v6578_v16, 16  ;;  %v338_v40 = vmul.f32 %v8591_v22, %v6674_v57  ;;  %v375_v14 = vadd.f32 %v8652_v3, %v337_v42 }
  0xd8   : > { %v842_v19 = vrot.slane %v840_v49, 7  ;;  %v1425_v36 = vrot.slane %v1424_v51, 4  ;;  %v8677_v9 = vld [vmem:[#allocation2 + $0xa0] sm:$0xf]  ;;  %v1113_v52 = vld [vmem:[#allocation2 + $0xa4] sm:$0x1] }
  0xd9   : > { %v1432_v55 = vshrl.u32 %v8675_v27, 16  ;;  %v1435_v47 = vshll.u32 %v8675_v27, 16  ;;  %v1441_v0 = vshll.u32 %v8677_v9, 16  ;;  %v1445_v63 = vshrl.u32 %v8677_v9, 16 }
  0xda   : > { %v1451_v45 = vshll.u32 %v1113_v52, 16  ;;  %v1430_v60 = vsel %vm8042_vm3, %v1425_v36, %v1429_v46  ;;  %v845_v5 = vor.u32 %v843_v50, %v842_v19  ;;  %v846_v37 = vrot.slane %v842_v19, 4  ;;  %v7849_v46 = vld [vmem:[#allocation2 + $0x58] sm:$0xf]  ;;  %v7850_v50 = vld [vmem:[#allocation2 + $0x5c] sm:$0x1] }
  0xdb   : > { %v1434_v48 = vrot.slane %v1432_v55, 4  ;;  %v6263_v23 = vcombine.low %v1420_v34, %v1430_v60  ;;  %v1437_v33 = vrot.slane %v1435_v47, 5  ;;  %v1443_v4 = vrot.slane %v1441_v0, 5  ;;  %v1035_v44 = vld [vmem:[#allocation2 + $0xb0] sm:$0x1] }
  0xdc   : > { %v1447_v18 = vrot.slane %v1445_v63, 4  ;;  %v1453_v11 = vrot.slane %v1451_v45, 5  ;;  %v850_v61 = vrot.slane %v848_v21, 7  ;;  %v1032_v20 = vsel %vm8108_vm10, %v845_v5, %v1031_v28  ;;  %v3727_v45 = vld [vmem:[#allocation2 + $0x6c] sm:$0xe] }
  0xdd   : > { %7045 = vmatprep.mubr.bf16.mxu1 %v6263_v23  ;;  %v1438_v12 = vor.u32 %v1437_v33, %v1434_v48  ;;  %1033 = vst [vmem:[#allocation2 + $0xa8] sm:$0xf] %v1032_v20  ;;  %v376_v24 = vadd.f32 %v8652_v3, %v338_v40  ;;  %v531_v62 = vsel %vm8058_vm8, 0, %v530_v38  ;;  %v407_v53 = vmax.f32 %v375_v14, 0.0 }
  0xde   : > { %v1448_v13 = vor.u32 %v1447_v18, %v1443_v4  ;;  %v853_v15 = vor.u32 %v851_v58, %v850_v61  ;;  %v855_v26 = vrot.slane %v850_v61, 4  ;;  %532 = vst [vmem:[#allocation2 + $0xbc] sm:$0x1] %v531_v62  ;;  %v6393_v56 = vrot.slane %v3725_v29, 9 }
  0xdf   : > { %v1439_v17 = vrot.slane %v1438_v12, 4  ;;  %v408_v41 = vmax.f32 %v376_v24, 0.0  ;;  %v3827_v16 = vrot.slane %v7849_v46, 5  ;;  %v6579_v51 = vpack.c.bf16 %v407_v53, %v407_v53  ;;  %v2992_v46 = vld [vmem:[#allocation2 + $0x74] sm:$0x1] }
  0xe0   : > { %v1449_v31 = vrot.slane %v1448_v13, 4  ;;  %v854_v49 = vsel %vm8115_vm11, %v846_v37, %v853_v15  ;;  %v1036_v8 = vsel %vm8049_vm6, %v855_v26, %v1035_v44  ;;  %v3830_v57 = vrot.slane %v7850_v50, 5  ;;  %v2991_v37 = vld [vmem:[#allocation2 + $0x70] sm:$0xf] }
  0xe1   : > { %v1444_v34 = vsel %vm8042_vm3, %v1439_v17, %v1443_v4  ;;  %1034 = vst [vmem:[#allocation2 + $0xac] sm:$0xf] %v854_v49  ;;  %1037 = vst [vmem:[#allocation2 + $0xb0] sm:$0x1] %v1036_v8  ;;  %v6580_v21 = vpack.c.bf16 %v408_v41, %v408_v41  ;;  %v3828_v58 = vsel %vm8453_vm14, %v6393_v56, %v3827_v16  ;;  %v857_v52 = vshrl.u32 %v6579_v51, 16 }
  0xe2   : > { %v1454_v19 = vsel %vm8042_vm3, %v1449_v31, %v1453_v11  ;;  %v860_v55 = vshll.u32 %v6579_v51, 16  ;;  %v3829_v42 = vrot.slane %v3827_v16, 4  ;;  %v6394_v0 = vrot.slane %v3726_v7, 9  ;;  %v1038_v4 = vld [vmem:[#allocation2 + $0xb4] sm:$0xf] }
  0xe3   : > { %v6264_v36 = vcombine.low %v1444_v34, %v1454_v19  ;;  %v865_v40 = vshrl.u32 %v6580_v21, 16  ;;  %v868_v47 = vshll.u32 %v6580_v21, 16  ;;  %v3834_v63 = vrot.slane %v8485_v1, 5  ;;  %v3728_v51 = vld [vmem:[#allocation2 + $0x78] sm:$0xe] }
  0xe4   : > { %v8704_v28 = vld [vmem:[#allocation2 + $0xa8] sm:$0xf]  ;;  %v859_v60 = vrot.slane %v857_v52, 7  ;;  %v3831_v48 = vsel %vm8453_vm14, %v3829_v42, %v3830_v57  ;;  %v3837_v5 = vrot.slane %v8487_v54, 5  ;;  %v6395_v26 = vrot.slane %v3727_v45, 9 }
  0xe5   : > { %7046 = vmatmul.mubr.bf16.gmra.mrb[24].mxu1 %v6264_v36  ;;  %v1456_v38 = vshrl.u32 %v8704_v28, 16  ;;  %v1459_v23 = vshll.u32 %v8704_v28, 16  ;;  %v867_v33 = vrot.slane %v865_v40, 7  ;;  %v6409_v18 = vcombine.low %v3828_v58, %v3831_v48  ;;  %v1042_v44 = vld [vmem:[#allocation2 + $0xbc] sm:$0x1] }
  0xe6   : > { %v862_v29 = vor.u32 %v860_v55, %v859_v60  ;;  %v863_v1 = vrot.slane %v859_v60, 4  ;;  %v3835_v11 = vsel %vm8453_vm14, %v6394_v0, %v3834_v63  ;;  %v3836_v61 = vrot.slane %v3834_v63, 4  ;;  %v8725_v34 = vld [vmem:[#allocation2 + $0x7c] sm:$0xf]  ;;  %v8729_v36 = vld [vmem:[#allocation2 + $0x80] sm:$0x1] }
  0xe7   : > { %v1458_v20 = vrot.slane %v1456_v38, 4  ;;  %v1461_v14 = vrot.slane %v1459_v23, 5  ;;  %v870_v12 = vor.u32 %v868_v47, %v867_v33  ;;  %v872_v13 = vrot.slane %v867_v33, 4  ;;  %7273 = vmatprep.mubr.bf16.mxu0 %v6409_v18  ;;  %v2997_v48 = vld [vmem:[#allocation2 + $0x88] sm:$0xf] }
  0xe8   : > { %v8713_v54 = vld [vmem:[#allocation2 + $0xac] sm:$0xf]  ;;  %v1114_v24 = vld [vmem:[#allocation2 + $0xb0] sm:$0x1]  ;;  %v1039_v62 = vsel %vm8108_vm10, %v862_v29, %v1038_v4  ;;  %v3838_v15 = vsel %vm8453_vm14, %v3836_v61, %v3837_v5  ;;  %v3841_v53 = vrot.slane %v2991_v37, 5  ;;  %v3844_v58 = vrot.slane %v2992_v46, 5 }
  0xe9   : > { %v1462_v56 = vor.u32 %v1461_v14, %v1458_v20  ;;  %v1465_v17 = vshll.u32 %v8713_v54, 16  ;;  %v1469_v31 = vshrl.u32 %v8713_v54, 16  ;;  %v1475_v41 = vshll.u32 %v1114_v24, 16  ;;  %1040 = vst [vmem:[#allocation2 + $0xb4] sm:$0xf] %v1039_v62 }
  0xea   : > { %v871_v16 = vsel %vm8115_vm11, %v863_v1, %v870_v12  ;;  %v1043_v49 = vsel %vm8049_vm6, %v872_v13, %v1042_v44  ;;  %v6410_v8 = vcombine.low %v3835_v11, %v3838_v15  ;;  %v3842_v19 = vsel %vm8453_vm14, %v6395_v26, %v3841_v53  ;;  %v3729_v5 = vld [vmem:[#allocation2 + $0x84] sm:$0xe]  ;;  %v2998_v23 = vld [vmem:[#allocation2 + $0x8c] sm:$0x1]  ;;  %v3730_v1 = vld [vmem:[#allocation2 + $0x90] sm:$0xe] }
  0xeb   : > { %v1463_v50 = vrot.slane %v1462_v56, 4  ;;  %v1467_v57 = vrot.slane %v1465_v17, 5  ;;  %v1471_v7 = vrot.slane %v1469_v31, 4  ;;  %1041 = vst [vmem:[#allocation2 + $0xb8] sm:$0xf] %v871_v16  ;;  %v3843_v21 = vrot.slane %v3841_v53, 4 }
  0xec   : > { %1044 = vst [vmem:[#allocation2 + $0xbc] sm:$0x1] %v1043_v49  ;;  %7274 = vmatmul.mubr.bf16.gmra.mrb[12].mxu0 %v6410_v8  ;;  %v1477_v55 = vrot.slane %v1475_v41, 5  ;;  %v6396_v42 = vrot.slane %v3728_v51, 9  ;;  %v3848_v47 = vrot.slane %v8725_v34, 5  ;;  %v3851_v60 = vrot.slane %v8729_v36, 5 }
  0xed   : > { %v1472_v52 = vor.u32 %v1471_v7, %v1467_v57  ;;  %v3845_v40 = vsel %vm8453_vm14, %v3843_v21, %v3844_v58  ;;  %v1468_v0 = vsel %vm8042_vm3, %v1463_v50, %v1467_v57  ;;  %v6397_v12 = vrot.slane %v3729_v5, 9  ;;  %v3000_v15 = vld [vmem:[#allocation2 + $0x94] sm:$0xf]  ;;  %v3001_v31 = vld [vmem:[#allocation2 + $0x98] sm:$0x1] }
  0xee   : > { %v6411_v45 = vcombine.low %v3842_v19, %v3845_v40  ;;  %v3850_v38 = vrot.slane %v3848_v47, 4  ;;  %v3849_v29 = vsel %vm8453_vm14, %v6396_v42, %v3848_v47  ;;  %v3855_v56 = vrot.slane %v2997_v48, 5  ;;  %v3003_v8 = vld [vmem:[#allocation2 + $0xa0] sm:$0xf]  ;;  %v3004_v7 = vld [vmem:[#allocation2 + $0xa4] sm:$0x1] }
  0xef   : > { %v1473_v63 = vrot.slane %v1472_v52, 4  ;;  %v3858_v17 = vrot.slane %v2998_v23, 5  ;;  %v6398_v49 = vrot.slane %v3730_v1, 9  ;;  %v3862_v57 = vrot.slane %v3000_v15, 5  ;;  %v3731_v19 = vld [vmem:[#allocation2 + $0x9c] sm:$0xe] }
  0xf0   : > { %v8737_v37 = vld [vmem:[#allocation2 + $0xb4] sm:$0xf]  ;;  %7277 = vmatprep.mubr.bf16.mxu0 %v6411_v45  ;;  %v3852_v14 = vsel %vm8453_vm14, %v3850_v38, %v3851_v60  ;;  %v3856_v51 = vsel %vm8453_vm14, %v6397_v12, %v3855_v56  ;;  %v3857_v50 = vrot.slane %v3855_v56, 4  ;;  %v3732_v42 = vld [vmem:[#allocation2 + $0xa8] sm:$0xe]  ;;  %v3872_v1 = vrot.slane %v3004_v7, 5 }
  0xf1   : > { %v1478_v33 = vsel %vm8042_vm3, %v1473_v63, %v1477_v55  ;;  %v1480_v4 = vshrl.u32 %v8737_v37, 16  ;;  %v1483_v18 = vshll.u32 %v8737_v37, 16  ;;  %v6412_v53 = vcombine.low %v3849_v29, %v3852_v14  ;;  %v7851_v40 = vld [vmem:[#allocation2] sm:$0xf]  ;;  %v8753_v47 = vld [vmem:[#allocation2 + $0x4] sm:$0xf] }
  0xf2   : > { %v6265_v11 = vcombine.low %v1468_v0, %v1478_v33  ;;  %v8745_v61 = vld [vmem:[#allocation2 + $0xb8] sm:$0xf]  ;;  %v3865_v55 = vrot.slane %v3001_v31, 5  ;;  %v6275_v0 = vcombine.low %v7851_v40, %v8753_v47  ;;  %v3859_v63 = vsel %vm8453_vm14, %v3857_v50, %v3858_v17  ;;  %v3006_v48 = vld [vmem:[#allocation2 + $0xac] sm:$0xf] }
  0xf3   : > { %v1115_v20 = vld [vmem:[#allocation2 + $0xbc] sm:$0x1]  ;;  %v1482_v13 = vrot.slane %v1480_v4, 4  ;;  %v1485_v44 = vrot.slane %v1483_v18, 5  ;;  %v1489_v24 = vshll.u32 %v8745_v61, 16  ;;  %v1493_v62 = vshrl.u32 %v8745_v61, 16 }
  0xf4   : > { %7049 = vmatprep.mubr.bf16.mxu1 %v6265_v11  ;;  %v1499_v26 = vshll.u32 %v1115_v20, 16  ;;  %7278 = vmatmul.mubr.bf16.gmra.mrb[16].mxu0 %v6412_v53  ;;  %v3863_v45 = vsel %vm8453_vm14, %v6398_v49, %v3862_v57  ;;  %v3864_v60 = vrot.slane %v3862_v57, 4  ;;  %v3007_v5 = vld [vmem:[#allocation2 + $0xb0] sm:$0x1]  ;;  %v6413_v33 = vcombine.low %v3856_v51, %v3859_v63  ;;  %v3733_v20 = vld [vmem:[#allocation2 + $0xb4] sm:$0xe] }
  0xf5   : > { %v1486_v41 = vor.u32 %v1485_v44, %v1482_v13  ;;  %v1491_v46 = vrot.slane %v1489_v24, 5  ;;  %v1495_v16 = vrot.slane %v1493_v62, 4  ;;  %v6399_v4 = vrot.slane %v3731_v19, 9  ;;  %v6773_v14 = vld [vmem:[%s8018_s22 + $0x78] sm:$0xff]   ;;  %v483_v17 = vld [vmem:[#allocation2 + $0xc0] sm:$0x1] }
  0xf6   : > { %v1501_v52 = vrot.slane %v1499_v26, 5  ;;  %v3866_v18 = vsel %vm8453_vm14, %v3864_v60, %v3865_v55  ;;  %v3869_v29 = vrot.slane %v3003_v8, 5  ;;  %v6400_v11 = vrot.slane %v3732_v42, 9  ;;  %7281 = vmatprep.mubr.bf16.mxu0 %v6413_v33  ;;  %v3009_v62 = vld [vmem:[#allocation2 + $0xb8] sm:$0xf]  ;;  %v7760_v33 = vld [vmem:[%s9897_s3 + $0x88] sm:$0xff]  }
  0xf7   : > { %v1487_v21 = vrot.slane %v1486_v41, 4  ;;  %v1496_v58 = vor.u32 %v1495_v16, %v1491_v46  ;;  %v6414_v13 = vcombine.low %v3863_v45, %v3866_v18  ;;  %v3876_v44 = vrot.slane %v3006_v48, 5  ;;  %v3010_v15 = vld [vmem:[#allocation2 + $0xbc] sm:$0x1]  ;;  %v533_v50 = vld [vmem:[#allocation2 + $0xc8] sm:$0x1] }
  0xf8   : > { %v3879_v24 = vrot.slane %v3007_v5, 5  ;;  %v3870_v53 = vsel %vm8453_vm14, %v6399_v4, %v3869_v29  ;;  %v3871_v56 = vrot.slane %v3869_v29, 4  ;;  %v3883_v49 = vrot.slane %v3009_v62, 5  ;;  %v8783_v63 = vld [vmem:[#allocation2 + $0x10] sm:$0xf] }
  0xf9   : > { %v1492_v38 = vsel %vm8042_vm3, %v1487_v21, %v1491_v46  ;;  %v1497_v23 = vrot.slane %v1496_v58, 4  ;;  %v3877_v31 = vsel %vm8453_vm14, %v6400_v11, %v3876_v44  ;;  %v3878_v41 = vrot.slane %v3876_v44, 4  ;;  %v7857_v11 = vld [vmem:[%s9897_s3 + $0x80] sm:$0xff]   ;;  %v8802_v62 = vld [vmem:[#allocation2 + $0x28] sm:$0xf] }
  0xfa   : > { %v6401_v46 = vrot.slane %v3733_v20, 9  ;;  %v3873_v16 = vsel %vm8453_vm14, %v3871_v56, %v3872_v1  ;;  %v3886_v8 = vrot.slane %v3010_v15, 5  ;;  %v6677_v51 = vunpack.c.l.bf16 %v6773_v14  ;;  %v8805_v56 = vld [vmem:[#allocation2 + $0x34] sm:$0xf] }
  0xfb   : > { %v1502_v12 = vsel %vm8042_vm3, %v1497_v23, %v1501_v52  ;;  %v6415_v57 = vcombine.low %v3870_v53, %v3873_v16  ;;  %v3880_v7 = vsel %vm8453_vm14, %v3878_v41, %v3879_v24  ;;  %v6678_v19 = vunpack.c.h.bf16 %v6773_v14  ;;  %v8789_v23 = vld [vmem:[#allocation2 + $0x1c] sm:$0xf]  ;;  %v7858_v24 = vld [vmem:[#allocation2 + $0x24] sm:$0xf]  ;;  %v7860_v53 = vld [vmem:[#allocation2 + $0x30] sm:$0xf] }
  0xfc   : > { %v6266_v26 = vcombine.low %v1492_v38, %v1502_v12  ;;  %7282 = vmatmul.mubr.bf16.gmra.mrb[20].mxu0 %v6414_v13  ;;  %v484_v21 = vsel %vm8049_vm6, 0, %v483_v17  ;;  %v3885_v58 = vrot.slane %v3883_v49, 4  ;;  %v339_v52 = vmul.f32 %v8591_v22, %v6677_v51  ;;  %v7855_v38 = vld [vmem:[#allocation2 + $0x18] sm:$0xf] }
  0xfd   : > { %485 = vst [vmem:[#allocation2 + $0xc0] sm:$0x1] %v484_v21  ;;  %7285 = vmatprep.mubr.bf16.mxu0 %v6415_v57  ;;  %v3884_v55 = vsel %vm8453_vm14, %v6401_v46, %v3883_v49  ;;  %v340_v42 = vmul.f32 %v8591_v22, %v6678_v19  ;;  %v534_v40 = vsel %vm8058_vm8, 0, %v533_v50  ;;  %v6416_v60 = vcombine.low %v3877_v31, %v3880_v7  ;;  %v7768_v16 = vld [vmem:[%s9897_s3 + $0x98] sm:$0xff]   ;;  %v7772_v21 = vld [vmem:[%s9897_s3 + $0xa0] sm:$0xff]  }
  0xfe   : > { %7050 = vmatmul.mubr.bf16.gmra.mrb[28].mxu1 %v6266_v26  ;;  %v3887_v48 = vsel %vm8453_vm14, %v3885_v58, %v3886_v8  ;;  %v377_v5 = vadd.f32 %v8652_v3, %v339_v52  ;;  %535 = vst [vmem:[#allocation2 + $0xc8] sm:$0x1] %v534_v40  ;;  %v6277_v22 = vcombine.low %v7855_v38, %v8789_v23  ;;  %v7862_v58 = vld [vmem:[#allocation2 + $0x3c] sm:$0xf]  ;;  %v8820_v52 = vld [vmem:[#allocation2 + $0x40] sm:$0xf] }
  0xff   : > { %7069 = vmatprep.mubr.bf16.mxu1 %v6275_v0  ;;  %v7853_v0 = vld [vmem:[#allocation2 + $0xc] sm:$0xf]  ;;  %v378_v43 = vadd.f32 %v8652_v3, %v340_v42  ;;  %v6417_v4 = vcombine.low %v3884_v55, %v3887_v48  ;;  %v7764_v3 = vld [vmem:[%s9897_s3 + $0x90] sm:$0xff]   ;;  %v6278_v15 = vcombine.low %v7858_v24, %v8802_v62  ;;  %v6279_v17 = vcombine.low %v7860_v53, %v8805_v56  ;;  %v7864_v55 = vld [vmem:[#allocation2 + $0x48] sm:$0xf] }
 0x100   : > { %v6276_v45 = vcombine.low %v7853_v0, %v8783_v63  ;;  %v409_v18 = vmax.f32 %v377_v5, 0.0  ;;  %v6280_v30 = vcombine.low %v7862_v58, %v8820_v52  ;;  %v8823_v42 = vld [vmem:[#allocation2 + $0x4c] sm:$0xf]  ;;  %v7784_v38 = vld [vmem:[%s9897_s3 + $0xb0] sm:$0xff]   ;;  %v2150_v24 = vrot.slane %v8753_v47, 5 }
 0x101   : > { %v410_v29 = vmax.f32 %v378_v43, 0.0  ;;  %v6281_v35 = vcombine.low %v7864_v55, %v8823_v42  ;;  %v3244_v43 = vshrl.u32 %v8725_v34, 16  ;;  %v2101_v55 = vld [vmem:[#allocation2 + $0x30] sm:$0xe] }
 0x102   : > { %v6581_v1 = vpack.c.bf16 %v409_v18, %v409_v18 }
 0x103   : > { %v6582_v20 = vpack.c.bf16 %v410_v29, %v410_v29 }
 0x104   : > { %7286 = vmatmul.mubr.bf16.gmra.mrb[24].mxu0 %v6416_v60  ;;  %v874_v14 = vshrl.u32 %v6581_v1, 16  ;;  %v877_v12 = vshll.u32 %v6581_v1, 16  ;;  %v1045_v41 = vld [vmem:[#allocation2 + $0xc0] sm:$0xf] }
 0x105   : > { %7289 = vmatprep.mubr.bf16.mxu0 %v6417_v4  ;;  %v882_v13 = vshrl.u32 %v6582_v20, 16  ;;  %v885_v44 = vshll.u32 %v6582_v20, 16  ;;  %v1049_v46 = vld [vmem:[#allocation2 + $0xc8] sm:$0x1]  ;;  %v8834_v4 = vld [vmem:[#allocation2 + $0x58] sm:$0xf] }
 0x106   : > { %7070 = vmatmul.mubr.bf16.vlgmr.msra.gmra.mrb[0].mxu1 %v6276_v45  ;;  %v876_v26 = vrot.slane %v874_v14, 7  ;;  %v8839_v20 = vld [vmem:[#allocation2 + $0x64] sm:$0xf]  ;;  %v2097_v14 = vld [vmem:[#allocation2] sm:$0xe] }
 0x107   : > { %7102 = vmatpush3.bf16.msra.mxu1 %v7857_v11  ;;  %7073 = vmatprep.mubr.bf16.mxu1 %v6277_v22  ;;  %v884_v31 = vrot.slane %v882_v13, 7  ;;  %v3240_v22 = vshll.u32 %v8725_v34, 16  ;;  %v7868_v11 = vld [vmem:[#allocation2 + $0x60] sm:$0xf]  ;;  %v2099_v13 = vld [vmem:[#allocation2 + $0x18] sm:$0xe] }
 0x108   : > { %7103 = vmatprep.subr.bf16.mxu1 %v7760_v33  ;;  %v879_v49 = vor.u32 %v877_v12, %v876_v26  ;;  %v880_v8 = vrot.slane %v876_v26, 4  ;;  %v2098_v12 = vld [vmem:[#allocation2 + $0xc] sm:$0xe]  ;;  %v2164_v26 = vrot.slane %v8789_v23, 5 }
 0x109   : > { %v887_v51 = vor.u32 %v885_v44, %v884_v31  ;;  %v889_v50 = vrot.slane %v884_v31, 4  ;;  %v7773_v44 = vld [vmem:[#allocation2 + $0x18] sm:$0xff]   ;;  %v8847_v53 = vrot.slane %v3240_v22, 5  ;;  %v6300_v23 = vrot.slane %v2098_v12, 9 }
 0x10a   : > { %v1046_v57 = vsel %vm8108_vm10, %v879_v49, %v1045_v41  ;;  %v7790_v41 = vld [vmem:[%s9897_s3 + $0xb8] sm:$0xff]   ;;  %v2171_v49 = vrot.slane %v8802_v62, 5  ;;  %v8860_v62 = vld [vmem:[%s9897_s3 + $0xc0] sm:$0xff]  }
 0x10b   : > { %7104 = vmatpush3.bf16.msra.mxu1 %v7760_v33  ;;  %v888_v7 = vsel %vm8115_vm11, %v880_v8, %v887_v51  ;;  %1047 = vst [vmem:[#allocation2 + $0xc0] sm:$0xf] %v1046_v57  ;;  %v1050_v19 = vsel %vm8049_vm6, %v889_v50, %v1049_v46  ;;  %v7866_v33 = vld [vmem:[#allocation2 + $0x54] sm:$0xf]  ;;  %9929 = vst [vmem:[#allocation4_spill] sm:$0xff] %v8847_v53  ;;  %v6301_v51 = vrot.slane %v2099_v13, 9 }
 0x10c   : > { %7105 = vmatprep.subr.bf16.mxu1 %v7764_v3  ;;  %1048 = vst [vmem:[#allocation2 + $0xc4] sm:$0xf] %v888_v7  ;;  %1051 = vst [vmem:[#allocation2 + $0xc8] sm:$0x1] %v1050_v19  ;;  %v6282_v18 = vcombine.low %v7866_v33, %v8834_v4  ;;  %v7870_v46 = vld [vmem:[#allocation2 + $0x8] sm:$0x1] }
 0x10d   : > { %v7871_v8 = vld [vmem:[#allocation2 + $0x14] sm:$0x1]  ;;  %v2100_v50 = vld [vmem:[#allocation2 + $0x24] sm:$0xe]  ;;  %v2152_v57 = vrot.slane %v2150_v24, 4  ;;  %v2166_v19 = vrot.slane %v2164_v26, 4  ;;  %v8890_v12 = vsel %vm8453_vm14, %v6301_v51, %v2164_v26 }
 0x10e   : > { %7074 = vmatmul.mubr.bf16.gmra.mrb[4].mxu1 %v6278_v15  ;;  %v2157_v15 = vrot.slane %v8783_v63, 5  ;;  %v2160_v47 = vrot.slane %v7871_v8, 5  ;;  %v6299_v63 = vrot.slane %v2097_v14, 9  ;;  %v8865_v22 = vld [vmem:[#allocation2 + $0x7c] sm:$0xf] }
 0x10f   : > { %7077 = vmatprep.mubr.bf16.mxu1 %v6279_v17  ;;  %7106 = vmatpush3.bf16.msra.mxu1 %v7764_v3  ;;  %v6283_v3 = vcombine.low %v7868_v11, %v8839_v20  ;;  %v8849_v17 = vrot.slane %v3244_v43, 4  ;;  %v8868_v33 = vld [vmem:[#allocation2 + $0x84] sm:$0xf]  ;;  %v7779_v11 = vld [vmem:[#allocation2 + $0x30] sm:$0xff]  }
 0x110   : > { %7107 = vmatprep.subr.bf16.mxu1 %v7768_v16  ;;  %v2159_v7 = vrot.slane %v2157_v15, 4 }
 0x112   : > { %v3734_v40 = vld [vmem:[#allocation2 + $0xc0] sm:$0xe]  ;;  %v8886_v14 = vsel %vm8453_vm14, %v2159_v7, %v2160_v47  ;;  %v2178_v47 = vrot.slane %v8805_v56, 5  ;;  %v7879_v56 = vld [vmem:[#allocation2 + $0x38] sm:$0x1] }
 0x113   : > { %7108 = vmatpush3.bf16.msra.mxu1 %v7768_v16  ;;  %v3012_v0 = vld [vmem:[#allocation2 + $0xc4] sm:$0xf]  ;;  %v3013_v45 = vld [vmem:[#allocation2 + $0xc8] sm:$0x1]  ;;  %v6402_v60 = vrot.slane %v3734_v40, 9  ;;  %v2153_v16 = vrot.slane %v7870_v46, 5 }
 0x114   : > { %7109 = vmatprep.subr.bf16.mxu1 %v7772_v21  ;;  %v3890_v48 = vrot.slane %v3012_v0, 5  ;;  %v3893_v5 = vrot.slane %v3013_v45, 5  ;;  %v6302_v0 = vrot.slane %v2100_v50, 9  ;;  %v2173_v45 = vrot.slane %v2171_v49, 4  ;;  %v8928_v50 = vld [vmem:[#allocation2 + $0x48] sm:$0xe] }
 0x115   : > { %v2181_v7 = vrot.slane %v7879_v56, 5  ;;  %v6305_v56 = vrot.slane %v8928_v50, 9 }
 0x116   : > { %7078 = vmatmul.mubr.bf16.gmra.mrb[8].mxu1 %v6280_v30  ;;  %v3891_v29 = vsel %vm8453_vm14, %v6402_v60, %v3890_v48  ;;  %v3892_v1 = vrot.slane %v3890_v48, 4  ;;  %v7875_v60 = vld [vmem:[#allocation2 + $0x2c] sm:$0x1] }
 0x117   : > { %7081 = vmatprep.mubr.bf16.mxu1 %v6281_v35  ;;  %7110 = vmatpush3.bf16.msra.mxu1 %v7772_v21  ;;  %v7872_v21 = vld [vmem:[#allocation2 + $0x20] sm:$0x1]  ;;  %v7873_v35 = vld [vmem:[#allocation2 + $0x6c] sm:$0xf]  ;;  %v2174_v48 = vrot.slane %v7875_v60, 5 }
 0x118   : > { %7111 = vmatprep.subr.bf16.mxu1 %v7778_v39  ;;  %v3894_v34 = vsel %vm8453_vm14, %v3892_v1, %v3893_v5  ;;  %v2167_v58 = vrot.slane %v7872_v21, 5  ;;  %v7775_v5 = vld [vmem:[#allocation2 + $0x24] sm:$0xff]   ;;  %v8878_v1 = vsel %vm8453_vm14, %v6300_v23, %v2157_v15  ;;  %v8940_v60 = vld [vmem:[#allocation2 + $0x60] sm:$0xe]  ;;  %v7882_v15 = vld [vmem:[#allocation2 + $0x5c] sm:$0x1] }
 0x119   : > { %v6418_v31 = vcombine.low %v3891_v29, %v3894_v34  ;;  %v8874_v29 = vsel %vm8453_vm14, %v6299_v63, %v2150_v24  ;;  %v8896_v34 = vld [vmem:[#allocation2 + $0x3c] sm:$0xe]  ;;  %v8916_v8 = vsel %vm8453_vm14, %v2173_v45, %v2174_v48  ;;  %v7786_v63 = vld [vmem:[%s9897_s3 + $0x1d0] sm:$0xff]   ;;  %v7785_v48 = vld [vmem:[#allocation2 + $0x48] sm:$0xff]   ;;  %v2202_v24 = vrot.slane %v7882_v15, 5 }
 0x11a   : > { %v8894_v13 = vsel %vm8453_vm14, %v2166_v19, %v2167_v58  ;;  %v2185_v19 = vrot.slane %v8820_v52, 5  ;;  %v2104_v45 = vld [vmem:[#allocation2 + $0x54] sm:$0xe]  ;;  %v2180_v52 = vrot.slane %v2178_v47, 4  ;;  %v6307_v50 = vrot.slane %v8940_v60, 9 }
 0x11b   : > { %7112 = vmatpush3.bf16.msra.mxu1 %v7778_v39  ;;  %7290 = vmatmul.mubr.bf16.gmra.mrb[28].mxu0 %v6418_v31  ;;  %v8862_v39 = vld [vmem:[#allocation2 + $0x70] sm:$0xf]  ;;  %v6303_v31 = vrot.slane %v2101_v55, 9  ;;  %v7781_v55 = vld [vmem:[#allocation2 + $0x3c] sm:$0xff]   ;;  %v6306_v26 = vrot.slane %v2104_v45, 9  ;;  %v9930_v15 = vcombine.low %v8638_v25, %v8659_v6 }
 0x11c   : > { %7113 = vmatprep.subr.bf16.mxu1 %v7784_v38  ;;  %7309 = vmatprep.mubr.bf16.mxu0 %v7773_v44  ;;  %v6284_v40 = vcombine.low %v7873_v35, %v8862_v39  ;;  %v7780_v44 = vld [vmem:[%s9897_s3 + $0x1c8] sm:$0xff]   ;;  %v2206_v35 = vrot.slane %v8839_v20, 5  ;;  %v7796_v25 = vld [vmem:[%s9897_s3 + $0x1e0] sm:$0xff]  }
 0x11e   : > { %7082 = vmatmul.mubr.bf16.gmra.mrb[12].mxu1 %v6282_v18  ;;  %v6286_v18 = vcombine.low %v8868_v33, %v8597_v2  ;;  %v7883_v2 = vld [vmem:[#allocation2 + $0x68] sm:$0x1] }
 0x11f   : > { %7085 = vmatprep.mubr.bf16.mxu1 %v6283_v3  ;;  %7114 = vmatpush3.bf16.msra.mxu1 %v7784_v38  ;;  %v7876_v38 = vld [vmem:[#allocation2 + $0x78] sm:$0xf]  ;;  %v8882_v3 = vsel %vm8453_vm14, %v2152_v57, %v2153_v16  ;;  %v8912_v16 = vsel %vm8453_vm14, %v6302_v0, %v2171_v49  ;;  %v4603_v57 = vld [vmem:[#allocation2 + $0x1c] sm:$0xf]  ;;  %v6304_v0 = vrot.slane %v8896_v34, 9  ;;  %v2209_v33 = vrot.slane %v7883_v2, 5 }
 0x120   : > { %7115 = vmatprep.subr.bf16.mxu1 %v7790_v41  ;;  %v6285_v43 = vcombine.low %v7876_v38, %v8865_v22  ;;  %v7881_v34 = vld [vmem:[#allocation2 + $0x50] sm:$0x1]  ;;  %v4605_v49 = vld [vmem:[#allocation2 + $0x24] sm:$0xf]  ;;  %v2220_v2 = vrot.slane %v8865_v22, 5 }
 0x121   : > { %v2195_v30 = vrot.slane %v7881_v34, 5  ;;  %v8961_v20 = vsel %vm8453_vm14, %v6304_v0, %v2185_v19  ;;  %v7787_v34 = vld [vmem:[#allocation2 + $0x54] sm:$0xff]  }
 0x122   : > { %v7804_v22 = vld [vmem:[%s9897_s3 + $0x1f0] sm:$0xff]  }
 0x123   : > { %7116 = vmatpush3.bf16.msra.mxu1 %v7790_v41  ;;  %v4602_v41 = vld [vmem:[#allocation2 + $0x18] sm:$0xf]  ;;  %7310 = vmatmul.mubr.bf16.vlgmr.msra.gmra.mrb[0].mxu0 %v7775_v5  ;;  %v7880_v5 = vld [vmem:[#allocation2 + $0x44] sm:$0x1] }
 0x124   : > { %7149 = vmatprep.subr.bf16.mxu1 %v8860_v62  ;;  %7342 = vmatpush3.bf16.msra.mxu0 %v8630_v59  ;;  %v4651_v21 = vshrl.u32 %v4602_v41, 16  ;;  %v4654_v58 = vshll.u32 %v4602_v41, 16  ;;  %v2192_v59 = vrot.slane %v8823_v42, 5  ;;  %v2188_v38 = vrot.slane %v7880_v5, 5 }
 0x125   : > { %7313 = vmatprep.mubr.bf16.mxu0 %v7779_v11  ;;  %7343 = vmatprep.subr.bf16.mxu0 %v7780_v44  ;;  %v4660_v11 = vshll.u32 %v4603_v57, 16  ;;  %v4664_v41 = vshrl.u32 %v4603_v57, 16  ;;  %v2199_v42 = vrot.slane %v8834_v4, 5  ;;  %v2213_v5 = vrot.slane %v8862_v39, 5  ;;  %v4606_v57 = vld [vmem:[#allocation2 + $0x28] sm:$0xf] }
 0x126   : > { %7086 = vmatmul.mubr.bf16.gmra.mrb[16].mxu1 %v6284_v40  ;;  %v8936_v40 = vsel %vm8453_vm14, %v6303_v31, %v2178_v47  ;;  %v7792_v31 = vld [vmem:[%s9897_s3 + $0x1d8] sm:$0xff]   ;;  %v2187_v47 = vrot.slane %v2185_v19, 4  ;;  %v4653_v51 = vrot.slane %v4651_v21, 4  ;;  %v4656_v23 = vrot.slane %v4654_v58, 5  ;;  %v7884_v19 = vld [vmem:[#allocation2 + $0x74] sm:$0x1] }
 0x127   : > { %7089 = vmatprep.mubr.bf16.mxu1 %v6285_v43  ;;  %v8942_v43 = vld [vmem:[#allocation2 + $0x6c] sm:$0xe]  ;;  %v2194_v46 = vrot.slane %v2192_v59, 4  ;;  %v8957_v4 = vsel %vm8453_vm14, %v2180_v52, %v2181_v7  ;;  %v8963_v39 = vrot.slane %v4660_v11, 5  ;;  %v2201_v21 = vrot.slane %v2199_v42, 4 }
 0x128   : > { %7344 = vmatpush3.bf16.msra.mxu0 %v7780_v44  ;;  %v4666_v44 = vrot.slane %v4664_v41, 4  ;;  %v2208_v58 = vrot.slane %v2206_v35, 4  ;;  %v4604_v7 = vld [vmem:[#allocation2 + $0x20] sm:$0x1]  ;;  %v2215_v45 = vrot.slane %v2213_v5, 4  ;;  %v2216_v0 = vrot.slane %v7884_v19, 5 }
 0x129   : > { %7345 = vmatprep.subr.bf16.mxu0 %v7786_v63  ;;  %v4657_v60 = vor.u32 %v4656_v23, %v4653_v51  ;;  %v4675_v52 = vshrl.u32 %v4605_v49, 16  ;;  %v8974_v6 = vsel %vm8453_vm14, %v6305_v56, %v2192_v59  ;;  %v4684_v11 = vshll.u32 %v4606_v57, 16  ;;  %v4607_v41 = vld [vmem:[#allocation2 + $0x2c] sm:$0x1] }
 0x12a   : > { %v8982_v23 = vsel %vm8453_vm14, %v2194_v46, %v2195_v30  ;;  %v4667_v51 = vor.u32 %v4666_v44, %v8963_v39  ;;  %v8987_v59 = vsel %vm8453_vm14, %v6306_v26, %v2199_v42  ;;  %v8999_v30 = vsel %vm8453_vm14, %v2208_v58, %v2209_v33  ;;  %v7791_v46 = vld [vmem:[#allocation2 + $0x60] sm:$0xff]   ;;  %v7800_v56 = vld [vmem:[%s9897_s3 + $0x1e8] sm:$0xff]   ;;  %v2107_v44 = vld [vmem:[#allocation2 + $0x78] sm:$0xe] }
 0x12b   : > { %7314 = vmatmul.mubr.bf16.gmra.mrb[4].mxu0 %v7781_v55  ;;  %v4678_v55 = vshll.u32 %v4605_v49, 16  ;;  %v8991_v49 = vsel %vm8453_vm14, %v2201_v21, %v2202_v24  ;;  %v9010_v24 = vsel %vm8453_vm14, %v2215_v45, %v2216_v0  ;;  %v4677_v42 = vrot.slane %v4675_v52, 4  ;;  %v4608_v45 = vld [vmem:[#allocation2 + $0x30] sm:$0xf]  ;;  %v4609_v52 = vld [vmem:[#allocation2 + $0x34] sm:$0xf] }
 0x12c   : > { %7317 = vmatprep.mubr.bf16.mxu0 %v7785_v48  ;;  %7346 = vmatpush3.bf16.msra.mxu0 %v7786_v63  ;;  %v8978_v63 = vsel %vm8453_vm14, %v2187_v47, %v2188_v38  ;;  %v4670_v48 = vshll.u32 %v4604_v7, 16  ;;  %v8995_v38 = vsel %vm8453_vm14, %v6307_v50, %v2206_v35  ;;  %v4658_v35 = vrot.slane %v4657_v60, 4  ;;  %v9040_v60 = vld [vmem:[#allocation2 + $0x84] sm:$0xe]  ;;  %v9068_v7 = vld [vmem:[#allocation2 + $0x4c] sm:$0xf] }
 0x12d   : > { %7347 = vmatprep.subr.bf16.mxu0 %v7792_v31  ;;  %v4680_v47 = vrot.slane %v4678_v55, 5  ;;  %v4668_v21 = vrot.slane %v4667_v51, 4  ;;  %v6309_v0 = vrot.slane %v2107_v44, 9  ;;  %v7795_v44 = vld [vmem:[#allocation2 + $0x78] sm:$0xff]   ;;  %9934 = vst [vmem:[#allocation5_spill] sm:$0xff] %v9068_v7 }
 0x12e   : > { %7090 = vmatmul.mubr.bf16.gmra.mrb[20].mxu1 %v6286_v18  ;;  %v6308_v18 = vrot.slane %v8942_v43, 9  ;;  %v4688_v43 = vshrl.u32 %v4606_v57, 16  ;;  %v9012_v57 = vrot.slane %v4684_v11, 5  ;;  %v4672_v58 = vrot.slane %v4670_v48, 5  ;;  %v4611_v48 = vld [vmem:[#allocation2 + $0x3c] sm:$0xf] }
 0x12f   : > { %7093 = vmatprep.mubr.bf16.mxu1 %v9930_v15  ;;  %v9931_v15 = vcombine.low %v8675_v27, %v8677_v9  ;;  %v4663_v19 = vsel %vm8042_vm3, %v4658_v35, %v8963_v39  ;;  %v4702_v39 = vshll.u32 %v4608_v45, 16  ;;  %v7793_v35 = vld [vmem:[#allocation2 + $0x6c] sm:$0xff]   ;;  %v7888_v33 = vld [vmem:[#allocation2 + $0x94] sm:$0xf] }
 0x130   : > { %7348 = vmatpush3.bf16.msra.mxu0 %v7792_v31  ;;  %v9006_v26 = vsel %vm8453_vm14, %v6308_v18, %v2213_v5  ;;  %v4690_v50 = vrot.slane %v4688_v43, 4  ;;  %v4694_v31 = vshll.u32 %v4607_v41, 16  ;;  %v9932_v18 = vcombine.low %v8704_v28, %v8713_v54  ;;  %v7885_v43 = vld [vmem:[#allocation2 + $0x80] sm:$0x1]  ;;  %v7886_v54 = vld [vmem:[#allocation2 + $0x88] sm:$0xf] }
 0x131   : > { %7349 = vmatprep.subr.bf16.mxu0 %v7796_v25  ;;  %v2223_v51 = vrot.slane %v7885_v43, 5  ;;  %v4612_v41 = vld [vmem:[#allocation2 + $0x40] sm:$0xf]  ;;  %v4723_v28 = vshrl.u32 %v4611_v48, 16  ;;  %v4726_v43 = vshll.u32 %v4611_v48, 16 }
 0x132   : > { %v4691_v55 = vor.u32 %v4690_v50, %v9012_v57  ;;  %v9043_v11 = vrot.slane %v4694_v31, 5  ;;  %v4712_v50 = vshrl.u32 %v4609_v52, 16  ;;  %v4610_v31 = vld [vmem:[#allocation2 + $0x38] sm:$0x1]  ;;  %v4732_v9 = vshll.u32 %v4612_v41, 16 }
 0x133   : > { %7318 = vmatmul.mubr.bf16.gmra.mrb[8].mxu0 %v7787_v34  ;;  %v4673_v34 = vsel %vm8042_vm3, %v4668_v21, %v4672_v58  ;;  %v4736_v27 = vshrl.u32 %v4612_v41, 16  ;;  %v7808_v21 = vld [vmem:[%s9897_s3 + $0x1f8] sm:$0xff]   ;;  %v7887_v41 = vld [vmem:[#allocation2 + $0x8c] sm:$0x1]  ;;  %v4617_v5 = vld [vmem:[#allocation2 + $0x54] sm:$0xf] }
 0x134   : > { %7321 = vmatprep.mubr.bf16.mxu0 %v7791_v46  ;;  %7350 = vmatpush3.bf16.msra.mxu0 %v7796_v25  ;;  %v4681_v25 = vor.u32 %v4680_v47, %v4677_v42  ;;  %v2222_v46 = vrot.slane %v2220_v2, 4  ;;  %v2227_v42 = vrot.slane %v7886_v54, 5  ;;  %v4708_v47 = vshll.u32 %v4609_v52, 16 }
 0x135   : > { %7351 = vmatprep.subr.bf16.mxu0 %v7800_v56  ;;  %v9051_v58 = vcombine.low %v4663_v19, %v4673_v34  ;;  %v9059_v54 = vsel %vm8453_vm14, %v6309_v0, %v2220_v2  ;;  %v9933_v52 = vcombine.low %v8737_v37, %v8745_v61  ;;  %v2230_v19 = vrot.slane %v7887_v41, 5 }
 0x136   : > { %7094 = vmatmul.mubr.bf16.gmra.mrb[24].mxu1 %v9931_v15  ;;  %v4699_v15 = vshrl.u32 %v4608_v45, 16  ;;  %v9053_v45 = vrot.slane %v4681_v25, 4  ;;  %v9066_v48 = vsel %vm8453_vm14, %v2222_v46, %v2223_v51  ;;  %v4704_v25 = vrot.slane %v4702_v39, 5  ;;  %v9080_v39 = vld [vmem:[%s9897_s3 + $0x200] sm:$0xff]  }
 0x137   : > { %7097 = vmatprep.mubr.bf16.mxu1 %v9932_v18  ;;  %v6310_v18 = vrot.slane %v9040_v60, 9  ;;  %v9055_v60 = vrot.slane %v4691_v55, 4  ;;  %v9935_v2 = vcombine.low %v8874_v29, %v8882_v3  ;;  %v2229_v0 = vrot.slane %v2227_v42, 4  ;;  %9936 = vst [vmem:[#allocation6_spill] sm:$0xff] %v9080_v39 }
 0x138   : > { %7352 = vmatpush3.bf16.msra.mxu0 %v7800_v56  ;;  %v4614_v56 = vld [vmem:[#allocation2 + $0x48] sm:$0xf]  ;;  %v4701_v34 = vrot.slane %v4699_v15, 4  ;;  %v9073_v55 = vrot.slane %v4708_v47, 5  ;;  %v4714_v37 = vrot.slane %v4712_v50, 4  ;;  %v4718_v61 = vshll.u32 %v4610_v31, 16 }
 0x139   : > { %7353 = vmatprep.subr.bf16.mxu0 %v7804_v22  ;;  %v4725_v51 = vrot.slane %v4723_v28, 4  ;;  %v4728_v46 = vrot.slane %v4726_v43, 5  ;;  %v9075_v41 = vrot.slane %v4732_v9, 5  ;;  %v4738_v15 = vrot.slane %v4736_v27, 4 }
 0x13a   : > { %v4747_v29 = vshrl.u32 %v4614_v56, 16  ;;  %v4750_v3 = vshll.u32 %v4614_v56, 16  ;;  %v4760_v47 = vshrl.u32 %v9068_v7, 16  ;;  %v9090_v27 = vsel %vm8453_vm14, %v6310_v18, %v2227_v42  ;;  %v7798_v18 = vld [vmem:[%s9897_s3 + $0xc8] sm:$0xff]   ;;  %v7799_v42 = vld [vmem:[#allocation2 + $0x90] sm:$0xff]  }
 0x13b   : > { %7322 = vmatmul.mubr.bf16.gmra.mrb[12].mxu0 %v7793_v35  ;;  %v4756_v35 = vshll.u32 %v9068_v7, 16  ;;  %v4705_v9 = vor.u32 %v4704_v25, %v4701_v34  ;;  %v9100_v43 = vsel %vm8453_vm14, %v2229_v0, %v2230_v19  ;;  %v4715_v56 = vor.u32 %v4714_v37, %v9073_v55  ;;  %v9110_v19 = vld [vmem:[#allocation2 + $0x50] sm:$0x1]  ;;  %v9121_v7 = vld [vmem:[#allocation2 + $0x58] sm:$0xf] }
 0x13c   : > { %7325 = vmatprep.mubr.bf16.mxu0 %v7795_v44  ;;  %7354 = vmatpush3.bf16.msra.mxu0 %v7804_v22  ;;  %v7797_v44 = vld [vmem:[#allocation2 + $0x84] sm:$0xff]   ;;  %v9106_v34 = vrot.slane %v4718_v61, 5  ;;  %v4729_v25 = vor.u32 %v4728_v46, %v4725_v51  ;;  %v2234_v31 = vrot.slane %v7888_v33, 5  ;;  %v4749_v0 = vrot.slane %v4747_v29, 4  ;;  %v7889_v33 = vld [vmem:[#allocation2 + $0x98] sm:$0x1] }
 0x13d   : > { %7355 = vmatprep.subr.bf16.mxu0 %v7808_v21  ;;  %v4752_v37 = vrot.slane %v4750_v3, 5  ;;  %v9112_v22 = vrot.slane %v4756_v35, 5  ;;  %v4762_v50 = vrot.slane %v4760_v47, 4  ;;  %v9117_v61 = vrot.slane %v4705_v9, 4  ;;  %v2110_v3 = vld [vmem:[#allocation2 + $0x9c] sm:$0xe] }
 0x13e   : > { %7098 = vmatmul.mubr.bf16.gmra.mrb[28].mxu1 %v9933_v52  ;;  %v4613_v52 = vld [vmem:[#allocation2 + $0x44] sm:$0x1]  ;;  %v4716_v29 = vrot.slane %v4715_v56, 4  ;;  %v7890_v35 = vld [vmem:[#allocation2 + $0xa0] sm:$0xf]  ;;  %v4774_v53 = vshll.u32 %v4617_v5, 16 }
 0x13f   : > { %7117 = vmatprep.mubr.bf16.mxu1 %v9935_v2  ;;  %v4742_v28 = vshll.u32 %v4613_v52, 16  ;;  %v2109_v2 = vld [vmem:[#allocation2 + $0x90] sm:$0xe]  ;;  %v4739_v52 = vor.u32 %v4738_v15, %v9075_v41  ;;  %v2237_v15 = vrot.slane %v7889_v33, 5  ;;  %v2241_v47 = vrot.slane %v7890_v35, 5 }
 0x140   : > { %7356 = vmatpush3.bf16.msra.mxu0 %v7808_v21  ;;  %v9937_v21 = vcombine.low %v8878_v1, %v8886_v14  ;;  %v6311_v46 = vrot.slane %v2109_v2, 9  ;;  %v9938_v1 = vcombine.low %v8890_v12, %v8894_v13  ;;  %v7802_v14 = vld [vmem:[%s9897_s3 + $0xd0] sm:$0xff]   ;;  %v4730_v9 = vrot.slane %v4729_v25, 4 }
 0x141   : > { %7389 = vmatprep.subr.bf16.mxu0 %v9080_v39  ;;  %v9119_v51 = vrot.slane %v4742_v28, 5  ;;  %v4771_v39 = vshrl.u32 %v4617_v5, 16  ;;  %v4740_v28 = vrot.slane %v4739_v52, 4  ;;  %v2236_v2 = vrot.slane %v2234_v31, 4  ;;  %v7891_v52 = vld [vmem:[#allocation2 + $0xa4] sm:$0x1] }
 0x142   : > { %v4763_v56 = vor.u32 %v4762_v50, %v9112_v22  ;;  %v4780_v5 = vshll.u32 %v9121_v7, 16  ;;  %v4711_v12 = vsel %vm8042_vm3, %v9117_v61, %v9073_v55  ;;  %v9140_v13 = vsel %vm8453_vm14, %v6311_v46, %v2234_v31  ;;  %v7803_v55 = vld [vmem:[#allocation2 + $0xa8] sm:$0xff]  }
 0x143   : > { %7326 = vmatmul.mubr.bf16.gmra.mrb[16].mxu0 %v7797_v44  ;;  %v4753_v44 = vor.u32 %v4752_v37, %v4749_v0  ;;  %v6312_v25 = vrot.slane %v2110_v3, 9  ;;  %v2244_v33 = vrot.slane %v7891_v52, 5  ;;  %v4721_v50 = vsel %vm8042_vm3, %v4716_v29, %v9106_v34  ;;  %v9145_v37 = vld [vmem:[#allocation2 + $0x5c] sm:$0x1]  ;;  %v2111_v46 = vld [vmem:[#allocation2 + $0xa8] sm:$0xe] }
 0x144   : > { %7329 = vmatprep.mubr.bf16.mxu0 %v7799_v42  ;;  %v7801_v42 = vld [vmem:[#allocation2 + $0x9c] sm:$0xff]   ;;  %v2243_v0 = vrot.slane %v2241_v47, 4  ;;  %v4773_v35 = vrot.slane %v4771_v39, 4  ;;  %v4735_v31 = vsel %vm8042_vm3, %v4730_v9, %v9075_v41  ;;  %v9155_v61 = vsel %vm8453_vm14, %v2236_v2, %v2237_v15 }
 0x145   : > { %v4754_v39 = vrot.slane %v4753_v44, 4  ;;  %v4764_v29 = vrot.slane %v4763_v56, 4  ;;  %v9160_v3 = vrot.slane %v4780_v5, 5  ;;  %v9939_v41 = vcombine.low %v8912_v16, %v8916_v8  ;;  %v4620_v44 = vld [vmem:[#allocation2 + $0x60] sm:$0xf] }
 0x146   : > { %7118 = vmatmul.mubr.bf16.vlgmr.msra.gmra.mrb[0].mxu1 %v9937_v21  ;;  %v4784_v21 = vshrl.u32 %v9121_v7, 16  ;;  %v9941_v15 = vsel %vm8042_vm3, %v9053_v45, %v9012_v57  ;;  %v9181_v2 = vsel %vm8453_vm14, %v6312_v25, %v2241_v47  ;;  %v4790_v16 = vshll.u32 %v9145_v37, 16  ;;  %v7810_v25 = vld [vmem:[%s9897_s3 + $0xe0] sm:$0xff]  }
 0x147   : > { %7150 = vmatpush3.bf16.msra.mxu1 %v8860_v62  ;;  %7121 = vmatprep.mubr.bf16.mxu1 %v9938_v1  ;;  %v4766_v62 = vshll.u32 %v9110_v19, 16  ;;  %v4776_v1 = vrot.slane %v4774_v53, 5  ;;  %v7806_v53 = vld [vmem:[%s9897_s3 + $0xd8] sm:$0xff]   ;;  %9942 = vst [vmem:[#allocation7_spill] sm:$0xff] %v9181_v2  ;;  %v9943_v8 = vcombine.low %v8936_v40, %v8957_v4  ;;  %v6313_v45 = vrot.slane %v2111_v46, 9 }
 0x148   : > { %7151 = vmatprep.subr.bf16.mxu1 %v7798_v18  ;;  %v4786_v52 = vrot.slane %v4784_v21, 4  ;;  %v9945_v56 = vshll.u32 %v8729_v36, 16  ;;  %v9195_v5 = vcombine.low %v4711_v12, %v4721_v50  ;;  %v2112_v4 = vld [vmem:[#allocation2 + $0xb4] sm:$0xe]  ;;  %v4759_v36 = vsel %vm8042_vm3, %v4754_v39, %v9112_v22  ;;  %v9210_v50 = vld [vmem:[#allocation2 + $0x64] sm:$0xf] }
 0x149   : > { %v4768_v34 = vrot.slane %v4766_v62, 5  ;;  %v4777_v57 = vor.u32 %v4776_v1, %v4773_v35  ;;  %9947 = vst [vmem:[#allocation10_spill] sm:$0xff] %v9210_v50  ;;  %v9216_v1 = vrot.slane %v4790_v16, 5  ;;  %v7805_v22 = vld [vmem:[#allocation2 + $0xb4] sm:$0xff]   ;;  %v9236_v35 = vld [vmem:[#allocation2 + $0x7c] sm:$0xf] }
 0x14a   : > { %v9193_v47 = vrot.slane %v9945_v56, 5  ;;  %v4787_v12 = vor.u32 %v4786_v52, %v9160_v3  ;;  %v7894_v52 = vld [vmem:[#allocation2 + $0xb0] sm:$0x1]  ;;  %9950 = vst [vmem:[#allocation13_spill] sm:$0xff] %v9236_v35  ;;  %v9288_v2 = vld [vmem:[#allocation2 + $0x94] sm:$0xf] }
 0x14b   : > { %7152 = vmatpush3.bf16.msra.mxu1 %v7798_v18  ;;  %v4745_v18 = vsel %vm8042_vm3, %v4740_v28, %v9119_v51  ;;  %v9940_v51 = vsel %vm8042_vm3, %v9055_v60, %v9043_v11  ;;  %7330 = vmatmul.mubr.bf16.gmra.mrb[20].mxu0 %v7801_v42  ;;  %v9189_v11 = vsel %vm8453_vm14, %v2243_v0, %v2244_v33  ;;  %v7892_v60 = vld [vmem:[#allocation2 + $0xac] sm:$0xf]  ;;  %v7893_v33 = vld [vmem:[#allocation2 + $0xb8] sm:$0xf]  ;;  %v9212_v0 = vld [vmem:[#allocation2 + $0x68] sm:$0x1] }
 0x14c   : > { %7153 = vmatprep.subr.bf16.mxu1 %v7802_v14  ;;  %v9175_v9 = vcombine.low %v9941_v15, %v9940_v51  ;;  %9944 = vst [vmem:[#allocation8_spill] sm:$0xff] %v9189_v11  ;;  %v2248_v62 = vrot.slane %v7892_v60, 5  ;;  %9946 = vst [vmem:[#allocation9_spill] sm:$0xff] %v9193_v47  ;;  %7333 = vmatprep.mubr.bf16.mxu0 %v7803_v55  ;;  %v9197_v21 = vcombine.low %v4735_v31, %v4745_v18  ;;  %v4623_v18 = vld [vmem:[#allocation2 + $0x6c] sm:$0xf]  ;;  %v7807_v15 = vld [vmem:[#allocation2 + $0xc0] sm:$0xff]  }
 0x14d   : > { %v2255_v42 = vrot.slane %v7893_v33, 5  ;;  %9948 = vst [vmem:[#allocation11_spill] sm:$0xff] %v9212_v0  ;;  %v4795_v55 = vshrl.u32 %v4620_v44, 16  ;;  %v4798_v31 = vshll.u32 %v4620_v44, 16  ;;  %v9221_v46 = vrot.slane %v4777_v57, 4  ;;  %9954 = vst [vmem:[#allocation15_spill] sm:$0xff] %v9288_v2 }
 0x14e   : > { %7122 = vmatmul.mubr.bf16.gmra.mrb[4].mxu1 %v9939_v41  ;;  %v9225_v39 = vsel %vm8453_vm14, %v6313_v45, %v2248_v62  ;;  %v2251_v41 = vrot.slane %v7894_v52, 5  ;;  %v9227_v51 = vld [vmem:[#allocation2 + $0x70] sm:$0xf]  ;;  %v4804_v60 = vshll.u32 %v9210_v50, 16  ;;  %v4808_v44 = vshrl.u32 %v9210_v50, 16 }
 0x14f   : > { %7125 = vmatprep.mubr.bf16.mxu1 %v9943_v8  ;;  %7154 = vmatpush3.bf16.msra.mxu1 %v7802_v14  ;;  %v4769_v14 = vsel %vm8042_vm3, %v4764_v29, %v4768_v34  ;;  %v7812_v34 = vld [vmem:[%s9897_s3 + $0xe8] sm:$0xff]   ;;  %v2250_v29 = vrot.slane %v2248_v62, 4  ;;  %9949 = vst [vmem:[#allocation12_spill] sm:$0xff] %v9227_v51  ;;  %v6314_v8 = vrot.slane %v2112_v4, 9  ;;  %v4626_v57 = vld [vmem:[#allocation2 + $0x78] sm:$0xf] }
 0x150   : > { %7155 = vmatprep.subr.bf16.mxu1 %v7806_v53  ;;  %v9229_v16 = vcombine.low %v4759_v36, %v4769_v14  ;;  %v9233_v56 = vrot.slane %v4787_v12, 4  ;;  %v2257_v45 = vrot.slane %v2255_v42, 4  ;;  %v7895_v33 = vld [vmem:[#allocation2 + $0xbc] sm:$0x1]  ;;  %v4814_v52 = vshll.u32 %v9212_v0, 16 }
 0x151   : > { %v2258_v62 = vrot.slane %v7895_v33, 5  ;;  %v9241_v4 = vrot.slane %v4795_v55, 4  ;;  %v9243_v36 = vrot.slane %v4798_v31, 5  ;;  %v4819_v14 = vshrl.u32 %v4623_v18, 16 }
 0x152   : > { %v4822_v40 = vshll.u32 %v4623_v18, 16  ;;  %v9952_v12 = vcombine.low %v8974_v6, %v8982_v23  ;;  %v4828_v33 = vshll.u32 %v9227_v51, 16  ;;  %v4832_v28 = vshrl.u32 %v9227_v51, 16  ;;  %v7814_v6 = vld [vmem:[%s9897_s3 + $0xf0] sm:$0xff]   ;;  %v4635_v51 = vld [vmem:[#allocation2 + $0x9c] sm:$0xf] }
 0x153   : > { %7156 = vmatpush3.bf16.msra.mxu1 %v7806_v53  ;;  %v9951_v53 = vcombine.low %v8961_v20, %v8978_v63  ;;  %7334 = vmatmul.mubr.bf16.gmra.mrb[24].mxu0 %v7805_v22  ;;  %v4843_v47 = vshrl.u32 %v4626_v57, 16  ;;  %v4846_v11 = vshll.u32 %v4626_v57, 16  ;;  %v9250_v20 = vrot.slane %v4804_v60, 5  ;;  %v9275_v60 = vld [vmem:[#allocation2 + $0x88] sm:$0xf] }
 0x154   : > { %7157 = vmatprep.subr.bf16.mxu1 %v7810_v25  ;;  %7337 = vmatprep.mubr.bf16.mxu0 %v7807_v15  ;;  %v9252_v63 = vrot.slane %v4808_v44, 4  ;;  %v4852_v55 = vshll.u32 %v9236_v35, 16  ;;  %v4856_v31 = vshrl.u32 %v9236_v35, 16  ;;  %v9269_v18 = vsel %vm8453_vm14, %v2250_v29, %v2251_v41  ;;  %v4629_v15 = vld [vmem:[#allocation2 + $0x84] sm:$0xf]  ;;  %9953 = vst [vmem:[#allocation14_spill] sm:$0xff] %v9275_v60 }
 0x155   : > { %v9273_v22 = vsel %vm8453_vm14, %v6314_v8, %v2255_v42  ;;  %v7809_v44 = vld [vmem:[#allocation2 + $0xcc] sm:$0xff]   ;;  %v9279_v57 = vsel %vm8453_vm14, %v2257_v45, %v2258_v62  ;;  %v4824_v23 = vrot.slane %v4822_v40, 5  ;;  %v7816_v29 = vld [vmem:[%s9897_s3 + $0xf8] sm:$0xff]   ;;  %v9286_v41 = vrot.slane %v4828_v33, 5  ;;  %v9294_v40 = vld [vmem:[#allocation2 + $0x74] sm:$0x1] }
 0x156   : > { %7126 = vmatmul.mubr.bf16.gmra.mrb[8].mxu1 %v9951_v53  ;;  %v9281_v53 = vrot.slane %v4814_v52, 5  ;;  %v4834_v42 = vrot.slane %v4832_v28, 4  ;;  %v4845_v8 = vrot.slane %v4843_v47, 4  ;;  %v4848_v35 = vrot.slane %v4846_v11, 5  ;;  %v9296_v52 = vld [vmem:[#allocation2 + $0x80] sm:$0x1] }
 0x157   : > { %7129 = vmatprep.mubr.bf16.mxu1 %v9952_v12  ;;  %7158 = vmatpush3.bf16.msra.mxu1 %v7810_v25  ;;  %v4821_v12 = vrot.slane %v4819_v14, 4  ;;  %v4632_v25 = vld [vmem:[#allocation2 + $0x90] sm:$0xf]  ;;  %v4801_v45 = vor.u32 %v9243_v36, %v9241_v4  ;;  %v4811_v62 = vor.u32 %v9252_v63, %v9250_v20  ;;  %9955 = vst [vmem:[#allocation16_spill] sm:$0xff] %v9296_v52  ;;  %v9298_v14 = vrot.slane %v4852_v55, 5 }
 0x158   : > { %7159 = vmatprep.subr.bf16.mxu1 %v7812_v34  ;;  %v4858_v33 = vrot.slane %v4856_v31, 4  ;;  %v4867_v28 = vshrl.u32 %v4629_v15, 16  ;;  %v4870_v47 = vshll.u32 %v4629_v15, 16  ;;  %v4876_v11 = vshll.u32 %v9275_v60, 16 }
 0x159   : > { %v9956_v4 = vcombine.low %v8987_v59, %v8991_v49  ;;  %v4891_v36 = vshrl.u32 %v4632_v25, 16  ;;  %v4894_v63 = vshll.u32 %v4632_v25, 16  ;;  %v4900_v0 = vshll.u32 %v9288_v2, 16 }
 0x15a   : > { %v4904_v55 = vshrl.u32 %v9288_v2, 16  ;;  %v9957_v31 = vcombine.low %v8995_v38, %v8999_v30  ;;  %v4825_v15 = vor.u32 %v4824_v23, %v4821_v12  ;;  %v4835_v50 = vor.u32 %v4834_v42, %v9286_v41  ;;  %v9317_v23 = vld [vmem:[#allocation2 + $0x8c] sm:$0x1] }
 0x15b   : > { %7160 = vmatpush3.bf16.msra.mxu1 %v7812_v34  ;;  %v4880_v34 = vshrl.u32 %v9275_v60, 16  ;;  %7338 = vmatmul.mubr.bf16.gmra.mrb[28].mxu0 %v7809_v44  ;;  %v4838_v60 = vshll.u32 %v9294_v40, 16  ;;  %v4849_v10 = vor.u32 %v4848_v35, %v4845_v8  ;;  %v4859_v59 = vor.u32 %v4858_v33, %v9298_v14 }
 0x15c   : > { %7161 = vmatprep.subr.bf16.mxu1 %v7814_v6  ;;  %7357 = vmatprep.mubr.bf16.mxu0 %v9051_v58  ;;  %v4862_v49 = vshll.u32 %v9296_v52, 16  ;;  %v4915_v25 = vshrl.u32 %v4635_v51, 16  ;;  %v4869_v44 = vrot.slane %v4867_v28, 4  ;;  %v4872_v2 = vrot.slane %v4870_v47, 5  ;;  %v9321_v52 = vld [vmem:[#allocation2 + $0x98] sm:$0x1] }
 0x15d   : > { %v9315_v38 = vrot.slane %v4876_v11, 5  ;;  %v4882_v30 = vrot.slane %v4880_v34, 4  ;;  %v4893_v12 = vrot.slane %v4891_v36, 4  ;;  %v4896_v42 = vrot.slane %v4894_v63, 5  ;;  %v9323_v47 = vld [vmem:[#allocation2 + $0xa0] sm:$0xf] }
 0x15e   : > { %7130 = vmatmul.mubr.bf16.gmra.mrb[12].mxu1 %v9956_v4  ;;  %v4918_v4 = vshll.u32 %v4635_v51, 16  ;;  %v9319_v35 = vrot.slane %v4900_v0, 5  ;;  %v4906_v58 = vrot.slane %v4904_v55, 4  ;;  %v4812_v8 = vrot.slane %v4811_v62, 4  ;;  %v7813_v36 = vld [vmem:[%s9897_s3 + $0x208] sm:$0xff]   ;;  %v9331_v0 = vld [vmem:[%s9897_s3 + $0x100] sm:$0xff]  }
 0x15f   : > { %7133 = vmatprep.mubr.bf16.mxu1 %v9957_v31  ;;  %7162 = vmatpush3.bf16.msra.mxu1 %v7814_v6  ;;  %v4802_v6 = vrot.slane %v4801_v45, 4  ;;  %v4826_v33 = vrot.slane %v4825_v15, 4  ;;  %v4840_v31 = vrot.slane %v4838_v60, 5  ;;  %v4836_v51 = vrot.slane %v4835_v50, 4 }
 0x160   : > { %7163 = vmatprep.subr.bf16.mxu1 %v7816_v29  ;;  %v4850_v28 = vrot.slane %v4849_v10, 4  ;;  %v4917_v11 = vrot.slane %v4915_v25, 4  ;;  %v4920_v34 = vrot.slane %v4918_v4, 5  ;;  %v4860_v60 = vrot.slane %v4859_v59, 4  ;;  %v9960_v25 = vld [vmem:[#allocation4_spill] sm:$0xff] }
 0x161   : > { %v4864_v45 = vrot.slane %v4862_v49, 5  ;;  %v4886_v10 = vshll.u32 %v9317_v23, 16  ;;  %v9958_v50 = vcombine.low %v9006_v26, %v9010_v24  ;;  %v4883_v62 = vor.u32 %v4882_v30, %v9315_v38 }
 0x162   : > { %v4897_v63 = vor.u32 %v4896_v42, %v4893_v12  ;;  %v4907_v55 = vor.u32 %v4906_v58, %v9319_v35  ;;  %v4910_v15 = vshll.u32 %v9321_v52, 16  ;;  %v9959_v59 = vcombine.low %v9059_v54, %v9066_v48  ;;  %v4638_v42 = vld [vmem:[#allocation2 + $0xa8] sm:$0xf] }
 0x163   : > { %7164 = vmatpush3.bf16.msra.mxu1 %v7816_v29  ;;  %v4873_v29 = vor.u32 %v4872_v2, %v4869_v44  ;;  %7358 = vmatmul.mubr.bf16.vlgmr.msra.gmra.mrb[0].mxu0 %v9175_v9  ;;  %v4807_v2 = vsel %vm8042_vm3, %v4802_v6, %v9250_v20  ;;  %v4817_v26 = vsel %vm8042_vm3, %v4812_v8, %v9281_v53  ;;  %v4924_v24 = vshll.u32 %v9323_v47, 16  ;;  %v9962_v44 = vld [vmem:[#allocation6_spill] sm:$0xff]  ;;  %v9365_v20 = vld [vmem:[#allocation2 + $0xa4] sm:$0x1] }
 0x164   : > { %7437 = vmatprep.subr.bf16.mxu1 %v9331_v0  ;;  %v4928_v49 = vshrl.u32 %v9323_v47, 16  ;;  %v9961_v4 = vor.u32 %v8849_v17, %v9960_v25  ;;  %7390 = vmatpush3.bf16.msra.mxu0 %v9962_v44  ;;  %v4831_v54 = vsel %vm8042_vm3, %v4826_v33, %v9286_v41  ;;  %v4841_v48 = vsel %vm8042_vm3, %v4836_v51, %v4840_v31  ;;  %v7815_v17 = vld [vmem:[%s9897_s3 + $0x210] sm:$0xff]  }
 0x165   : > { %7361 = vmatprep.mubr.bf16.mxu0 %v9195_v5  ;;  %v4921_v53 = vor.u32 %v4920_v34, %v4917_v11  ;;  %7391 = vmatprep.subr.bf16.mxu0 %v7813_v36  ;;  %v4855_v30 = vsel %vm8042_vm3, %v4850_v28, %v9298_v14  ;;  %v4865_v5 = vsel %vm8042_vm3, %v4860_v60, %v4864_v45  ;;  %v9375_v12 = vrot.slane %v4873_v29, 4  ;;  %v9392_v11 = vld [vmem:[#allocation2 + $0xac] sm:$0xf] }
 0x166   : > { %7134 = vmatmul.mubr.bf16.gmra.mrb[16].mxu1 %v9958_v50  ;;  %v9356_v9 = vrot.slane %v9961_v4, 4  ;;  %v9377_v41 = vrot.slane %v4886_v10, 5  ;;  %v9379_v58 = vrot.slane %v4883_v62, 4  ;;  %v9381_v6 = vrot.slane %v4897_v63, 4  ;;  %v5359_v62 = vld [vmem:[#allocation2 + $0x48] sm:$0xe] }
 0x167   : > { %7137 = vmatprep.mubr.bf16.mxu1 %v9959_v59  ;;  %v9383_v8 = vrot.slane %v4907_v55, 4  ;;  %v9385_v33 = vrot.slane %v4910_v15, 5  ;;  %v6329_v31 = vcombine.low %v9225_v39, %v9269_v18  ;;  %v9389_v14 = vrot.slane %v4924_v24, 5  ;;  %v9969_v59 = vld [vmem:[#allocation10_spill] sm:$0xff] }
 0x168   : > { %v4930_v51 = vrot.slane %v4928_v49, 4  ;;  %v4934_v28 = vshll.u32 %v9365_v20, 16  ;;  %7392 = vmatpush3.bf16.msra.mxu0 %v7813_v36  ;;  %v9963_v34 = vsel %vm8042_vm3, %v9233_v56, %v9216_v1  ;;  %v9964_v60 = vsel %vm8042_vm3, %v9221_v46, %v9160_v3  ;;  %v7817_v1 = vld [vmem:[%s9897_s3 + $0x218] sm:$0xff]   ;;  %v9979_v36 = vld [vmem:[#allocation14_spill] sm:$0xff] }
 0x169   : > { %v9404_v45 = vcombine.low %v9964_v60, %v9963_v34  ;;  %v9406_v29 = vrot.slane %v4921_v53, 4  ;;  %v4939_v10 = vshrl.u32 %v4638_v42, 16  ;;  %v4942_v50 = vshll.u32 %v4638_v42, 16  ;;  %7393 = vmatprep.subr.bf16.mxu0 %v7815_v17  ;;  %v7820_v53 = vld [vmem:[%s9897_s3 + $0x220] sm:$0xff]   ;;  %v9967_v42 = vld [vmem:[#allocation5_spill] sm:$0xff] }
 0x16a   : > { %v9410_v63 = vcombine.low %v4807_v2, %v4817_v26  ;;  %v9415_v56 = vcombine.low %v4831_v54, %v4841_v48  ;;  %v9417_v3 = vcombine.low %v4855_v30, %v4865_v5  ;;  %v9965_v46 = vcombine.low %v9090_v27, %v9100_v43  ;;  %v9438_v43 = vld [vmem:[#allocation2 + $0xb0] sm:$0x1]  ;;  %v9440_v2 = vld [vmem:[#allocation2 + $0xb4] sm:$0xf]  ;;  %v5361_v48 = vld [vmem:[#allocation2 + $0x60] sm:$0xe] }
 0x16b   : > { %v5360_v26 = vld [vmem:[#allocation2 + $0x54] sm:$0xe]  ;;  %7362 = vmatmul.mubr.bf16.gmra.mrb[4].mxu0 %v9197_v21  ;;  %v9966_v24 = vcombine.low %v9140_v13, %v9155_v61  ;;  %v4931_v49 = vor.u32 %v4930_v51, %v9389_v14  ;;  %v9447_v4 = vrot.slane %v4934_v28, 5  ;;  %v4948_v44 = vshll.u32 %v9392_v11, 16  ;;  %v5362_v28 = vld [vmem:[#allocation2 + $0x6c] sm:$0xe] }
 0x16c   : > { %v6479_v54 = vrot.slane %v5359_v62, 9  ;;  %7365 = vmatprep.mubr.bf16.mxu0 %v9229_v16  ;;  %7394 = vmatpush3.bf16.msra.mxu0 %v7815_v17  ;;  %v4941_v61 = vrot.slane %v4939_v10, 4  ;;  %v4944_v21 = vrot.slane %v4942_v50, 5  ;;  %v4952_v30 = vshrl.u32 %v9392_v11, 16  ;;  %v9970_v27 = vld [vmem:[#allocation11_spill] sm:$0xff] }
 0x16d   : > { %7395 = vmatprep.subr.bf16.mxu0 %v7817_v1  ;;  %v4958_v5 = vshll.u32 %v9438_v43, 16  ;;  %v5449_v51 = vrot.slane %v9967_v42, 5  ;;  %v5452_v16 = vrot.slane %v9110_v19, 5  ;;  %v6480_v17 = vrot.slane %v5360_v26, 9  ;;  %v7914_v50 = vld [vmem:[#allocation2 + $0x88] sm:$0xf] }
 0x16e   : > { %7138 = vmatmul.mubr.bf16.gmra.mrb[20].mxu1 %v9965_v46  ;;  %v4963_v34 = vshrl.u32 %v9440_v2, 16  ;;  %v5456_v60 = vrot.slane %v9121_v7, 5  ;;  %v5459_v62 = vrot.slane %v9145_v37, 5  ;;  %v6481_v46 = vrot.slane %v5361_v48, 9  ;;  %v7823_v37 = vld [vmem:[%s9897_s3 + $0x228] sm:$0xff]  }
 0x16f   : > { %7141 = vmatprep.mubr.bf16.mxu1 %v9966_v24  ;;  %v9465_v10 = vrot.slane %v4931_v49, 4  ;;  %v9469_v24 = vsel %vm8453_vm14, %v6479_v54, %v5449_v51  ;;  %v5451_v13 = vrot.slane %v5449_v51, 4  ;;  %v5463_v42 = vrot.slane %v9969_v59, 5  ;;  %v9971_v54 = vld [vmem:[#allocation12_spill] sm:$0xff]  ;;  %v9972_v51 = vld [vmem:[#allocation7_spill] sm:$0xff] }
 0x170   : > { %7396 = vmatpush3.bf16.msra.mxu0 %v7817_v1  ;;  %v9474_v19 = vsel %vm8453_vm14, %v6480_v17, %v5456_v60  ;;  %v5458_v26 = vrot.slane %v5456_v60, 4  ;;  %v5466_v7 = vrot.slane %v9970_v27, 5  ;;  %v6482_v55 = vrot.slane %v5362_v28, 9  ;;  %v9973_v17 = vld [vmem:[#allocation8_spill] sm:$0xff] }
 0x171   : > { %7397 = vmatprep.subr.bf16.mxu0 %v7820_v53  ;;  %v9482_v49 = vsel %vm8453_vm14, %v5451_v13, %v5452_v16  ;;  %v9486_v1 = vsel %vm8453_vm14, %v6481_v46, %v5463_v42  ;;  %v5465_v59 = vrot.slane %v5463_v42, 4  ;;  %v5470_v48 = vrot.slane %v9971_v54, 5  ;;  %v2993_v16 = vld [vmem:[#allocation2 + $0x78] sm:$0xf]  ;;  %v7818_v54 = vld [vmem:[#allocation2 + $0xc] sm:$0xff]  }
 0x172   : > { %v9974_v27 = vcombine.low %v9972_v51, %v9973_v17  ;;  %v4945_v28 = vor.u32 %v4944_v21, %v4941_v61  ;;  %v9496_v15 = vsel %vm8453_vm14, %v5458_v26, %v5459_v62  ;;  %v5473_v13 = vrot.slane %v9294_v40, 5  ;;  %v9503_v46 = vld [vmem:[#allocation2 + $0xb8] sm:$0xf]  ;;  %v4644_v51 = vld [vmem:[#allocation2 + $0xc0] sm:$0xf] }
 0x173   : > { %7366 = vmatmul.mubr.bf16.gmra.mrb[8].mxu0 %v9404_v45  ;;  %v9509_v21 = vsel %vm8453_vm14, %v5465_v59, %v5466_v7  ;;  %v9513_v62 = vsel %vm8453_vm14, %v6482_v55, %v5470_v48  ;;  %v5472_v40 = vrot.slane %v5470_v48, 4  ;;  %v9516_v45 = vrot.slane %v4948_v44, 5  ;;  %v7826_v55 = vld [vmem:[%s9897_s3 + $0x230] sm:$0xff]   ;;  %v5364_v59 = vld [vmem:[#allocation2 + $0x84] sm:$0xe] }
 0x174   : > { %7369 = vmatprep.mubr.bf16.mxu0 %v9410_v63  ;;  %7398 = vmatpush3.bf16.msra.mxu0 %v7820_v53  ;;  %v4954_v39 = vrot.slane %v4952_v30, 4  ;;  %v4966_v18 = vshll.u32 %v9440_v2, 16  ;;  %v9521_v42 = vrot.slane %v4958_v5, 5  ;;  %v9526_v26 = vrot.slane %v4963_v34, 4  ;;  %v5363_v53 = vld [vmem:[#allocation2 + $0x78] sm:$0xe] }
 0x175   : > { %7399 = vmatprep.subr.bf16.mxu0 %v7823_v37  ;;  %v9530_v63 = vsel %vm8453_vm14, %v5472_v40, %v5473_v13  ;;  %v3231_v44 = vshrl.u32 %v2993_v16, 16  ;;  %v4972_v2 = vshll.u32 %v9503_v46, 16  ;;  %v4976_v30 = vshrl.u32 %v9503_v46, 16 }
 0x176   : > { %7142 = vmatmul.mubr.bf16.gmra.mrb[24].mxu1 %v9974_v27  ;;  %9975 = vst [vmem:[#allocation4_spill] sm:$0xff] %v9530_v63  ;;  %v3234_v7 = vshll.u32 %v2993_v16, 16  ;;  %v4937_v34 = vsel %vm8042_vm3, %v9465_v10, %v9447_v4  ;;  %v9540_v48 = vrot.slane %v4945_v28, 4  ;;  %v9976_v27 = vld [vmem:[#allocation9_spill] sm:$0xff]  ;;  %v4955_v40 = vor.u32 %v4954_v39, %v9516_v45  ;;  %v7829_v4 = vld [vmem:[%s9897_s3 + $0x238] sm:$0xff]   ;;  %v9978_v10 = vld [vmem:[#allocation16_spill] sm:$0xff] }
 0x177   : > { %7145 = vmatprep.mubr.bf16.mxu1 %v6329_v31  ;;  %v3233_v17 = vrot.slane %v3231_v44, 4  ;;  %v3253_v13 = vsel %vm8042_vm3, %v9356_v9, %v9976_v27  ;;  %v6483_v5 = vrot.slane %v5363_v53, 9  ;;  %v9977_v31 = vld [vmem:[#allocation13_spill] sm:$0xff]  ;;  %v9548_v60 = vrot.slane %v4966_v18, 5 }
 0x178   : > { %7400 = vmatpush3.bf16.msra.mxu0 %v7823_v37  ;;  %v3236_v16 = vrot.slane %v3234_v7, 5  ;;  %v5477_v61 = vrot.slane %v9977_v31, 5  ;;  %v5480_v28 = vrot.slane %v9978_v10, 5  ;;  %v6484_v44 = vrot.slane %v5364_v59, 9  ;;  %v9558_v37 = vld [vmem:[#allocation2 + $0xc4] sm:$0xf] }
 0x179   : > { %7401 = vmatprep.subr.bf16.mxu0 %v7826_v55  ;;  %v5484_v63 = vrot.slane %v9979_v36, 5  ;;  %v9980_v9 = vcombine.low %v9273_v22, %v9279_v57  ;;  %v4987_v39 = vshrl.u32 %v4644_v51, 16  ;;  %v9565_v7 = vld [vmem:[#allocation2 + $0xbc] sm:$0x1]  ;;  %v4990_v59 = vshll.u32 %v4644_v51, 16 }
 0x17a   : > { %v3237_v31 = vor.u32 %v3236_v16, %v3233_v17  ;;  %v9562_v18 = vsel %vm8453_vm14, %v6483_v5, %v5477_v61  ;;  %v5479_v53 = vrot.slane %v5477_v61, 4  ;;  %v5487_v57 = vrot.slane %v9317_v23, 5 }
 0x17b   : > { %7370 = vmatmul.mubr.bf16.gmra.mrb[12].mxu0 %v9415_v56  ;;  %v9569_v36 = vsel %vm8453_vm14, %v6484_v44, %v5484_v63  ;;  %v5486_v22 = vrot.slane %v5484_v63, 4  ;;  %v9573_v17 = vrot.slane %v4972_v2, 5  ;;  %v4978_v5 = vrot.slane %v4976_v30, 4 }
 0x17c   : > { %7373 = vmatprep.mubr.bf16.mxu0 %v9417_v3  ;;  %7402 = vmatpush3.bf16.msra.mxu0 %v7826_v55  ;;  %v3238_v61 = vrot.slane %v3237_v31, 4  ;;  %v9577_v56 = vsel %vm8453_vm14, %v5479_v53, %v5480_v28  ;;  %v5000_v51 = vshrl.u32 %v9558_v37, 16  ;;  %v7819_v3 = vld [vmem:[#allocation2 + $0x18] sm:$0xff]   ;;  %v4956_v2 = vrot.slane %v4955_v40, 4  ;;  %v9603_v28 = vld [vmem:[#allocation2 + $0xc8] sm:$0x1] }
 0x17d   : > { %7403 = vmatprep.subr.bf16.mxu0 %v7829_v4  ;;  %v6499_v63 = vcombine.low %v9562_v18, %v9577_v56  ;;  %v9585_v23 = vsel %vm8453_vm14, %v5486_v22, %v5487_v57  ;;  %v4982_v55 = vshll.u32 %v9565_v7, 16  ;;  %v9981_v16 = vsel %vm8042_vm3, %v9379_v58, %v9377_v41  ;;  %v3011_v18 = vld [vmem:[#allocation2 + $0xc0] sm:$0xf] }
 0x17e   : > { %7146 = vmatmul.mubr.bf16.gmra.mrb[28].mxu1 %v9980_v9  ;;  %v3243_v30 = vsel %vm8042_vm3, %v3238_v61, %v9960_v25  ;;  %v6500_v27 = vcombine.low %v9569_v36, %v9585_v23  ;;  %v9982_v10 = vsel %vm8042_vm3, %v9375_v12, %v9315_v38  ;;  %v4989_v44 = vrot.slane %v4987_v39, 4  ;;  %v7821_v25 = vld [vmem:[#allocation2 + $0x24] sm:$0xff]   ;;  %v9622_v39 = vld [vmem:[#allocation2 + $0xd0] sm:$0xf]  ;;  %v9986_v61 = vld [vmem:[#allocation15_spill] sm:$0xff] }
 0x17f   : > { %7165 = vmatprep.mubr.bf16.mxu1 %v7818_v54  ;;  %v4996_v54 = vshll.u32 %v9558_v37, 16  ;;  %v6460_v40 = vcombine.low %v9982_v10, %v9981_v16  ;;  %v4992_v9 = vrot.slane %v4990_v59, 5  ;;  %v9605_v31 = vcombine.low %v3243_v30, %v3253_v13  ;;  %v4647_v13 = vld [vmem:[#allocation2 + $0xcc] sm:$0xf]  ;;  %v7822_v30 = vld [vmem:[#allocation2 + $0x30] sm:$0xff]  }
 0x180   : > { %v9983_v53 = vsel %vm8042_vm3, %v9383_v8, %v9385_v33  ;;  %v9984_v41 = vsel %vm8042_vm3, %v9381_v6, %v9319_v35  ;;  %v9985_v38 = vsel %vm8042_vm3, %v9406_v29, %v9389_v14  ;;  %7404 = vmatpush3.bf16.msra.mxu0 %v7829_v4  ;;  %v4969_v59 = vor.u32 %v9548_v60, %v9526_v26  ;;  %v5365_v35 = vld [vmem:[#allocation2 + $0x90] sm:$0xe] }
 0x181   : > { %v6461_v58 = vcombine.low %v9984_v41, %v9983_v53  ;;  %v6462_v12 = vcombine.low %v9985_v38, %v4937_v34  ;;  %v4979_v8 = vor.u32 %v4978_v5, %v9573_v17  ;;  %v9627_v33 = vrot.slane %v4996_v54, 5  ;;  %v5366_v5 = vld [vmem:[#allocation2 + $0x9c] sm:$0xe] }
 0x182   : > { %v5002_v22 = vrot.slane %v5000_v51, 4  ;;  %v4951_v6 = vsel %vm8042_vm3, %v9540_v48, %v9516_v45  ;;  %v4961_v14 = vsel %vm8042_vm3, %v4956_v2, %v9521_v42  ;;  %v9636_v29 = vrot.slane %v4982_v55, 5  ;;  %v7897_v45 = vld [vmem:[%s9897_s3 + $0x108] sm:$0xff]  }
 0x183   : > { %v5006_v60 = vshll.u32 %v9603_v28, 16  ;;  %7374 = vmatmul.mubr.bf16.gmra.mrb[16].mxu0 %v6460_v40  ;;  %v4993_v26 = vor.u32 %v4992_v9, %v4989_v44  ;;  %v5011_v34 = vshrl.u32 %v4647_v13, 16  ;;  %v5014_v4 = vshll.u32 %v4647_v13, 16  ;;  %v7824_v9 = vld [vmem:[#allocation2 + $0x3c] sm:$0xff]  }
 0x184   : > { %v5020_v57 = vshll.u32 %v9622_v39, 16  ;;  %v5024_v42 = vshrl.u32 %v9622_v39, 16  ;;  %v6485_v48 = vrot.slane %v5365_v35, 9  ;;  %v5491_v54 = vrot.slane %v9986_v61, 5  ;;  %7377 = vmatprep.mubr.bf16.mxu0 %v6461_v58  ;;  %v7898_v58 = vld [vmem:[%s9897_s3 + $0x110] sm:$0xff]  }
 0x185   : > { %v6463_v51 = vcombine.low %v4951_v6, %v4961_v14  ;;  %v4980_v2 = vrot.slane %v4979_v8, 4  ;;  %v5003_v55 = vor.u32 %v5002_v22, %v9627_v33  ;;  %v5008_v16 = vrot.slane %v5006_v60, 5  ;;  %v9663_v35 = vld [vmem:[#allocation2 + $0xd4] sm:$0x1] }
 0x186   : > { %7166 = vmatmul.mubr.bf16.vlgmr.msra.gmra.mrb[0].mxu1 %v7819_v3  ;;  %v4970_v3 = vrot.slane %v4969_v59, 4  ;;  %v9650_v10 = vsel %vm8453_vm14, %v6485_v48, %v5491_v54  ;;  %v5493_v40 = vrot.slane %v5491_v54, 4  ;;  %v6486_v44 = vrot.slane %v5366_v5, 9  ;;  %v7900_v48 = vld [vmem:[#allocation2 + $0x1c] sm:$0xf]  ;;  %v7825_v54 = vld [vmem:[#allocation2 + $0x48] sm:$0xff]  }
 0x187   : > { %7445 = vmatpush3.bf16.msra.mxu1 %v9331_v0  ;;  %7169 = vmatprep.mubr.bf16.mxu1 %v7821_v25  ;;  %v5494_v0 = vrot.slane %v9321_v52, 5  ;;  %v4994_v25 = vrot.slane %v4993_v26, 4  ;;  %v5013_v53 = vrot.slane %v5011_v34, 4  ;;  %v5498_v52 = vrot.slane %v9323_v47, 5 }
 0x188   : > { %7438 = vmatprep.subr.bf16.mxu1 %v7897_v45  ;;  %v5501_v41 = vrot.slane %v9365_v20, 5  ;;  %v5016_v38 = vrot.slane %v5014_v4, 5  ;;  %v9657_v13 = vrot.slane %v5020_v57, 5  ;;  %v5026_v59 = vrot.slane %v5024_v42, 4  ;;  %v5355_v57 = vld [vmem:[#allocation2 + $0x18] sm:$0xe] }
 0x189   : > { %v9661_v8 = vsel %vm8453_vm14, %v5493_v40, %v5494_v0  ;;  %v5004_v22 = vrot.slane %v5003_v55, 4  ;;  %v9669_v20 = vsel %vm8453_vm14, %v6486_v44, %v5498_v52  ;;  %v5500_v6 = vrot.slane %v5498_v52, 4  ;;  %v5368_v44 = vld [vmem:[#allocation2 + $0xb4] sm:$0xe] }
 0x18a   : > { %v6501_v47 = vcombine.low %v9650_v10, %v9661_v8  ;;  %v4975_v14 = vsel %vm8042_vm3, %v4970_v3, %v9573_v17  ;;  %v4985_v60 = vsel %vm8042_vm3, %v4980_v2, %v9636_v29  ;;  %v5017_v34 = vor.u32 %v5016_v38, %v5013_v53  ;;  %v5367_v17 = vld [vmem:[#allocation2 + $0xa8] sm:$0xe]  ;;  %v7899_v29 = vld [vmem:[%s9897_s3 + $0x118] sm:$0xff]   ;;  %v7901_v2 = vld [vmem:[#allocation2 + $0x20] sm:$0x1] }
 0x18b   : > { %7446 = vmatpush3.bf16.msra.mxu1 %v7897_v45  ;;  %7378 = vmatmul.mubr.bf16.gmra.mrb[20].mxu0 %v6462_v12  ;;  %v9679_v26 = vsel %vm8453_vm14, %v5500_v6, %v5501_v41  ;;  %v5027_v4 = vor.u32 %v5026_v59, %v9657_v13  ;;  %v5030_v12 = vshll.u32 %v9663_v35, 16  ;;  %v4999_v45 = vsel %vm8042_vm3, %v4994_v25, %v9627_v33  ;;  %v5356_v59 = vld [vmem:[#allocation2 + $0x24] sm:$0xe] }
 0x18c   : > { %7439 = vmatprep.subr.bf16.mxu1 %v7898_v58  ;;  %7381 = vmatprep.mubr.bf16.mxu0 %v6463_v51  ;;  %v6502_v5 = vcombine.low %v9669_v20, %v9679_v26  ;;  %v5009_v42 = vsel %vm8042_vm3, %v5004_v22, %v5008_v16  ;;  %v5421_v61 = vrot.slane %v7900_v48, 5  ;;  %v6464_v0 = vcombine.low %v4975_v14, %v4985_v60  ;;  %v7827_v51 = vld [vmem:[#allocation2 + $0x54] sm:$0xff]   ;;  %v7902_v16 = vld [vmem:[%s9897_s3 + $0x120] sm:$0xff]   ;;  %v7903_v22 = vld [vmem:[#allocation2 + $0x28] sm:$0xf] }
 0x18d   : > { %v6475_v3 = vrot.slane %v5355_v57, 9  ;;  %v5424_v55 = vrot.slane %v7901_v2, 5  ;;  %v5505_v40 = vrot.slane %v9392_v11, 5  ;;  %v5018_v53 = vrot.slane %v5017_v34, 4  ;;  %v7904_v57 = vld [vmem:[#allocation2 + $0x34] sm:$0xf] }
 0x18e   : > { %7170 = vmatmul.mubr.bf16.gmra.mrb[4].mxu1 %v7822_v30  ;;  %v6487_v30 = vrot.slane %v5367_v17, 9  ;;  %v5028_v52 = vrot.slane %v5027_v4, 4  ;;  %v5032_v33 = vrot.slane %v5030_v12, 5  ;;  %v5423_v25 = vrot.slane %v5421_v61, 4  ;;  %v5357_v12 = vld [vmem:[#allocation2 + $0x30] sm:$0xe] }
 0x18f   : > { %7173 = vmatprep.mubr.bf16.mxu1 %v7824_v9  ;;  %7447 = vmatpush3.bf16.msra.mxu1 %v7898_v58  ;;  %v6465_v9 = vcombine.low %v4999_v45, %v5009_v42  ;;  %v5507_v58 = vrot.slane %v5505_v40, 4  ;;  %v5508_v38 = vrot.slane %v9438_v43, 5  ;;  %v6488_v11 = vrot.slane %v5368_v44, 9  ;;  %v7828_v48 = vld [vmem:[#allocation2 + $0x60] sm:$0xff]  }
 0x190   : > { %7440 = vmatprep.subr.bf16.mxu1 %v7899_v29  ;;  %v9699_v41 = vsel %vm8453_vm14, %v6487_v30, %v5505_v40  ;;  %v5428_v6 = vrot.slane %v7903_v22, 5  ;;  %v5512_v60 = vrot.slane %v9503_v46, 5  ;;  %v5515_v34 = vrot.slane %v9565_v7, 5  ;;  %v7830_v30 = vld [vmem:[#allocation2 + $0x6c] sm:$0xff]   ;;  %v5369_v40 = vld [vmem:[#allocation2 + $0xc0] sm:$0xe] }
 0x191   : > { %v9704_v14 = vsel %vm8453_vm14, %v5507_v58, %v5508_v38  ;;  %v5023_v43 = vsel %vm8042_vm3, %v5018_v53, %v9657_v13  ;;  %v5033_v4 = vsel %vm8042_vm3, %v5028_v52, %v5032_v33  ;;  %v5435_v17 = vrot.slane %v7904_v57, 5  ;;  %v7905_v13 = vld [vmem:[%s9897_s3 + $0x128] sm:$0xff]   ;;  %v7907_v53 = vld [vmem:[#allocation2 + $0x38] sm:$0x1]  ;;  %v7909_v22 = vld [vmem:[#allocation2 + $0x40] sm:$0xf] }
 0x192   : > { %v5422_v46 = vsel %vm8453_vm14, %v6475_v3, %v5421_v61  ;;  %v5425_v7 = vsel %vm8453_vm14, %v5423_v25, %v5424_v55  ;;  %v9724_v45 = vsel %vm8453_vm14, %v6488_v11, %v5512_v60  ;;  %v5514_v42 = vrot.slane %v5512_v60, 4  ;;  %v5358_v25 = vld [vmem:[#allocation2 + $0x3c] sm:$0xe]  ;;  %v5370_v38 = vld [vmem:[#allocation2 + $0xcc] sm:$0xe] }
 0x193   : > { %7448 = vmatpush3.bf16.msra.mxu1 %v7899_v29  ;;  %7382 = vmatmul.mubr.bf16.gmra.mrb[24].mxu0 %v6464_v0  ;;  %v6503_v29 = vcombine.low %v9699_v41, %v9704_v14  ;;  %v7906_v0 = vld [vmem:[#allocation2 + $0x2c] sm:$0x1]  ;;  %v6466_v2 = vcombine.low %v5023_v43, %v5033_v4  ;;  %v5430_v61 = vrot.slane %v5428_v6, 4  ;;  %v6477_v3 = vrot.slane %v5357_v12, 9 }
 0x194   : > { %7441 = vmatprep.subr.bf16.mxu1 %v7902_v16  ;;  %7385 = vmatprep.mubr.bf16.mxu0 %v6465_v9  ;;  %v9728_v55 = vsel %vm8453_vm14, %v5514_v42, %v5515_v34  ;;  %v6491_v44 = vcombine.low %v5422_v46, %v5425_v7  ;;  %v5437_v9 = vrot.slane %v5435_v17, 4  ;;  %v5438_v52 = vrot.slane %v7907_v53, 5  ;;  %v2990_v57 = vld [vmem:[#allocation2 + $0x6c] sm:$0xf] }
 0x195   : > { %v6504_v33 = vcombine.low %v9724_v45, %v9728_v55  ;;  %v6489_v58 = vrot.slane %v5369_v40, 9  ;;  %v5442_v60 = vrot.slane %v7909_v22, 5  ;;  %v5436_v34 = vsel %vm8453_vm14, %v6477_v3, %v5435_v17  ;;  %v7912_v40 = vld [vmem:[#allocation2 + $0x70] sm:$0xf] }
 0x196   : > { %7174 = vmatmul.mubr.bf16.gmra.mrb[8].mxu1 %v7825_v54  ;;  %v6476_v54 = vrot.slane %v5356_v59, 9  ;;  %v5439_v43 = vsel %vm8453_vm14, %v5437_v9, %v5438_v52  ;;  %v5519_v4 = vrot.slane %v9558_v37, 5  ;;  %v6478_v12 = vrot.slane %v5358_v25, 9  ;;  %v7832_v37 = vld [vmem:[#allocation2 + $0x84] sm:$0xff]  }
 0x197   : > { %7177 = vmatprep.mubr.bf16.mxu1 %v7827_v51  ;;  %7449 = vmatpush3.bf16.msra.mxu1 %v7902_v16  ;;  %v5431_v51 = vrot.slane %v7906_v0, 5  ;;  %v7908_v16 = vld [vmem:[%s9897_s3 + $0x130] sm:$0xff]   ;;  %v5522_v46 = vrot.slane %v9603_v28, 5  ;;  %v6490_v7 = vrot.slane %v5370_v38, 9  ;;  %v3207_v3 = vshrl.u32 %v2990_v57, 16 }
 0x198   : > { %7442 = vmatprep.subr.bf16.mxu1 %v7905_v13  ;;  %v5429_v11 = vsel %vm8453_vm14, %v6476_v54, %v5428_v6  ;;  %v7910_v6 = vld [vmem:[%s9897_s3 + $0x138] sm:$0xff]   ;;  %v9750_v54 = vsel %vm8453_vm14, %v6489_v58, %v5519_v4  ;;  %v5521_v0 = vrot.slane %v5519_v4, 4  ;;  %v3210_v28 = vshll.u32 %v2990_v57, 16  ;;  %v2996_v57 = vld [vmem:[#allocation2 + $0x84] sm:$0xf] }
 0x199   : > { %v5432_v59 = vsel %vm8453_vm14, %v5430_v61, %v5431_v51  ;;  %v6493_v51 = vcombine.low %v5436_v34, %v5439_v43  ;;  %v5529_v61 = vrot.slane %v9663_v35, 5  ;;  %v3220_v53 = vshrl.u32 %v7912_v40, 16  ;;  %v7833_v43 = vld [vmem:[#allocation2 + $0x90] sm:$0xff]  }
 0x19a   : > { %v6492_v42 = vcombine.low %v5429_v11, %v5432_v59  ;;  %v9756_v9 = vsel %vm8453_vm14, %v5521_v0, %v5522_v46  ;;  %v5443_v35 = vsel %vm8453_vm14, %v6478_v12, %v5442_v60  ;;  %v3209_v38 = vrot.slane %v3207_v3, 4  ;;  %v7913_v46 = vld [vmem:[#allocation2 + $0x74] sm:$0x1] }
 0x19b   : > { %7450 = vmatpush3.bf16.msra.mxu1 %v7905_v13  ;;  %7386 = vmatmul.mubr.bf16.gmra.mrb[28].mxu0 %v6466_v2  ;;  %v7831_v13 = vld [vmem:[#allocation2 + $0x78] sm:$0xff]   ;;  %v5444_v2 = vrot.slane %v5442_v60, 4  ;;  %v6505_v52 = vcombine.low %v9750_v54, %v9756_v9  ;;  %v3212_v11 = vrot.slane %v3210_v28, 5  ;;  %v3222_v34 = vrot.slane %v3220_v53, 4 }
 0x19c   : > { %7443 = vmatprep.subr.bf16.mxu1 %v7908_v16  ;;  %7405 = vmatprep.mubr.bf16.mxu0 %v6491_v44  ;;  %v3216_v44 = vshll.u32 %v7912_v40, 16  ;;  %v9987_v0 = vcombine.low %v9469_v24, %v9482_v49  ;;  %v7836_v3 = vld [vmem:[#allocation2 + $0xb4] sm:$0xff]   ;;  %v7915_v49 = vld [vmem:[#allocation2 + $0x8c] sm:$0x1] }
 0x19d   : > { %v3213_v60 = vor.u32 %v3212_v11, %v3209_v38  ;;  %v3274_v11 = vshll.u32 %v7915_v49, 16  ;;  %v3008_v49 = vld [vmem:[#allocation2 + $0xb4] sm:$0xf] }
 0x19e   : > { %7178 = vmatmul.mubr.bf16.gmra.mrb[12].mxu1 %v7828_v48  ;;  %v7911_v48 = vld [vmem:[#allocation2 + $0x44] sm:$0x1]  ;;  %v3218_v22 = vrot.slane %v3216_v44, 5 }
 0x19f   : > { %7181 = vmatprep.mubr.bf16.mxu1 %v7830_v30  ;;  %7451 = vmatpush3.bf16.msra.mxu1 %v7908_v16  ;;  %v5445_v17 = vrot.slane %v7911_v48, 5  ;;  %v5526_v30 = vrot.slane %v9622_v39, 5  ;;  %v3264_v48 = vshll.u32 %v7914_v50, 16 }
 0x1a0   : > { %7444 = vmatprep.subr.bf16.mxu1 %v7910_v6  ;;  %v3223_v12 = vor.u32 %v3222_v34, %v3218_v22  ;;  %v7916_v34 = vld [vmem:[#allocation2 + $0x94] sm:$0xf] }
 0x1a1   : > { %v9762_v16 = vsel %vm8453_vm14, %v6490_v7, %v5526_v30  ;;  %v5528_v39 = vrot.slane %v5526_v30, 4  ;;  %v5446_v58 = vsel %vm8453_vm14, %v5444_v2, %v5445_v17  ;;  %v3226_v7 = vshll.u32 %v7913_v46, 16 }
 0x1a2   : > { %v6494_v4 = vcombine.low %v5443_v35, %v5446_v58  ;;  %v3268_v17 = vshrl.u32 %v7914_v50, 16  ;;  %v3224_v2 = vrot.slane %v3223_v12, 4  ;;  %v9777_v44 = vrot.slane %v3264_v48, 5  ;;  %v3002_v58 = vld [vmem:[#allocation2 + $0x9c] sm:$0xf] }
 0x1a3   : > { %7452 = vmatpush3.bf16.msra.mxu1 %v7910_v6  ;;  %7406 = vmatmul.mubr.bf16.vlgmr.msra.gmra.mrb[0].mxu0 %v6492_v42  ;;  %v9768_v25 = vsel %vm8453_vm14, %v5528_v39, %v5529_v61  ;;  %v7834_v6 = vld [vmem:[#allocation2 + $0x9c] sm:$0xff]   ;;  %v3258_v42 = vshll.u32 %v2996_v57, 16  ;;  %v3228_v30 = vrot.slane %v3226_v7, 5  ;;  %v7835_v61 = vld [vmem:[#allocation2 + $0xa8] sm:$0xff]   ;;  %v9988_v7 = vcombine.low %v9474_v19, %v9496_v15 }
 0x1a4   : > { %7409 = vmatprep.mubr.bf16.mxu0 %v6493_v51  ;;  %v6506_v59 = vcombine.low %v9762_v16, %v9768_v25  ;;  %v2999_v51 = vld [vmem:[#allocation2 + $0x90] sm:$0xf]  ;;  %v3270_v53 = vrot.slane %v3268_v17, 4  ;;  %v9989_v48 = vcombine.low %v9486_v1, %v9509_v21  ;;  %v7837_v17 = vld [vmem:[#allocation2 + $0xc0] sm:$0xff]  }
 0x1a5   : > { %v3260_v40 = vrot.slane %v3258_v42, 5  ;;  %v3279_v39 = vshrl.u32 %v2999_v51, 16  ;;  %v3282_v35 = vshll.u32 %v2999_v51, 16  ;;  %v3229_v24 = vsel %vm8042_vm3, %v3224_v2, %v3228_v30  ;;  %v7919_v21 = vld [vmem:[#allocation2 + $0xa4] sm:$0x1] }
 0x1a6   : > { %7182 = vmatmul.mubr.bf16.gmra.mrb[16].mxu1 %v7831_v13  ;;  %v3255_v13 = vshrl.u32 %v2996_v57, 16  ;;  %v3306_v57 = vshll.u32 %v3002_v58, 16 }
 0x1a7   : > { %7185 = vmatprep.mubr.bf16.mxu1 %v7832_v37  ;;  %v3214_v37 = vrot.slane %v3213_v60, 4  ;;  %v7917_v60 = vld [vmem:[#allocation2 + $0xa0] sm:$0xf]  ;;  %v3281_v42 = vrot.slane %v3279_v39, 4  ;;  %v3284_v50 = vrot.slane %v3282_v35, 5 }
 0x1a8   : > { %v3257_v28 = vrot.slane %v3255_v13, 4  ;;  %v3312_v12 = vshll.u32 %v7917_v60, 16  ;;  %v3316_v46 = vshrl.u32 %v7917_v60, 16  ;;  %v3271_v13 = vor.u32 %v3270_v53, %v9777_v44  ;;  %v7918_v39 = vld [vmem:[#allocation2 + $0x98] sm:$0x1] }
 0x1a9   : > { %v3219_v38 = vsel %vm8042_vm3, %v3214_v37, %v3218_v22  ;;  %v3276_v37 = vrot.slane %v3274_v11, 5  ;;  %v3285_v53 = vor.u32 %v3284_v50, %v3281_v42  ;;  %v3298_v35 = vshll.u32 %v7918_v39, 16  ;;  %v7921_v50 = vld [vmem:[#allocation2 + $0xb8] sm:$0xf] }
 0x1aa   : > { %v3261_v22 = vor.u32 %v3260_v40, %v3257_v28  ;;  %v9792_v15 = vrot.slane %v3312_v12, 5  ;;  %v3318_v19 = vrot.slane %v3316_v46, 4  ;;  %v3272_v40 = vrot.slane %v3271_v13, 4 }
 0x1ab   : > { %7410 = vmatmul.mubr.bf16.gmra.mrb[4].mxu0 %v6494_v4  ;;  %v3292_v4 = vshrl.u32 %v7916_v34, 16  ;;  %v3351_v13 = vshrl.u32 %v3008_v49, 16  ;;  %v3354_v42 = vshll.u32 %v3008_v49, 16  ;;  %v3378_v49 = vshll.u32 %v3011_v18, 16 }
 0x1ac   : > { %7413 = vmatprep.mubr.bf16.mxu0 %v9987_v0  ;;  %v6371_v0 = vcombine.low %v3219_v38, %v3229_v24  ;;  %v3262_v28 = vrot.slane %v3261_v22, 4  ;;  %v3277_v46 = vsel %vm8042_vm3, %v3272_v40, %v3276_v37  ;;  %v3300_v22 = vrot.slane %v3298_v35, 5  ;;  %v7922_v35 = vld [vmem:[#allocation2 + $0xb0] sm:$0x1] }
 0x1ad   : > { %v3294_v2 = vrot.slane %v3292_v4, 4  ;;  %v3356_v40 = vrot.slane %v3354_v42, 5 }
 0x1ae   : > { %7186 = vmatmul.mubr.bf16.gmra.mrb[20].mxu1 %v7833_v43  ;;  %v3288_v43 = vshll.u32 %v7916_v34, 16  ;;  %v3319_v34 = vor.u32 %v3318_v19, %v9792_v15  ;;  %v3267_v12 = vsel %vm8042_vm3, %v3262_v28, %v9777_v44  ;;  %v3353_v28 = vrot.slane %v3351_v13, 4 }
 0x1af   : > { %7189 = vmatprep.mubr.bf16.mxu1 %v7834_v6  ;;  %v3303_v6 = vshrl.u32 %v3002_v58, 16  ;;  %v3322_v58 = vshll.u32 %v7919_v21, 16  ;;  %v6373_v37 = vcombine.low %v3267_v12, %v3277_v46 }
 0x1b0   : > { %v9790_v51 = vrot.slane %v3288_v43, 5  ;;  %v7920_v43 = vld [vmem:[#allocation2 + $0xac] sm:$0xf]  ;;  %v3320_v44 = vrot.slane %v3319_v34, 4 }
 0x1b1   : > { %v3305_v30 = vrot.slane %v3303_v6, 4  ;;  %v3336_v4 = vshll.u32 %v7920_v43, 16  ;;  %v3340_v6 = vshrl.u32 %v7920_v43, 16 }
 0x1b2   : > { %v3295_v1 = vor.u32 %v3294_v2, %v9790_v51 }
 0x1b3   : > { %7414 = vmatmul.mubr.bf16.gmra.mrb[8].mxu0 %v9988_v7  ;;  %v3286_v7 = vrot.slane %v3285_v53, 4  ;;  %v3338_v19 = vrot.slane %v3336_v4, 5  ;;  %v7924_v4 = vld [vmem:[#allocation2 + $0xbc] sm:$0x1] }
 0x1b4   : > { %7417 = vmatprep.mubr.bf16.mxu0 %v9989_v48  ;;  %v3360_v48 = vshll.u32 %v7921_v50, 16 }
 0x1b5   : > { %v3291_v56 = vsel %vm8042_vm3, %v3286_v7, %v9790_v51  ;;  %v3375_v51 = vshrl.u32 %v3011_v18, 16 }
 0x1b6   : > { %7190 = vmatmul.mubr.bf16.gmra.mrb[24].mxu1 %v7835_v61  ;;  %v3308_v61 = vrot.slane %v3306_v57, 5  ;;  %v9990_v57 = vld [vmem:[#allocation4_spill] sm:$0xff]  ;;  %v3362_v53 = vrot.slane %v3360_v48, 5 }
 0x1b7   : > { %7193 = vmatprep.mubr.bf16.mxu1 %v7836_v3  ;;  %v3005_v3 = vld [vmem:[#allocation2 + $0xa8] sm:$0xf]  ;;  %v9991_v60 = vcombine.low %v9513_v62, %v9990_v57  ;;  %v3364_v62 = vshrl.u32 %v7921_v50, 16  ;;  %v3377_v23 = vrot.slane %v3375_v51, 4 }
 0x1b8   : > { %v3327_v38 = vshrl.u32 %v3005_v3, 16  ;;  %v3330_v24 = vshll.u32 %v3005_v3, 16  ;;  %v3309_v11 = vor.u32 %v3308_v61, %v3305_v30  ;;  %v3342_v3 = vrot.slane %v3340_v6, 4 }
 0x1b9   : > { %v3366_v39 = vrot.slane %v3364_v62, 4  ;;  %v3370_v6 = vshll.u32 %v7924_v4, 16  ;;  %v7925_v62 = vld [vmem:[#allocation2 + $0xc8] sm:$0x1] }
 0x1ba   : > { %v3329_v2 = vrot.slane %v3327_v38, 4  ;;  %v3332_v30 = vrot.slane %v3330_v24, 5  ;;  %v3310_v61 = vrot.slane %v3309_v11, 4  ;;  %v3343_v24 = vor.u32 %v3342_v3, %v3338_v19  ;;  %v7923_v11 = vld [vmem:[#allocation2 + $0xc4] sm:$0xf] }
 0x1bb   : > { %7418 = vmatmul.mubr.bf16.gmra.mrb[12].mxu0 %v9991_v60  ;;  %v3384_v34 = vshll.u32 %v7923_v11, 16  ;;  %v3388_v43 = vshrl.u32 %v7923_v11, 16  ;;  %v3372_v50 = vrot.slane %v3370_v6, 5 }
 0x1bc   : > { %7421 = vmatprep.mubr.bf16.mxu0 %v6499_v63  ;;  %v3315_v21 = vsel %vm8042_vm3, %v3310_v61, %v9792_v15  ;;  %v3333_v38 = vor.u32 %v3332_v30, %v3329_v2  ;;  %v3367_v15 = vor.u32 %v3366_v39, %v3362_v53  ;;  %v3344_v46 = vrot.slane %v3343_v24, 4 }
 0x1bd   : > { %v3386_v7 = vrot.slane %v3384_v34, 5 }
 0x1be   : > { %7194 = vmatmul.mubr.bf16.gmra.mrb[28].mxu1 %v7837_v17  ;;  %v3296_v17 = vrot.slane %v3295_v1, 4  ;;  %v3346_v1 = vshll.u32 %v7922_v35, 16  ;;  %v3334_v12 = vrot.slane %v3333_v38, 4  ;;  %v3368_v42 = vrot.slane %v3367_v15, 4 }
 0x1bf   : > { %7229 = vmatprep.mubr.bf16.mxu1 %v6371_v0  ;;  %v3324_v0 = vrot.slane %v3322_v58, 5 }
 0x1c0   : > { %v3301_v63 = vsel %vm8042_vm3, %v3296_v17, %v3300_v22  ;;  %v3348_v36 = vrot.slane %v3346_v1, 5  ;;  %v3390_v22 = vrot.slane %v3388_v43, 4  ;;  %v3339_v10 = vsel %vm8042_vm3, %v3334_v12, %v3338_v19 }
 0x1c1   : > { %v3325_v58 = vsel %vm8042_vm3, %v3320_v44, %v3324_v0  ;;  %v6374_v57 = vcombine.low %v3291_v56, %v3301_v63  ;;  %v3394_v17 = vshll.u32 %v7925_v62, 16  ;;  %v3373_v2 = vsel %vm8042_vm3, %v3368_v42, %v3372_v50 }
 0x1c2   : > { %v6375_v60 = vcombine.low %v3315_v21, %v3325_v58  ;;  %v3349_v8 = vsel %vm8042_vm3, %v3344_v46, %v3348_v36  ;;  %v3391_v48 = vor.u32 %v3390_v22, %v3386_v7 }
 0x1c3   : > { %7422 = vmatmul.mubr.bf16.gmra.mrb[16].mxu0 %v6500_v27  ;;  %v3380_v27 = vrot.slane %v3378_v49, 5  ;;  %v6376_v20 = vcombine.low %v3339_v10, %v3349_v8  ;;  %v3396_v61 = vrot.slane %v3394_v17, 5 }
 0x1c4   : > { %7425 = vmatprep.mubr.bf16.mxu0 %v6501_v47  ;;  %v3392_v30 = vrot.slane %v3391_v48, 4 }
 0x1c5   : > { %v3381_v47 = vor.u32 %v3380_v27, %v3377_v23 }
 0x1c6   : > { %7230 = vmatmul.mubr.bf16.vlgmr.msra.gmra.mrb[16].mxu1 %v9605_v31  ;;  %v3357_v31 = vor.u32 %v3356_v40, %v3353_v28  ;;  %v3397_v14 = vsel %vm8042_vm3, %v3392_v30, %v3396_v61 }
 0x1c7   : > { %7233 = vmatprep.mubr.bf16.mxu1 %v6373_v37 }
 0x1c8   : > { %v3358_v13 = vrot.slane %v3357_v31, 4 }
 0x1ca   : > { %v3363_v0 = vsel %vm8042_vm3, %v3358_v13, %v3362_v53 }
 0x1cb   : > { %7426 = vmatmul.mubr.bf16.gmra.mrb[20].mxu0 %v6502_v5  ;;  %v6377_v26 = vcombine.low %v3363_v0, %v3373_v2  ;;  %v3382_v5 = vrot.slane %v3381_v47, 4 }
 0x1cc   : > { %7429 = vmatprep.mubr.bf16.mxu0 %v6503_v29 }
 0x1cd   : > { %v3387_v41 = vsel %vm8042_vm3, %v3382_v5, %v3386_v7 }
 0x1ce   : > { %7234 = vmatmul.mubr.bf16.gmra.mrb[20].mxu1 %v6374_v57  ;;  %v6378_v29 = vcombine.low %v3387_v41, %v3397_v14 }
 0x1cf   : > { %7237 = vmatprep.mubr.bf16.mxu1 %v6375_v60 }
 0x1d3   : > { %7430 = vmatmul.mubr.bf16.gmra.mrb[24].mxu0 %v6504_v33 }
 0x1d4   : > { %7433 = vmatprep.mubr.bf16.mxu0 %v6505_v52 }
 0x1d6   : > { %7238 = vmatmul.mubr.bf16.gmra.mrb[24].mxu1 %v6376_v20 }
 0x1d7   : > { %7241 = vmatprep.mubr.bf16.mxu1 %v6377_v26 }
 0x1db   : > { %7434 = vmatmul.mubr.bf16.gmra.mrb[28].mxu0 %v6506_v59 }
 0x1de   : > { %7242 = vmatmul.mubr.bf16.gmra.mrb[28].mxu1 %v6378_v29 }
 0x259   : > { %v7167_v44 = vpop.f32.mrb[0].mxu1 }
 0x25a   : > { %v2807_v45 = vpop.f32.mrb[1].mxu1 }
 0x25b   : > { %v7168_v55 = vpop.f32.mrb[2].mxu1 }
 0x25c   : > { %v2810_v33 = vpop.f32.mrb[3].mxu1 }
 0x261   : > { %v7171_v19 = vpop.f32.mrb[4].mxu1 }
 0x262   : > { %v2823_v3 = vpop.f32.mrb[5].mxu1 }
 0x263   : > { %v7172_v37 = vpop.f32.mrb[6].mxu1 }
 0x264   : > { %v2826_v28 = vpop.f32.mrb[7].mxu1 }
 0x269   : > { %v7175_v32 = vpop.f32.mrb[8].mxu1 }
 0x26a   : > { %v2839_v40 = vpop.f32.mrb[9].mxu1 }
 0x26b   : > { %v7176_v53 = vpop.f32.mrb[10].mxu1 }
 0x26c   : > { %v2842_v54 = vpop.f32.mrb[11].mxu1 }
 0x271   : > { %v9851_v9 = vpop.f32.mrb[12].mxu1 }
 0x272   : > { %v9853_v52 = vpop.f32.mrb[13].mxu1 }
 0x273   : > { %v9855_v39 = vpop.f32.mrb[14].mxu1 }
 0x274   : > { %v9857_v16 = vpop.f32.mrb[15].mxu1 }
 0x276   : > { %v7407_v25 = vpop.f32.mrb[0].mxu0 }
 0x277   : > { %v7453_v59 = vadd.f32 %v7407_v25, %v7167_v44  ;;  %v5693_v18 = vpop.f32.mrb[1].mxu0 }
 0x278   : > { %v7454_v56 = vadd.f32 %v5693_v18, %v2807_v45  ;;  %v7408_v63 = vpop.f32.mrb[2].mxu0 }
 0x279   : > { %v7455_v35 = vadd.f32 %v7408_v63, %v7168_v55  ;;  %v5696_v1 = vpop.f32.mrb[3].mxu0  ;;  %v5891_v11 = vmul.f32 %v7453_v59, %v7453_v59 }
 0x27a   : > { %v7456_v21 = vadd.f32 %v5696_v1, %v2810_v33  ;;  %v5889_v38 = vmul.f32 %v7454_v56, %v7454_v56 }
 0x27b   : > { %v6687_v58 = vpack.c.bf16 %v7455_v35, %v7453_v59  ;;  %v5892_v6 = vmul.f32 %v7455_v35, %v7455_v35 }
 0x27c   : > { %v5852_v24 = vadd.f32 %v7456_v21, %v7454_v56  ;;  %v5890_v51 = vmul.f32 %v7456_v21, %v7456_v21  ;;  %v6682_v49 = vpack.c.bf16 %v7456_v21, %v7454_v56 }
 0x27d   : > { %6774 = vst [vmem:[%s9864_s26 + $0x8] sm:$0xff] %v6687_v58  }
 0x27e   : > { %v5853_v34 = vadd.f32 %v7453_v59, %v5852_v24  ;;  %v5921_v43 = vadd.f32 %v5890_v51, %v5889_v38  ;;  %6683 = vst [vmem:[%s9864_s26] sm:$0xff] %v6682_v49   ;;  %v7411_v31 = vpop.f32.mrb[4].mxu0 }
 0x27f   : > { %v7457_v15 = vadd.f32 %v7411_v31, %v7171_v19  ;;  %v5709_v4 = vpop.f32.mrb[5].mxu0 }
 0x280   : > { %v5922_v57 = vadd.f32 %v5921_v43, %v5891_v11  ;;  %v7458_v60 = vadd.f32 %v5709_v4, %v2823_v3  ;;  %v5854_v12 = vadd.f32 %v7455_v35, %v5853_v34  ;;  %v7412_v46 = vpop.f32.mrb[6].mxu0 }
 0x281   : > { %v7459_v36 = vadd.f32 %v7412_v46, %v7172_v37  ;;  %v5712_v23 = vpop.f32.mrb[7].mxu0  ;;  %v5895_v48 = vmul.f32 %v7457_v15, %v7457_v15 }
 0x282   : > { %v5855_v27 = vadd.f32 %v7458_v60, %v5854_v12  ;;  %v5893_v7 = vmul.f32 %v7458_v60, %v7458_v60  ;;  %v5923_v22 = vadd.f32 %v5922_v57, %v5892_v6  ;;  %v7460_v13 = vadd.f32 %v5712_v23, %v2826_v28 }
 0x283   : > { %v6697_v42 = vpack.c.bf16 %v7459_v36, %v7457_v15  ;;  %v5896_v26 = vmul.f32 %v7459_v36, %v7459_v36 }
 0x284   : > { %v5924_v50 = vadd.f32 %v5923_v22, %v5893_v7  ;;  %v5856_v10 = vadd.f32 %v7460_v13, %v5855_v27  ;;  %v5894_v8 = vmul.f32 %v7460_v13, %v7460_v13  ;;  %v6692_v47 = vpack.c.bf16 %v7460_v13, %v7458_v60 }
 0x285   : > { %6776 = vst [vmem:[%s9864_s26 + $0x18] sm:$0xff] %v6697_v42  }
 0x286   : > { %v5857_v62 = vadd.f32 %v7457_v15, %v5856_v10  ;;  %v5925_v17 = vadd.f32 %v5924_v50, %v5894_v8  ;;  %6775 = vst [vmem:[%s9864_s26 + $0x10] sm:$0xff] %v6692_v47   ;;  %v7415_v0 = vpop.f32.mrb[8].mxu0 }
 0x287   : > { %v7461_v2 = vadd.f32 %v7415_v0, %v7175_v32  ;;  %v5725_v20 = vpop.f32.mrb[9].mxu0 }
 0x288   : > { %v5926_v5 = vadd.f32 %v5925_v17, %v5895_v48  ;;  %v7462_v30 = vadd.f32 %v5725_v20, %v2839_v40  ;;  %v5858_v61 = vadd.f32 %v7459_v36, %v5857_v62  ;;  %v7416_v41 = vpop.f32.mrb[10].mxu0 }
 0x289   : > { %v7463_v14 = vadd.f32 %v7416_v41, %v7176_v53  ;;  %v5728_v29 = vpop.f32.mrb[11].mxu0  ;;  %v5899_v32 = vmul.f32 %v7461_v2, %v7461_v2 }
 0x28a   : > { %v5859_v44 = vadd.f32 %v7462_v30, %v5858_v61  ;;  %v5897_v45 = vmul.f32 %v7462_v30, %v7462_v30  ;;  %v5927_v55 = vadd.f32 %v5926_v5, %v5896_v26  ;;  %v7464_v33 = vadd.f32 %v5728_v29, %v2842_v54 }
 0x28b   : > { %v6707_v19 = vpack.c.bf16 %v7463_v14, %v7461_v2  ;;  %v5900_v53 = vmul.f32 %v7463_v14, %v7463_v14 }
 0x28c   : > { %v5928_v3 = vadd.f32 %v5927_v55, %v5897_v45  ;;  %v5860_v37 = vadd.f32 %v7464_v33, %v5859_v44  ;;  %v5898_v28 = vmul.f32 %v7464_v33, %v7464_v33  ;;  %v6702_v25 = vpack.c.bf16 %v7464_v33, %v7462_v30 }
 0x28d   : > { %6778 = vst [vmem:[%s9864_s26 + $0x28] sm:$0xff] %v6707_v19  }
 0x28e   : > { %v5861_v59 = vadd.f32 %v7461_v2, %v5860_v37  ;;  %v5929_v18 = vadd.f32 %v5928_v3, %v5898_v28  ;;  %6777 = vst [vmem:[%s9864_s26 + $0x20] sm:$0xff] %v6702_v25   ;;  %v7419_v40 = vpop.f32.mrb[12].mxu0 }
 0x28f   : > { %v7465_v56 = vadd.f32 %v7419_v40, %v9851_v9  ;;  %v5741_v63 = vpop.f32.mrb[13].mxu0 }
 0x290   : > { %v5930_v35 = vadd.f32 %v5929_v18, %v5899_v32  ;;  %v7466_v1 = vadd.f32 %v5741_v63, %v9853_v52  ;;  %v5862_v54 = vadd.f32 %v7463_v14, %v5861_v59  ;;  %v7420_v21 = vpop.f32.mrb[14].mxu0 }
 0x291   : > { %v7467_v58 = vadd.f32 %v7420_v21, %v9855_v39  ;;  %v5744_v38 = vpop.f32.mrb[15].mxu0  ;;  %v5903_v6 = vmul.f32 %v7465_v56, %v7465_v56 }
 0x292   : > { %v5863_v24 = vadd.f32 %v7466_v1, %v5862_v54  ;;  %v5901_v51 = vmul.f32 %v7466_v1, %v7466_v1  ;;  %v5931_v49 = vadd.f32 %v5930_v35, %v5900_v53  ;;  %v7468_v11 = vadd.f32 %v5744_v38, %v9857_v16 }
 0x293   : > { %v6717_v34 = vpack.c.bf16 %v7467_v58, %v7465_v56  ;;  %v5904_v23 = vmul.f32 %v7467_v58, %v7467_v58 }
 0x294   : > { %v5932_v43 = vadd.f32 %v5931_v49, %v5901_v51  ;;  %v5864_v9 = vadd.f32 %v7468_v11, %v5863_v24  ;;  %v5902_v31 = vmul.f32 %v7468_v11, %v7468_v11  ;;  %v6712_v15 = vpack.c.bf16 %v7468_v11, %v7466_v1 }
 0x295   : > { %6780 = vst [vmem:[%s9864_s26 + $0x38] sm:$0xff] %v6717_v34  }
 0x296   : > { %v5865_v52 = vadd.f32 %v7465_v56, %v5864_v9  ;;  %v5933_v57 = vadd.f32 %v5932_v43, %v5902_v31  ;;  %6779 = vst [vmem:[%s9864_s26 + $0x30] sm:$0xff] %v6712_v15   ;;  %v7423_v39 = vpop.f32.mrb[16].mxu0 }
 0x297   : > { %v5757_v36 = vpop.f32.mrb[17].mxu0 }
 0x298   : > { %v5934_v27 = vadd.f32 %v5933_v57, %v5903_v6  ;;  %v5866_v7 = vadd.f32 %v7467_v58, %v5865_v52  ;;  %v7424_v13 = vpop.f32.mrb[18].mxu0 }
 0x299   : > { %v7231_v4 = vpop.f32.mrb[16].mxu1  ;;  %v5760_v50 = vpop.f32.mrb[19].mxu0 }
 0x29a   : > { %v3624_v60 = vpop.f32.mrb[17].mxu1  ;;  %v7469_v12 = vadd.f32 %v7423_v39, %v7231_v4  ;;  %v5935_v47 = vadd.f32 %v5934_v27, %v5904_v23 }
 0x29b   : > { %v7232_v46 = vpop.f32.mrb[18].mxu1  ;;  %v7470_v16 = vadd.f32 %v5757_v36, %v3624_v60 }
 0x29c   : > { %v3627_v22 = vpop.f32.mrb[19].mxu1  ;;  %v7471_v42 = vadd.f32 %v7424_v13, %v7232_v46  ;;  %v5907_v5 = vmul.f32 %v7469_v12, %v7469_v12 }
 0x29d   : > { %v5867_v10 = vadd.f32 %v7470_v16, %v5866_v7  ;;  %v5905_v8 = vmul.f32 %v7470_v16, %v7470_v16  ;;  %v7472_v48 = vadd.f32 %v5760_v50, %v3627_v22 }
 0x29e   : > { %v6727_v62 = vpack.c.bf16 %v7471_v42, %v7469_v12  ;;  %v7427_v14 = vpop.f32.mrb[20].mxu0  ;;  %v5908_v55 = vmul.f32 %v7471_v42, %v7471_v42 }
 0x29f   : > { %v5936_v17 = vadd.f32 %v5935_v47, %v5905_v8  ;;  %v5868_v0 = vadd.f32 %v7472_v48, %v5867_v10  ;;  %v5906_v2 = vmul.f32 %v7472_v48, %v7472_v48  ;;  %v6722_v20 = vpack.c.bf16 %v7472_v48, %v7470_v16  ;;  %v5773_v45 = vpop.f32.mrb[21].mxu0 }
 0x2a0   : > { %6782 = vst [vmem:[%s9864_s26 + $0x48] sm:$0xff] %v6727_v62   ;;  %v7428_v28 = vpop.f32.mrb[22].mxu0 }
 0x2a1   : > { %v7235_v26 = vpop.f32.mrb[20].mxu1  ;;  %v5869_v30 = vadd.f32 %v7469_v12, %v5868_v0  ;;  %v5937_v61 = vadd.f32 %v5936_v17, %v5906_v2  ;;  %6781 = vst [vmem:[%s9864_s26 + $0x40] sm:$0xff] %v6722_v20   ;;  %v5776_v32 = vpop.f32.mrb[23].mxu0 }
 0x2a2   : > { %v3640_v41 = vpop.f32.mrb[21].mxu1  ;;  %v7473_v29 = vadd.f32 %v7427_v14, %v7235_v26 }
 0x2a3   : > { %v7236_v44 = vpop.f32.mrb[22].mxu1  ;;  %v5938_v33 = vadd.f32 %v5937_v61, %v5907_v5  ;;  %v7474_v19 = vadd.f32 %v5773_v45, %v3640_v41  ;;  %v5870_v3 = vadd.f32 %v7471_v42, %v5869_v30 }
 0x2a4   : > { %v3643_v37 = vpop.f32.mrb[23].mxu1  ;;  %v7475_v25 = vadd.f32 %v7428_v28, %v7236_v44  ;;  %v5911_v58 = vmul.f32 %v7473_v29, %v7473_v29 }
 0x2a5   : > { %v5871_v59 = vadd.f32 %v7474_v19, %v5870_v3  ;;  %v5909_v18 = vmul.f32 %v7474_v19, %v7474_v19  ;;  %v5939_v40 = vadd.f32 %v5938_v33, %v5908_v55  ;;  %v7476_v56 = vadd.f32 %v5776_v32, %v3643_v37 }
 0x2a6   : > { %v6737_v63 = vpack.c.bf16 %v7475_v25, %v7473_v29  ;;  %v7431_v49 = vpop.f32.mrb[24].mxu0  ;;  %v5912_v9 = vmul.f32 %v7475_v25, %v7475_v25 }
 0x2a7   : > { %v5940_v53 = vadd.f32 %v5939_v40, %v5909_v18  ;;  %v5872_v35 = vadd.f32 %v7476_v56, %v5871_v59  ;;  %v5910_v1 = vmul.f32 %v7476_v56, %v7476_v56  ;;  %v6732_v54 = vpack.c.bf16 %v7476_v56, %v7474_v19  ;;  %v5789_v43 = vpop.f32.mrb[25].mxu0 }
 0x2a8   : > { %6784 = vst [vmem:[%s9864_s26 + $0x58] sm:$0xff] %v6737_v63   ;;  %v7432_v52 = vpop.f32.mrb[26].mxu0 }
 0x2a9   : > { %v7239_v21 = vpop.f32.mrb[24].mxu1  ;;  %v5873_v38 = vadd.f32 %v7473_v29, %v5872_v35  ;;  %v5941_v24 = vadd.f32 %v5940_v53, %v5910_v1  ;;  %6783 = vst [vmem:[%s9864_s26 + $0x50] sm:$0xff] %v6732_v54   ;;  %v5792_v60 = vpop.f32.mrb[27].mxu0 }
 0x2aa   : > { %v3656_v51 = vpop.f32.mrb[25].mxu1  ;;  %v7477_v11 = vadd.f32 %v7431_v49, %v7239_v21 }
 0x2ab   : > { %v7240_v34 = vpop.f32.mrb[26].mxu1  ;;  %v5942_v31 = vadd.f32 %v5941_v24, %v5911_v58  ;;  %v7478_v15 = vadd.f32 %v5789_v43, %v3656_v51  ;;  %v5874_v4 = vadd.f32 %v7475_v25, %v5873_v38 }
 0x2ac   : > { %v3659_v6 = vpop.f32.mrb[27].mxu1  ;;  %v7479_v57 = vadd.f32 %v7432_v52, %v7240_v34  ;;  %v5915_v42 = vmul.f32 %v7477_v11, %v7477_v11 }
 0x2ad   : > { %v5875_v39 = vadd.f32 %v7478_v15, %v5874_v4  ;;  %v5913_v12 = vmul.f32 %v7478_v15, %v7478_v15  ;;  %v5943_v46 = vadd.f32 %v5942_v31, %v5912_v9  ;;  %v7480_v36 = vadd.f32 %v5792_v60, %v3659_v6 }
 0x2ae   : > { %v6747_v23 = vpack.c.bf16 %v7479_v57, %v7477_v11  ;;  %v7435_v47 = vpop.f32.mrb[28].mxu0  ;;  %v5916_v0 = vmul.f32 %v7479_v57, %v7479_v57 }
 0x2af   : > { %v5944_v27 = vadd.f32 %v5943_v46, %v5913_v12  ;;  %v5876_v16 = vadd.f32 %v7480_v36, %v5875_v39  ;;  %v5914_v7 = vmul.f32 %v7480_v36, %v7480_v36  ;;  %v6742_v22 = vpack.c.bf16 %v7480_v36, %v7478_v15  ;;  %v5805_v17 = vpop.f32.mrb[29].mxu0 }
 0x2b0   : > { %6786 = vst [vmem:[%s9864_s26 + $0x68] sm:$0xff] %v6747_v23   ;;  %v7436_v30 = vpop.f32.mrb[30].mxu0 }
 0x2b1   : > { %v7243_v13 = vpop.f32.mrb[28].mxu1  ;;  %v5877_v50 = vadd.f32 %v7477_v11, %v5876_v16  ;;  %v5945_v10 = vadd.f32 %v5944_v27, %v5914_v7  ;;  %6785 = vst [vmem:[%s9864_s26 + $0x60] sm:$0xff] %v6742_v22   ;;  %v5808_v41 = vpop.f32.mrb[31].mxu0 }
 0x2b2   : > { %v3672_v8 = vpop.f32.mrb[29].mxu1  ;;  %v7481_v48 = vadd.f32 %v7435_v47, %v7243_v13 }
 0x2b3   : > { %v7244_v62 = vpop.f32.mrb[30].mxu1  ;;  %v5946_v2 = vadd.f32 %v5945_v10, %v5915_v42  ;;  %v7482_v20 = vadd.f32 %v5805_v17, %v3672_v8  ;;  %v5878_v26 = vadd.f32 %v7479_v57, %v5877_v50 }
 0x2b4   : > { %v3675_v5 = vpop.f32.mrb[31].mxu1  ;;  %v7483_v61 = vadd.f32 %v7436_v30, %v7244_v62  ;;  %v5919_v28 = vmul.f32 %v7481_v48, %v7481_v48 }
 0x2b5   : > { %v5879_v14 = vadd.f32 %v7482_v20, %v5878_v26  ;;  %v5917_v29 = vmul.f32 %v7482_v20, %v7482_v20  ;;  %v5947_v44 = vadd.f32 %v5946_v2, %v5916_v0  ;;  %v7484_v45 = vadd.f32 %v5808_v41, %v3675_v5 }
 0x2b6   : > { %v6757_v55 = vpack.c.bf16 %v7483_v61, %v7481_v48  ;;  %v5920_v59 = vmul.f32 %v7483_v61, %v7483_v61 }
 0x2b7   : > { %v5948_v33 = vadd.f32 %v5947_v44, %v5917_v29  ;;  %v5880_v19 = vadd.f32 %v7484_v45, %v5879_v14  ;;  %v5918_v3 = vmul.f32 %v7484_v45, %v7484_v45  ;;  %v6752_v37 = vpack.c.bf16 %v7484_v45, %v7482_v20 }
 0x2b8   : > { %6788 = vst [vmem:[%s9864_s26 + $0x78] sm:$0xff] %v6757_v55  }
 0x2b9   : > { %v5881_v25 = vadd.f32 %v7481_v48, %v5880_v19  ;;  %v5949_v32 = vadd.f32 %v5948_v33, %v5918_v3  ;;  %6787 = vst [vmem:[%s9864_s26 + $0x70] sm:$0xff] %v6752_v37  }
 0x2bb   : > { %v5882_v18 = vadd.f32 %v7483_v61, %v5881_v25  ;;  %v5950_v40 = vadd.f32 %v5949_v32, %v5919_v28 }
 0x2bd   : > { %v5883_v56 = vrot.slane %v5882_v18, 4  ;;  %v5951_v63 = vadd.f32 %v5950_v40, %v5920_v59 }
 0x2bf   : > { %v5884_v53 = vadd.f32 %v5883_v56, %v5882_v18  ;;  %v5952_v35 = vrot.slane %v5951_v63, 4 }
 0x2c1   : > { %v5885_v1 = vrot.slane %v5884_v53, 2  ;;  %v5953_v54 = vadd.f32 %v5952_v35, %v5951_v63 }
 0x2c3   : > { %v5886_v21 = vadd.f32 %v5885_v1, %v5884_v53  ;;  %v5954_v58 = vrot.slane %v5953_v54, 2 }
 0x2c5   : > { %v5887_v38 = vrot.slane %v5886_v21, 1  ;;  %v5955_v24 = vadd.f32 %v5954_v58, %v5953_v54 }
 0x2c7   : > { %v5956_v51 = vrot.slane %v5955_v24, 1  ;;  %v5888_v49 = vadd.f32 %v5887_v38, %v5886_v21 }
 0x2c9   : > { %v5957_v11 = vadd.f32 %v5956_v51, %v5955_v24 }
 0x2cb   : > { %v5959_v34 = vsel %vm435_vm1, %v5888_v49, %v5957_v11 }
 0x2cc   : > { %5960 = vst [vmem:[%s235_s29] sm:$0x3] %v5959_v34 }
 0x2cd PF: > { %s16_s18 = sadd.s32 1, %s7932_s18  }
 0x2ce   : > { %p13_p4 = scmp.ge.s32.totalorder %s16_s18, 4  }
 0x2d0   :  { %15 = sbr.rel (!%p13_p4) target bundleno = 1 (0x1), region = 81 }

</bundles_post_ra>
